<compile_context>
chip_gen: v5e
topology: v5e:2x2
jax: 0.10.0
libtpu: 0.0.40
codegen_flags: <defaults>
</compile_context>

<pallas_src>
import functools

import jax
import jax.numpy as jnp
from jax import lax
from jax.experimental import pallas as pl
from jax.experimental.pallas import tpu as pltpu


def _round_up(v, m):
    return ((v + m - 1) // m) * m


# ---------------- fused Pallas kernel ----------------
# One grid step processes `nb` batch images.  Per image, the activation lives as
# (C, H*W) in the center of a halo-padded VMEM scratch for the whole layer stack.
# Each 3x3 conv layer = sum over 9 taps of W_tap(C,C) @ shifted_window(C, H*W),
# with bias (+ residual + ReLU for the middle blocks) fused in the epilogue.

def _resid_cnn_fused_kernel(x_ref, w_ref, b_ref, mask_ref, out_ref, xpad_ref,
                            *, H, W, C, n_layers, nb, padl):
    HW = H * W

    # Zero only the halos; the center is fully overwritten every image / layer.
    xpad_ref[:, :padl] = jnp.zeros((C, padl), jnp.float32)
    xpad_ref[:, padl + HW:] = jnp.zeros((C, padl), jnp.float32)

    # Precomputed x-boundary masks (hoisted outside all loops).
    m_lo = mask_ref[0:1, :]   # 0 where x == 0      (used for dx = -1 taps)
    m_hi = mask_ref[1:2, :]   # 0 where x == W - 1  (used for dx = +1 taps)

    for n in range(nb):                                   # images in this block
        xpad_ref[:, padl:padl + HW] = x_ref[n].astype(jnp.float32)

        for layer in range(n_layers):
            center = xpad_ref[:, padl:padl + HW]          # (C, HW) current activation

            acc = None
            for tap in range(9):
                ky, kx = tap // 3, tap % 3
                d = (ky - 1) * W + (kx - 1)               # flattened spatial shift
                v = center if d == 0 else xpad_ref[:, padl + d: padl + d + HW]
                if kx == 0:                               # dx = -1: mask column 0
                    v = v * m_lo
                elif kx == 2:                             # dx = +1: mask column W-1
                    v = v * m_hi
                wt = w_ref[layer, :, tap * C:(tap + 1) * C]   # (C, C) lane strip
                t = jnp.dot(wt, v, preferred_element_type=jnp.float32)
                acc = t if acc is None else acc + t

            acc = acc + b_ref[layer]                      # (C, 1) lane-broadcast bias

            if 0 < layer < n_layers - 1:
                # ResidCnnBlock: relu(conv(x) + x)   (activation == ReLU)
                acc = jnp.maximum(acc + center, 0.0)

            if layer < n_layers - 1:
                xpad_ref[:, padl:padl + HW] = acc         # stay resident in VMEM
            else:
                out_ref[n] = acc.astype(out_ref.dtype)    # lane-dense (C, HW) store


# ---------------- wrapper ----------------

def _pack_params(params, cmax):
    """Pack per-layer HWIO weights/biases into the transposed kernel layout.

    w_all: (L, cmax, 9*cmax) with w_all[l, co, tap*cmax + ci] = w[ky, kx, ci, co]
    b_all: (L, cmax, 1)
    Padded channels get zero weights/biases, so they stay exactly 0 through
    bias, residual add and ReLU.
    """
    w_list, b_list = [], []
    for w, b in params:
        cin, cout = w.shape[2], w.shape[3]
        wp = jnp.zeros((3, 3, cmax, cmax), jnp.float32)
        wp = wp.at[:, :, :cin, :cout].set(w.astype(jnp.float32))
        wt = jnp.transpose(wp, (3, 0, 1, 2)).reshape(cmax, 9 * cmax)
        bp = jnp.zeros((cmax, 1), jnp.float32).at[:cout, 0].set(b.astype(jnp.float32))
        w_list.append(wt)
        b_list.append(bp)
    return jnp.stack(w_list), jnp.stack(b_list)


def resid_cnn_forward(x_nchw, params):
    """ResidCNN.forward. Input/output are NCHW to match the PyTorch module."""
    N, cin0, H, W = x_nchw.shape
    HW = H * W
    n_layers = len(params)
    out_dim = params[-1][0].shape[-1]
    cmax = _round_up(max(max(w.shape[2], w.shape[3]) for w, _ in params), 8)
    padl = _round_up(W + 1, 128)          # halo width; keeps center vreg-aligned

    w_all, b_all = _pack_params(params, cmax)

    # x-boundary masks, computed once in the wrapper (hoisted out of the kernel).
    col = jnp.arange(HW, dtype=jnp.int32) % W
    masks = jnp.stack([col != 0, col != W - 1]).astype(jnp.float32)   # (2, HW)

    # NCHW -> (N, C, H*W) is a free reshape (no transpose); pad channels to cmax.
    x = x_nchw.reshape(N, cin0, HW).astype(jnp.float32)
    x = jnp.pad(x, ((0, 0), (0, cmax - cin0), (0, 0)))

    # Fold the (small) batch into one grid step to amortize per-step overhead.
    nb = N if N <= 4 else 4
    ng = pl.cdiv(N, nb)
    n_pad = ng * nb
    if n_pad != N:
        x = jnp.pad(x, ((0, n_pad - N), (0, 0), (0, 0)))

    kernel = functools.partial(_resid_cnn_fused_kernel, H=H, W=W, C=cmax,
                               n_layers=n_layers, nb=nb, padl=padl)

    out = pl.pallas_call(
        kernel,
        out_shape=jax.ShapeDtypeStruct((n_pad, cmax, HW), jnp.float32),
        grid=(ng,),
        in_specs=[
            pl.BlockSpec((nb, cmax, HW), lambda g: (g, 0, 0)),
            # weights/biases/masks: constant block index -> DMA'd once, reused
            pl.BlockSpec((n_layers, cmax, 9 * cmax), lambda g: (0, 0, 0)),
            pl.BlockSpec((n_layers, cmax, 1), lambda g: (0, 0, 0)),
            pl.BlockSpec((2, HW), lambda g: (0, 0)),
        ],
        out_specs=pl.BlockSpec((nb, cmax, HW), lambda g: (g, 0, 0)),
        scratch_shapes=[
            pltpu.VMEM((cmax, HW + 2 * padl), jnp.float32),   # halo-padded activation
        ],
        compiler_params=pltpu.CompilerParams(
            dimension_semantics=("parallel",),
            vmem_limit_bytes=32 * 1024 * 1024),
    )(x, w_all, b_all, masks)

    out = out[:N, :out_dim, :]            # drop batch/channel padding
    return out.reshape(N, out_dim, H, W)  # (N, C, H*W) -> NCHW, free reshape


def init_params(key, input_dim, resid_dim, resid_count, output_dim):
    """Deterministic synthetic params. Weights are (kh, kw, Cin, Cout) HWIO."""
    params = []
    dims = [(input_dim, resid_dim)] + \
           [(resid_dim, resid_dim)] * resid_count + \
           [(resid_dim, output_dim)]
    for cin, cout in dims:
        key, kw_, kb_ = jax.random.split(key, 3)
        fan_in = cin * 9
        w = jax.random.normal(kw_, (3, 3, cin, cout), jnp.float32) / jnp.sqrt(fan_in)
        b = 0.01 * jax.random.normal(kb_, (cout,), jnp.float32)
        params.append((w, b))
    return params


# ---------------- pure-JAX reference (for verification) ----------------

def _ref_conv(x_nhwc, w_hwio, b):
    y = lax.conv_general_dilated(
        x_nhwc, w_hwio, window_strides=(1, 1), padding="SAME",
        dimension_numbers=("NHWC", "HWIO", "NHWC"))
    return y + b


def ref_forward(x_nchw, params):
    x = jnp.transpose(x_nchw, (0, 2, 3, 1))
    w, b = params[0]
    x = _ref_conv(x, w, b)
    for w, b in params[1:-1]:
        x = jax.nn.relu(_ref_conv(x, w, b) + x)
    w, b = params[-1]
    x = _ref_conv(x, w, b)
    return jnp.transpose(x, (0, 3, 1, 2))


if __name__ == "__main__":
    # Small shapes consistent with the module's forward (NCHW input).
    N, INPUT_DIM, H, W = 2, 4, 16, 16
    RESID_DIM, RESID_COUNT, OUTPUT_DIM = 8, 2, 3

    key = jax.random.PRNGKey(0)
    key, kx = jax.random.split(key)
    x = jax.random.normal(kx, (N, INPUT_DIM, H, W), jnp.float32)

    params = init_params(key, INPUT_DIM, RESID_DIM, RESID_COUNT, OUTPUT_DIM)

    out = jax.block_until_ready(jax.jit(resid_cnn_forward)(x, params))
    ref = jax.block_until_ready(ref_forward(x, params))

    assert out.shape == (N, OUTPUT_DIM, H, W)
    assert jnp.allclose(out, ref, atol=1e-3, rtol=1e-3), "mismatch vs reference"

    print("KERNEL_OK")
</pallas_src>

<mosaic_0001>
module attributes {stable_mosaic.version = 11 : i64} {
  func.func @_resid_cnn_fused_kernel(%arg0: i32, %arg1: memref<2x8x256xf32, #tpu.memory_space<vmem>>, %arg2: memref<4x8x72xf32, #tpu.memory_space<vmem>>, %arg3: memref<4x8x1xf32, #tpu.memory_space<vmem>>, %arg4: memref<2x256xf32, #tpu.memory_space<vmem>>, %arg5: memref<2x8x256xf32, #tpu.memory_space<vmem>>, %arg6: memref<8x512xf32, #tpu.memory_space<vmem>>) attributes {dimension_semantics = [#tpu.dimension_semantics<parallel>], iteration_bounds = array<i64: 1>, scalar_prefetch = 0 : i64, scratch_operands = 1 : i64, tpu.core_type = #tpu.core_type<tc>, window_params = [{transform_indices = @transform_0, window_bounds = array<i64: 2, 8, 256>}, {pipeline_mode = #tpu.pipeline_mode<synchronous>, transform_indices = @transform_1, window_bounds = array<i64: 4, 8, 72>}, {pipeline_mode = #tpu.pipeline_mode<synchronous>, transform_indices = @transform_2, window_bounds = array<i64: 4, 8, 1>}, {pipeline_mode = #tpu.pipeline_mode<synchronous>, transform_indices = @transform_3, window_bounds = array<i64: 2, 256>}, {transform_indices = @transform_4, window_bounds = array<i64: 2, 8, 256>}]} {
    %cst = arith.constant 0.000000e+00 : f32
    %0 = vector.broadcast %cst : f32 to vector<8x128xf32>
    %c0 = arith.constant 0 : index
    %c0_0 = arith.constant 0 : index
    %1 = vector.load %arg6[%c0, %c0_0] : memref<8x512xf32, #tpu.memory_space<vmem>>, vector<8x128xf32>
    tpu.vector_store %arg6[%c0, %c0_0], %0 {strides = array<i32>} : memref<8x512xf32, #tpu.memory_space<vmem>>, vector<8x128xf32>,
    %cst_1 = arith.constant 0.000000e+00 : f32
    %2 = vector.broadcast %cst_1 : f32 to vector<8x128xf32>
    %c0_2 = arith.constant 0 : index
    %c384 = arith.constant 384 : index
    %3 = vector.load %arg6[%c0_2, %c384] : memref<8x512xf32, #tpu.memory_space<vmem>>, vector<8x128xf32>
    tpu.vector_store %arg6[%c0_2, %c384], %2 {strides = array<i32>} : memref<8x512xf32, #tpu.memory_space<vmem>>, vector<8x128xf32>,
    %c0_3 = arith.constant 0 : index
    %c0_4 = arith.constant 0 : index
    %4 = vector.load %arg4[%c0_3, %c0_4] : memref<2x256xf32, #tpu.memory_space<vmem>>, vector<1x256xf32>
    %c1 = arith.constant 1 : index
    %c0_5 = arith.constant 0 : index
    %5 = vector.load %arg4[%c1, %c0_5] : memref<2x256xf32, #tpu.memory_space<vmem>>, vector<1x256xf32>
    %c0_6 = arith.constant 0 : index
    %c0_7 = arith.constant 0 : index
    %c0_8 = arith.constant 0 : index
    %6 = vector.load %arg1[%c0_6, %c0_7, %c0_8] : memref<2x8x256xf32, #tpu.memory_space<vmem>>, vector<1x8x256xf32>
    %7 = vector.shape_cast %6 : vector<1x8x256xf32> to vector<8x256xf32>
    %c0_9 = arith.constant 0 : index
    %c128 = arith.constant 128 : index
    %8 = vector.load %arg6[%c0_9, %c128] : memref<8x512xf32, #tpu.memory_space<vmem>>, vector<8x256xf32>
    tpu.vector_store %arg6[%c0_9, %c128], %7 {strides = array<i32>} : memref<8x512xf32, #tpu.memory_space<vmem>>, vector<8x256xf32>,
    %c0_10 = arith.constant 0 : index
    %c128_11 = arith.constant 128 : index
    %9 = vector.load %arg6[%c0_10, %c128_11] : memref<8x512xf32, #tpu.memory_space<vmem>>, vector<8x256xf32>
    %c0_12 = arith.constant 0 : index
    %c111 = arith.constant 111 : index
    %10 = vector.load %arg6[%c0_12, %c111] : memref<8x512xf32, #tpu.memory_space<vmem>>, vector<8x256xf32>
    %11 = vector.broadcast %4 : vector<1x256xf32> to vector<8x256xf32>
    %12 = arith.mulf %10, %11 : vector<8x256xf32>
    %c0_13 = arith.constant 0 : index
    %c0_14 = arith.constant 0 : index
    %c0_15 = arith.constant 0 : index
    %13 = vector.load %arg2[%c0_13, %c0_14, %c0_15] : memref<4x8x72xf32, #tpu.memory_space<vmem>>, vector<1x8x8xf32>
    %14 = vector.shape_cast %13 : vector<1x8x8xf32> to vector<8x8xf32>
    %cst_16 = arith.constant dense<0.000000e+00> : vector<8x256xf32>
    %15 = tpu.matmul %14, %12, %cst_16 {dimension_numbers = #tpu.dot_dimension_numbers<[1], [0], [0], [1], [0, 0, 1, 1], [], []>} : vector<8x8xf32>, vector<8x256xf32>, vector<8x256xf32> -> vector<8x256xf32>
    %c0_17 = arith.constant 0 : index
    %c112 = arith.constant 112 : index
    %16 = vector.load %arg6[%c0_17, %c112] : memref<8x512xf32, #tpu.memory_space<vmem>>, vector<8x256xf32>
    %c0_18 = arith.constant 0 : index
    %c0_19 = arith.constant 0 : index
    %c8 = arith.constant 8 : index
    %17 = vector.load %arg2[%c0_18, %c0_19, %c8] : memref<4x8x72xf32, #tpu.memory_space<vmem>>, vector<1x8x8xf32>
    %18 = vector.shape_cast %17 : vector<1x8x8xf32> to vector<8x8xf32>
    %cst_20 = arith.constant dense<0.000000e+00> : vector<8x256xf32>
    %19 = tpu.matmul %18, %16, %cst_20 {dimension_numbers = #tpu.dot_dimension_numbers<[1], [0], [0], [1], [0, 0, 1, 1], [], []>} : vector<8x8xf32>, vector<8x256xf32>, vector<8x256xf32> -> vector<8x256xf32>
    %20 = arith.addf %15, %19 : vector<8x256xf32>
    %c0_21 = arith.constant 0 : index
    %c113 = arith.constant 113 : index
    %21 = vector.load %arg6[%c0_21, %c113] : memref<8x512xf32, #tpu.memory_space<vmem>>, vector<8x256xf32>
    %22 = vector.broadcast %5 : vector<1x256xf32> to vector<8x256xf32>
    %23 = arith.mulf %21, %22 : vector<8x256xf32>
    %c0_22 = arith.constant 0 : index
    %c0_23 = arith.constant 0 : index
    %c16 = arith.constant 16 : index
    %24 = vector.load %arg2[%c0_22, %c0_23, %c16] : memref<4x8x72xf32, #tpu.memory_space<vmem>>, vector<1x8x8xf32>
    %25 = vector.shape_cast %24 : vector<1x8x8xf32> to vector<8x8xf32>
    %cst_24 = arith.constant dense<0.000000e+00> : vector<8x256xf32>
    %26 = tpu.matmul %25, %23, %cst_24 {dimension_numbers = #tpu.dot_dimension_numbers<[1], [0], [0], [1], [0, 0, 1, 1], [], []>} : vector<8x8xf32>, vector<8x256xf32>, vector<8x256xf32> -> vector<8x256xf32>
    %27 = arith.addf %20, %26 : vector<8x256xf32>
    %c0_25 = arith.constant 0 : index
    %c127 = arith.constant 127 : index
    %28 = vector.load %arg6[%c0_25, %c127] : memref<8x512xf32, #tpu.memory_space<vmem>>, vector<8x256xf32>
    %29 = vector.broadcast %4 : vector<1x256xf32> to vector<8x256xf32>
    %30 = arith.mulf %28, %29 : vector<8x256xf32>
    %c0_26 = arith.constant 0 : index
    %c0_27 = arith.constant 0 : index
    %c24 = arith.constant 24 : index
    %31 = vector.load %arg2[%c0_26, %c0_27, %c24] : memref<4x8x72xf32, #tpu.memory_space<vmem>>, vector<1x8x8xf32>
    %32 = vector.shape_cast %31 : vector<1x8x8xf32> to vector<8x8xf32>
    %cst_28 = arith.constant dense<0.000000e+00> : vector<8x256xf32>
    %33 = tpu.matmul %32, %30, %cst_28 {dimension_numbers = #tpu.dot_dimension_numbers<[1], [0], [0], [1], [0, 0, 1, 1], [], []>} : vector<8x8xf32>, vector<8x256xf32>, vector<8x256xf32> -> vector<8x256xf32>
    %34 = arith.addf %27, %33 : vector<8x256xf32>
    %c0_29 = arith.constant 0 : index
    %c0_30 = arith.constant 0 : index
    %c32 = arith.constant 32 : index
    %35 = vector.load %arg2[%c0_29, %c0_30, %c32] : memref<4x8x72xf32, #tpu.memory_space<vmem>>, vector<1x8x8xf32>
    %36 = vector.shape_cast %35 : vector<1x8x8xf32> to vector<8x8xf32>
    %cst_31 = arith.constant dense<0.000000e+00> : vector<8x256xf32>
    %37 = tpu.matmul %36, %9, %cst_31 {dimension_numbers = #tpu.dot_dimension_numbers<[1], [0], [0], [1], [0, 0, 1, 1], [], []>} : vector<8x8xf32>, vector<8x256xf32>, vector<8x256xf32> -> vector<8x256xf32>
    %38 = arith.addf %34, %37 : vector<8x256xf32>
    %c0_32 = arith.constant 0 : index
    %c129 = arith.constant 129 : index
    %39 = vector.load %arg6[%c0_32, %c129] : memref<8x512xf32, #tpu.memory_space<vmem>>, vector<8x256xf32>
    %40 = vector.broadcast %5 : vector<1x256xf32> to vector<8x256xf32>
    %41 = arith.mulf %39, %40 : vector<8x256xf32>
    %c0_33 = arith.constant 0 : index
    %c0_34 = arith.constant 0 : index
    %c40 = arith.constant 40 : index
    %42 = vector.load %arg2[%c0_33, %c0_34, %c40] : memref<4x8x72xf32, #tpu.memory_space<vmem>>, vector<1x8x8xf32>
    %43 = vector.shape_cast %42 : vector<1x8x8xf32> to vector<8x8xf32>
    %cst_35 = arith.constant dense<0.000000e+00> : vector<8x256xf32>
    %44 = tpu.matmul %43, %41, %cst_35 {dimension_numbers = #tpu.dot_dimension_numbers<[1], [0], [0], [1], [0, 0, 1, 1], [], []>} : vector<8x8xf32>, vector<8x256xf32>, vector<8x256xf32> -> vector<8x256xf32>
    %45 = arith.addf %38, %44 : vector<8x256xf32>
    %c0_36 = arith.constant 0 : index
    %c143 = arith.constant 143 : index
    %46 = vector.load %arg6[%c0_36, %c143] : memref<8x512xf32, #tpu.memory_space<vmem>>, vector<8x256xf32>
    %47 = vector.broadcast %4 : vector<1x256xf32> to vector<8x256xf32>
    %48 = arith.mulf %46, %47 : vector<8x256xf32>
    %c0_37 = arith.constant 0 : index
    %c0_38 = arith.constant 0 : index
    %c48 = arith.constant 48 : index
    %49 = vector.load %arg2[%c0_37, %c0_38, %c48] : memref<4x8x72xf32, #tpu.memory_space<vmem>>, vector<1x8x8xf32>
    %50 = vector.shape_cast %49 : vector<1x8x8xf32> to vector<8x8xf32>
    %cst_39 = arith.constant dense<0.000000e+00> : vector<8x256xf32>
    %51 = tpu.matmul %50, %48, %cst_39 {dimension_numbers = #tpu.dot_dimension_numbers<[1], [0], [0], [1], [0, 0, 1, 1], [], []>} : vector<8x8xf32>, vector<8x256xf32>, vector<8x256xf32> -> vector<8x256xf32>
    %52 = arith.addf %45, %51 : vector<8x256xf32>
    %c0_40 = arith.constant 0 : index
    %c144 = arith.constant 144 : index
    %53 = vector.load %arg6[%c0_40, %c144] : memref<8x512xf32, #tpu.memory_space<vmem>>, vector<8x256xf32>
    %c0_41 = arith.constant 0 : index
    %c0_42 = arith.constant 0 : index
    %c56 = arith.constant 56 : index
    %54 = vector.load %arg2[%c0_41, %c0_42, %c56] : memref<4x8x72xf32, #tpu.memory_space<vmem>>, vector<1x8x8xf32>
    %55 = vector.shape_cast %54 : vector<1x8x8xf32> to vector<8x8xf32>
    %cst_43 = arith.constant dense<0.000000e+00> : vector<8x256xf32>
    %56 = tpu.matmul %55, %53, %cst_43 {dimension_numbers = #tpu.dot_dimension_numbers<[1], [0], [0], [1], [0, 0, 1, 1], [], []>} : vector<8x8xf32>, vector<8x256xf32>, vector<8x256xf32> -> vector<8x256xf32>
    %57 = arith.addf %52, %56 : vector<8x256xf32>
    %c0_44 = arith.constant 0 : index
    %c145 = arith.constant 145 : index
    %58 = vector.load %arg6[%c0_44, %c145] : memref<8x512xf32, #tpu.memory_space<vmem>>, vector<8x256xf32>
    %59 = vector.broadcast %5 : vector<1x256xf32> to vector<8x256xf32>
    %60 = arith.mulf %58, %59 : vector<8x256xf32>
    %c0_45 = arith.constant 0 : index
    %c0_46 = arith.constant 0 : index
    %c64 = arith.constant 64 : index
    %61 = vector.load %arg2[%c0_45, %c0_46, %c64] : memref<4x8x72xf32, #tpu.memory_space<vmem>>, vector<1x8x8xf32>
    %62 = vector.shape_cast %61 : vector<1x8x8xf32> to vector<8x8xf32>
    %cst_47 = arith.constant dense<0.000000e+00> : vector<8x256xf32>
    %63 = tpu.matmul %62, %60, %cst_47 {dimension_numbers = #tpu.dot_dimension_numbers<[1], [0], [0], [1], [0, 0, 1, 1], [], []>} : vector<8x8xf32>, vector<8x256xf32>, vector<8x256xf32> -> vector<8x256xf32>
    %64 = arith.addf %57, %63 : vector<8x256xf32>
    %c0_48 = arith.constant 0 : index
    %c0_49 = arith.constant 0 : index
    %c0_50 = arith.constant 0 : index
    %65 = vector.load %arg3[%c0_48, %c0_49, %c0_50] : memref<4x8x1xf32, #tpu.memory_space<vmem>>, vector<1x8x1xf32>
    %66 = vector.shape_cast %65 : vector<1x8x1xf32> to vector<8x1xf32>
    %67 = vector.broadcast %66 : vector<8x1xf32> to vector<8x256xf32>
    %68 = arith.addf %64, %67 : vector<8x256xf32>
    %c0_51 = arith.constant 0 : index
    %c128_52 = arith.constant 128 : index
    %69 = vector.load %arg6[%c0_51, %c128_52] : memref<8x512xf32, #tpu.memory_space<vmem>>, vector<8x256xf32>
    tpu.vector_store %arg6[%c0_51, %c128_52], %68 {strides = array<i32>} : memref<8x512xf32, #tpu.memory_space<vmem>>, vector<8x256xf32>,
    %c0_53 = arith.constant 0 : index
    %c128_54 = arith.constant 128 : index
    %70 = vector.load %arg6[%c0_53, %c128_54] : memref<8x512xf32, #tpu.memory_space<vmem>>, vector<8x256xf32>
    %c0_55 = arith.constant 0 : index
    %c111_56 = arith.constant 111 : index
    %71 = vector.load %arg6[%c0_55, %c111_56] : memref<8x512xf32, #tpu.memory_space<vmem>>, vector<8x256xf32>
    %72 = vector.broadcast %4 : vector<1x256xf32> to vector<8x256xf32>
    %73 = arith.mulf %71, %72 : vector<8x256xf32>
    %c1_57 = arith.constant 1 : index
    %c0_58 = arith.constant 0 : index
    %c0_59 = arith.constant 0 : index
    %74 = vector.load %arg2[%c1_57, %c0_58, %c0_59] : memref<4x8x72xf32, #tpu.memory_space<vmem>>, vector<1x8x8xf32>
    %75 = vector.shape_cast %74 : vector<1x8x8xf32> to vector<8x8xf32>
    %cst_60 = arith.constant dense<0.000000e+00> : vector<8x256xf32>
    %76 = tpu.matmul %75, %73, %cst_60 {dimension_numbers = #tpu.dot_dimension_numbers<[1], [0], [0], [1], [0, 0, 1, 1], [], []>} : vector<8x8xf32>, vector<8x256xf32>, vector<8x256xf32> -> vector<8x256xf32>
    %c0_61 = arith.constant 0 : index
    %c112_62 = arith.constant 112 : index
    %77 = vector.load %arg6[%c0_61, %c112_62] : memref<8x512xf32, #tpu.memory_space<vmem>>, vector<8x256xf32>
    %c1_63 = arith.constant 1 : index
    %c0_64 = arith.constant 0 : index
    %c8_65 = arith.constant 8 : index
    %78 = vector.load %arg2[%c1_63, %c0_64, %c8_65] : memref<4x8x72xf32, #tpu.memory_space<vmem>>, vector<1x8x8xf32>
    %79 = vector.shape_cast %78 : vector<1x8x8xf32> to vector<8x8xf32>
    %cst_66 = arith.constant dense<0.000000e+00> : vector<8x256xf32>
    %80 = tpu.matmul %79, %77, %cst_66 {dimension_numbers = #tpu.dot_dimension_numbers<[1], [0], [0], [1], [0, 0, 1, 1], [], []>} : vector<8x8xf32>, vector<8x256xf32>, vector<8x256xf32> -> vector<8x256xf32>
    %81 = arith.addf %76, %80 : vector<8x256xf32>
    %c0_67 = arith.constant 0 : index
    %c113_68 = arith.constant 113 : index
    %82 = vector.load %arg6[%c0_67, %c113_68] : memref<8x512xf32, #tpu.memory_space<vmem>>, vector<8x256xf32>
    %83 = vector.broadcast %5 : vector<1x256xf32> to vector<8x256xf32>
    %84 = arith.mulf %82, %83 : vector<8x256xf32>
    %c1_69 = arith.constant 1 : index
    %c0_70 = arith.constant 0 : index
    %c16_71 = arith.constant 16 : index
    %85 = vector.load %arg2[%c1_69, %c0_70, %c16_71] : memref<4x8x72xf32, #tpu.memory_space<vmem>>, vector<1x8x8xf32>
    %86 = vector.shape_cast %85 : vector<1x8x8xf32> to vector<8x8xf32>
    %cst_72 = arith.constant dense<0.000000e+00> : vector<8x256xf32>
    %87 = tpu.matmul %86, %84, %cst_72 {dimension_numbers = #tpu.dot_dimension_numbers<[1], [0], [0], [1], [0, 0, 1, 1], [], []>} : vector<8x8xf32>, vector<8x256xf32>, vector<8x256xf32> -> vector<8x256xf32>
    %88 = arith.addf %81, %87 : vector<8x256xf32>
    %c0_73 = arith.constant 0 : index
    %c127_74 = arith.constant 127 : index
    %89 = vector.load %arg6[%c0_73, %c127_74] : memref<8x512xf32, #tpu.memory_space<vmem>>, vector<8x256xf32>
    %90 = vector.broadcast %4 : vector<1x256xf32> to vector<8x256xf32>
    %91 = arith.mulf %89, %90 : vector<8x256xf32>
    %c1_75 = arith.constant 1 : index
    %c0_76 = arith.constant 0 : index
    %c24_77 = arith.constant 24 : index
    %92 = vector.load %arg2[%c1_75, %c0_76, %c24_77] : memref<4x8x72xf32, #tpu.memory_space<vmem>>, vector<1x8x8xf32>
    %93 = vector.shape_cast %92 : vector<1x8x8xf32> to vector<8x8xf32>
    %cst_78 = arith.constant dense<0.000000e+00> : vector<8x256xf32>
    %94 = tpu.matmul %93, %91, %cst_78 {dimension_numbers = #tpu.dot_dimension_numbers<[1], [0], [0], [1], [0, 0, 1, 1], [], []>} : vector<8x8xf32>, vector<8x256xf32>, vector<8x256xf32> -> vector<8x256xf32>
    %95 = arith.addf %88, %94 : vector<8x256xf32>
    %c1_79 = arith.constant 1 : index
    %c0_80 = arith.constant 0 : index
    %c32_81 = arith.constant 32 : index
    %96 = vector.load %arg2[%c1_79, %c0_80, %c32_81] : memref<4x8x72xf32, #tpu.memory_space<vmem>>, vector<1x8x8xf32>
    %97 = vector.shape_cast %96 : vector<1x8x8xf32> to vector<8x8xf32>
    %cst_82 = arith.constant dense<0.000000e+00> : vector<8x256xf32>
    %98 = tpu.matmul %97, %70, %cst_82 {dimension_numbers = #tpu.dot_dimension_numbers<[1], [0], [0], [1], [0, 0, 1, 1], [], []>} : vector<8x8xf32>, vector<8x256xf32>, vector<8x256xf32> -> vector<8x256xf32>
    %99 = arith.addf %95, %98 : vector<8x256xf32>
    %c0_83 = arith.constant 0 : index
    %c129_84 = arith.constant 129 : index
    %100 = vector.load %arg6[%c0_83, %c129_84] : memref<8x512xf32, #tpu.memory_space<vmem>>, vector<8x256xf32>
    %101 = vector.broadcast %5 : vector<1x256xf32> to vector<8x256xf32>
    %102 = arith.mulf %100, %101 : vector<8x256xf32>
    %c1_85 = arith.constant 1 : index
    %c0_86 = arith.constant 0 : index
    %c40_87 = arith.constant 40 : index
    %103 = vector.load %arg2[%c1_85, %c0_86, %c40_87] : memref<4x8x72xf32, #tpu.memory_space<vmem>>, vector<1x8x8xf32>
    %104 = vector.shape_cast %103 : vector<1x8x8xf32> to vector<8x8xf32>
    %cst_88 = arith.constant dense<0.000000e+00> : vector<8x256xf32>
    %105 = tpu.matmul %104, %102, %cst_88 {dimension_numbers = #tpu.dot_dimension_numbers<[1], [0], [0], [1], [0, 0, 1, 1], [], []>} : vector<8x8xf32>, vector<8x256xf32>, vector<8x256xf32> -> vector<8x256xf32>
    %106 = arith.addf %99, %105 : vector<8x256xf32>
    %c0_89 = arith.constant 0 : index
    %c143_90 = arith.constant 143 : index
    %107 = vector.load %arg6[%c0_89, %c143_90] : memref<8x512xf32, #tpu.memory_space<vmem>>, vector<8x256xf32>
    %108 = vector.broadcast %4 : vector<1x256xf32> to vector<8x256xf32>
    %109 = arith.mulf %107, %108 : vector<8x256xf32>
    %c1_91 = arith.constant 1 : index
    %c0_92 = arith.constant 0 : index
    %c48_93 = arith.constant 48 : index
    %110 = vector.load %arg2[%c1_91, %c0_92, %c48_93] : memref<4x8x72xf32, #tpu.memory_space<vmem>>, vector<1x8x8xf32>
    %111 = vector.shape_cast %110 : vector<1x8x8xf32> to vector<8x8xf32>
    %cst_94 = arith.constant dense<0.000000e+00> : vector<8x256xf32>
    %112 = tpu.matmul %111, %109, %cst_94 {dimension_numbers = #tpu.dot_dimension_numbers<[1], [0], [0], [1], [0, 0, 1, 1], [], []>} : vector<8x8xf32>, vector<8x256xf32>, vector<8x256xf32> -> vector<8x256xf32>
    %113 = arith.addf %106, %112 : vector<8x256xf32>
    %c0_95 = arith.constant 0 : index
    %c144_96 = arith.constant 144 : index
    %114 = vector.load %arg6[%c0_95, %c144_96] : memref<8x512xf32, #tpu.memory_space<vmem>>, vector<8x256xf32>
    %c1_97 = arith.constant 1 : index
    %c0_98 = arith.constant 0 : index
    %c56_99 = arith.constant 56 : index
    %115 = vector.load %arg2[%c1_97, %c0_98, %c56_99] : memref<4x8x72xf32, #tpu.memory_space<vmem>>, vector<1x8x8xf32>
    %116 = vector.shape_cast %115 : vector<1x8x8xf32> to vector<8x8xf32>
    %cst_100 = arith.constant dense<0.000000e+00> : vector<8x256xf32>
    %117 = tpu.matmul %116, %114, %cst_100 {dimension_numbers = #tpu.dot_dimension_numbers<[1], [0], [0], [1], [0, 0, 1, 1], [], []>} : vector<8x8xf32>, vector<8x256xf32>, vector<8x256xf32> -> vector<8x256xf32>
    %118 = arith.addf %113, %117 : vector<8x256xf32>
    %c0_101 = arith.constant 0 : index
    %c145_102 = arith.constant 145 : index
    %119 = vector.load %arg6[%c0_101, %c145_102] : memref<8x512xf32, #tpu.memory_space<vmem>>, vector<8x256xf32>
    %120 = vector.broadcast %5 : vector<1x256xf32> to vector<8x256xf32>
    %121 = arith.mulf %119, %120 : vector<8x256xf32>
    %c1_103 = arith.constant 1 : index
    %c0_104 = arith.constant 0 : index
    %c64_105 = arith.constant 64 : index
    %122 = vector.load %arg2[%c1_103, %c0_104, %c64_105] : memref<4x8x72xf32, #tpu.memory_space<vmem>>, vector<1x8x8xf32>
    %123 = vector.shape_cast %122 : vector<1x8x8xf32> to vector<8x8xf32>
    %cst_106 = arith.constant dense<0.000000e+00> : vector<8x256xf32>
    %124 = tpu.matmul %123, %121, %cst_106 {dimension_numbers = #tpu.dot_dimension_numbers<[1], [0], [0], [1], [0, 0, 1, 1], [], []>} : vector<8x8xf32>, vector<8x256xf32>, vector<8x256xf32> -> vector<8x256xf32>
    %125 = arith.addf %118, %124 : vector<8x256xf32>
    %c1_107 = arith.constant 1 : index
    %c0_108 = arith.constant 0 : index
    %c0_109 = arith.constant 0 : index
    %126 = vector.load %arg3[%c1_107, %c0_108, %c0_109] : memref<4x8x1xf32, #tpu.memory_space<vmem>>, vector<1x8x1xf32>
    %127 = vector.shape_cast %126 : vector<1x8x1xf32> to vector<8x1xf32>
    %128 = vector.broadcast %127 : vector<8x1xf32> to vector<8x256xf32>
    %129 = arith.addf %125, %128 : vector<8x256xf32>
    %130 = arith.addf %129, %70 : vector<8x256xf32>
    %cst_110 = arith.constant 0.000000e+00 : f32
    %131 = vector.broadcast %cst_110 : f32 to vector<8x256xf32>
    %132 = arith.maximumf %130, %131 : vector<8x256xf32>
    %c0_111 = arith.constant 0 : index
    %c128_112 = arith.constant 128 : index
    %133 = vector.load %arg6[%c0_111, %c128_112] : memref<8x512xf32, #tpu.memory_space<vmem>>, vector<8x256xf32>
    tpu.vector_store %arg6[%c0_111, %c128_112], %132 {strides = array<i32>} : memref<8x512xf32, #tpu.memory_space<vmem>>, vector<8x256xf32>,
    %c0_113 = arith.constant 0 : index
    %c128_114 = arith.constant 128 : index
    %134 = vector.load %arg6[%c0_113, %c128_114] : memref<8x512xf32, #tpu.memory_space<vmem>>, vector<8x256xf32>
    %c0_115 = arith.constant 0 : index
    %c111_116 = arith.constant 111 : index
    %135 = vector.load %arg6[%c0_115, %c111_116] : memref<8x512xf32, #tpu.memory_space<vmem>>, vector<8x256xf32>
    %136 = vector.broadcast %4 : vector<1x256xf32> to vector<8x256xf32>
    %137 = arith.mulf %135, %136 : vector<8x256xf32>
    %c2 = arith.constant 2 : index
    %c0_117 = arith.constant 0 : index
    %c0_118 = arith.constant 0 : index
    %138 = vector.load %arg2[%c2, %c0_117, %c0_118] : memref<4x8x72xf32, #tpu.memory_space<vmem>>, vector<1x8x8xf32>
    %139 = vector.shape_cast %138 : vector<1x8x8xf32> to vector<8x8xf32>
    %cst_119 = arith.constant dense<0.000000e+00> : vector<8x256xf32>
    %140 = tpu.matmul %139, %137, %cst_119 {dimension_numbers = #tpu.dot_dimension_numbers<[1], [0], [0], [1], [0, 0, 1, 1], [], []>} : vector<8x8xf32>, vector<8x256xf32>, vector<8x256xf32> -> vector<8x256xf32>
    %c0_120 = arith.constant 0 : index
    %c112_121 = arith.constant 112 : index
    %141 = vector.load %arg6[%c0_120, %c112_121] : memref<8x512xf32, #tpu.memory_space<vmem>>, vector<8x256xf32>
    %c2_122 = arith.constant 2 : index
    %c0_123 = arith.constant 0 : index
    %c8_124 = arith.constant 8 : index
    %142 = vector.load %arg2[%c2_122, %c0_123, %c8_124] : memref<4x8x72xf32, #tpu.memory_space<vmem>>, vector<1x8x8xf32>
    %143 = vector.shape_cast %142 : vector<1x8x8xf32> to vector<8x8xf32>
    %cst_125 = arith.constant dense<0.000000e+00> : vector<8x256xf32>
    %144 = tpu.matmul %143, %141, %cst_125 {dimension_numbers = #tpu.dot_dimension_numbers<[1], [0], [0], [1], [0, 0, 1, 1], [], []>} : vector<8x8xf32>, vector<8x256xf32>, vector<8x256xf32> -> vector<8x256xf32>
    %145 = arith.addf %140, %144 : vector<8x256xf32>
    %c0_126 = arith.constant 0 : index
    %c113_127 = arith.constant 113 : index
    %146 = vector.load %arg6[%c0_126, %c113_127] : memref<8x512xf32, #tpu.memory_space<vmem>>, vector<8x256xf32>
    %147 = vector.broadcast %5 : vector<1x256xf32> to vector<8x256xf32>
    %148 = arith.mulf %146, %147 : vector<8x256xf32>
    %c2_128 = arith.constant 2 : index
    %c0_129 = arith.constant 0 : index
    %c16_130 = arith.constant 16 : index
    %149 = vector.load %arg2[%c2_128, %c0_129, %c16_130] : memref<4x8x72xf32, #tpu.memory_space<vmem>>, vector<1x8x8xf32>
    %150 = vector.shape_cast %149 : vector<1x8x8xf32> to vector<8x8xf32>
    %cst_131 = arith.constant dense<0.000000e+00> : vector<8x256xf32>
    %151 = tpu.matmul %150, %148, %cst_131 {dimension_numbers = #tpu.dot_dimension_numbers<[1], [0], [0], [1], [0, 0, 1, 1], [], []>} : vector<8x8xf32>, vector<8x256xf32>, vector<8x256xf32> -> vector<8x256xf32>
    %152 = arith.addf %145, %151 : vector<8x256xf32>
    %c0_132 = arith.constant 0 : index
    %c127_133 = arith.constant 127 : index
    %153 = vector.load %arg6[%c0_132, %c127_133] : memref<8x512xf32, #tpu.memory_space<vmem>>, vector<8x256xf32>
    %154 = vector.broadcast %4 : vector<1x256xf32> to vector<8x256xf32>
    %155 = arith.mulf %153, %154 : vector<8x256xf32>
    %c2_134 = arith.constant 2 : index
    %c0_135 = arith.constant 0 : index
    %c24_136 = arith.constant 24 : index
    %156 = vector.load %arg2[%c2_134, %c0_135, %c24_136] : memref<4x8x72xf32, #tpu.memory_space<vmem>>, vector<1x8x8xf32>
    %157 = vector.shape_cast %156 : vector<1x8x8xf32> to vector<8x8xf32>
    %cst_137 = arith.constant dense<0.000000e+00> : vector<8x256xf32>
    %158 = tpu.matmul %157, %155, %cst_137 {dimension_numbers = #tpu.dot_dimension_numbers<[1], [0], [0], [1], [0, 0, 1, 1], [], []>} : vector<8x8xf32>, vector<8x256xf32>, vector<8x256xf32> -> vector<8x256xf32>
    %159 = arith.addf %152, %158 : vector<8x256xf32>
    %c2_138 = arith.constant 2 : index
    %c0_139 = arith.constant 0 : index
    %c32_140 = arith.constant 32 : index
    %160 = vector.load %arg2[%c2_138, %c0_139, %c32_140] : memref<4x8x72xf32, #tpu.memory_space<vmem>>, vector<1x8x8xf32>
    %161 = vector.shape_cast %160 : vector<1x8x8xf32> to vector<8x8xf32>
    %cst_141 = arith.constant dense<0.000000e+00> : vector<8x256xf32>
    %162 = tpu.matmul %161, %134, %cst_141 {dimension_numbers = #tpu.dot_dimension_numbers<[1], [0], [0], [1], [0, 0, 1, 1], [], []>} : vector<8x8xf32>, vector<8x256xf32>, vector<8x256xf32> -> vector<8x256xf32>
    %163 = arith.addf %159, %162 : vector<8x256xf32>
    %c0_142 = arith.constant 0 : index
    %c129_143 = arith.constant 129 : index
    %164 = vector.load %arg6[%c0_142, %c129_143] : memref<8x512xf32, #tpu.memory_space<vmem>>, vector<8x256xf32>
    %165 = vector.broadcast %5 : vector<1x256xf32> to vector<8x256xf32>
    %166 = arith.mulf %164, %165 : vector<8x256xf32>
    %c2_144 = arith.constant 2 : index
    %c0_145 = arith.constant 0 : index
    %c40_146 = arith.constant 40 : index
    %167 = vector.load %arg2[%c2_144, %c0_145, %c40_146] : memref<4x8x72xf32, #tpu.memory_space<vmem>>, vector<1x8x8xf32>
    %168 = vector.shape_cast %167 : vector<1x8x8xf32> to vector<8x8xf32>
    %cst_147 = arith.constant dense<0.000000e+00> : vector<8x256xf32>
    %169 = tpu.matmul %168, %166, %cst_147 {dimension_numbers = #tpu.dot_dimension_numbers<[1], [0], [0], [1], [0, 0, 1, 1], [], []>} : vector<8x8xf32>, vector<8x256xf32>, vector<8x256xf32> -> vector<8x256xf32>
    %170 = arith.addf %163, %169 : vector<8x256xf32>
    %c0_148 = arith.constant 0 : index
    %c143_149 = arith.constant 143 : index
    %171 = vector.load %arg6[%c0_148, %c143_149] : memref<8x512xf32, #tpu.memory_space<vmem>>, vector<8x256xf32>
    %172 = vector.broadcast %4 : vector<1x256xf32> to vector<8x256xf32>
    %173 = arith.mulf %171, %172 : vector<8x256xf32>
    %c2_150 = arith.constant 2 : index
    %c0_151 = arith.constant 0 : index
    %c48_152 = arith.constant 48 : index
    %174 = vector.load %arg2[%c2_150, %c0_151, %c48_152] : memref<4x8x72xf32, #tpu.memory_space<vmem>>, vector<1x8x8xf32>
    %175 = vector.shape_cast %174 : vector<1x8x8xf32> to vector<8x8xf32>
    %cst_153 = arith.constant dense<0.000000e+00> : vector<8x256xf32>
    %176 = tpu.matmul %175, %173, %cst_153 {dimension_numbers = #tpu.dot_dimension_numbers<[1], [0], [0], [1], [0, 0, 1, 1], [], []>} : vector<8x8xf32>, vector<8x256xf32>, vector<8x256xf32> -> vector<8x256xf32>
    %177 = arith.addf %170, %176 : vector<8x256xf32>
    %c0_154 = arith.constant 0 : index
    %c144_155 = arith.constant 144 : index
    %178 = vector.load %arg6[%c0_154, %c144_155] : memref<8x512xf32, #tpu.memory_space<vmem>>, vector<8x256xf32>
    %c2_156 = arith.constant 2 : index
    %c0_157 = arith.constant 0 : index
    %c56_158 = arith.constant 56 : index
    %179 = vector.load %arg2[%c2_156, %c0_157, %c56_158] : memref<4x8x72xf32, #tpu.memory_space<vmem>>, vector<1x8x8xf32>
    %180 = vector.shape_cast %179 : vector<1x8x8xf32> to vector<8x8xf32>
    %cst_159 = arith.constant dense<0.000000e+00> : vector<8x256xf32>
    %181 = tpu.matmul %180, %178, %cst_159 {dimension_numbers = #tpu.dot_dimension_numbers<[1], [0], [0], [1], [0, 0, 1, 1], [], []>} : vector<8x8xf32>, vector<8x256xf32>, vector<8x256xf32> -> vector<8x256xf32>
    %182 = arith.addf %177, %181 : vector<8x256xf32>
    %c0_160 = arith.constant 0 : index
    %c145_161 = arith.constant 145 : index
    %183 = vector.load %arg6[%c0_160, %c145_161] : memref<8x512xf32, #tpu.memory_space<vmem>>, vector<8x256xf32>
    %184 = vector.broadcast %5 : vector<1x256xf32> to vector<8x256xf32>
    %185 = arith.mulf %183, %184 : vector<8x256xf32>
    %c2_162 = arith.constant 2 : index
    %c0_163 = arith.constant 0 : index
    %c64_164 = arith.constant 64 : index
    %186 = vector.load %arg2[%c2_162, %c0_163, %c64_164] : memref<4x8x72xf32, #tpu.memory_space<vmem>>, vector<1x8x8xf32>
    %187 = vector.shape_cast %186 : vector<1x8x8xf32> to vector<8x8xf32>
    %cst_165 = arith.constant dense<0.000000e+00> : vector<8x256xf32>
    %188 = tpu.matmul %187, %185, %cst_165 {dimension_numbers = #tpu.dot_dimension_numbers<[1], [0], [0], [1], [0, 0, 1, 1], [], []>} : vector<8x8xf32>, vector<8x256xf32>, vector<8x256xf32> -> vector<8x256xf32>
    %189 = arith.addf %182, %188 : vector<8x256xf32>
    %c2_166 = arith.constant 2 : index
    %c0_167 = arith.constant 0 : index
    %c0_168 = arith.constant 0 : index
    %190 = vector.load %arg3[%c2_166, %c0_167, %c0_168] : memref<4x8x1xf32, #tpu.memory_space<vmem>>, vector<1x8x1xf32>
    %191 = vector.shape_cast %190 : vector<1x8x1xf32> to vector<8x1xf32>
    %192 = vector.broadcast %191 : vector<8x1xf32> to vector<8x256xf32>
    %193 = arith.addf %189, %192 : vector<8x256xf32>
    %194 = arith.addf %193, %134 : vector<8x256xf32>
    %cst_169 = arith.constant 0.000000e+00 : f32
    %195 = vector.broadcast %cst_169 : f32 to vector<8x256xf32>
    %196 = arith.maximumf %194, %195 : vector<8x256xf32>
    %c0_170 = arith.constant 0 : index
    %c128_171 = arith.constant 128 : index
    %197 = vector.load %arg6[%c0_170, %c128_171] : memref<8x512xf32, #tpu.memory_space<vmem>>, vector<8x256xf32>
    tpu.vector_store %arg6[%c0_170, %c128_171], %196 {strides = array<i32>} : memref<8x512xf32, #tpu.memory_space<vmem>>, vector<8x256xf32>,
    %c0_172 = arith.constant 0 : index
    %c128_173 = arith.constant 128 : index
    %198 = vector.load %arg6[%c0_172, %c128_173] : memref<8x512xf32, #tpu.memory_space<vmem>>, vector<8x256xf32>
    %c0_174 = arith.constant 0 : index
    %c111_175 = arith.constant 111 : index
    %199 = vector.load %arg6[%c0_174, %c111_175] : memref<8x512xf32, #tpu.memory_space<vmem>>, vector<8x256xf32>
    %200 = vector.broadcast %4 : vector<1x256xf32> to vector<8x256xf32>
    %201 = arith.mulf %199, %200 : vector<8x256xf32>
    %c3 = arith.constant 3 : index
    %c0_176 = arith.constant 0 : index
    %c0_177 = arith.constant 0 : index
    %202 = vector.load %arg2[%c3, %c0_176, %c0_177] : memref<4x8x72xf32, #tpu.memory_space<vmem>>, vector<1x8x8xf32>
    %203 = vector.shape_cast %202 : vector<1x8x8xf32> to vector<8x8xf32>
    %cst_178 = arith.constant dense<0.000000e+00> : vector<8x256xf32>
    %204 = tpu.matmul %203, %201, %cst_178 {dimension_numbers = #tpu.dot_dimension_numbers<[1], [0], [0], [1], [0, 0, 1, 1], [], []>} : vector<8x8xf32>, vector<8x256xf32>, vector<8x256xf32> -> vector<8x256xf32>
    %c0_179 = arith.constant 0 : index
    %c112_180 = arith.constant 112 : index
    %205 = vector.load %arg6[%c0_179, %c112_180] : memref<8x512xf32, #tpu.memory_space<vmem>>, vector<8x256xf32>
    %c3_181 = arith.constant 3 : index
    %c0_182 = arith.constant 0 : index
    %c8_183 = arith.constant 8 : index
    %206 = vector.load %arg2[%c3_181, %c0_182, %c8_183] : memref<4x8x72xf32, #tpu.memory_space<vmem>>, vector<1x8x8xf32>
    %207 = vector.shape_cast %206 : vector<1x8x8xf32> to vector<8x8xf32>
    %cst_184 = arith.constant dense<0.000000e+00> : vector<8x256xf32>
    %208 = tpu.matmul %207, %205, %cst_184 {dimension_numbers = #tpu.dot_dimension_numbers<[1], [0], [0], [1], [0, 0, 1, 1], [], []>} : vector<8x8xf32>, vector<8x256xf32>, vector<8x256xf32> -> vector<8x256xf32>
    %209 = arith.addf %204, %208 : vector<8x256xf32>
    %c0_185 = arith.constant 0 : index
    %c113_186 = arith.constant 113 : index
    %210 = vector.load %arg6[%c0_185, %c113_186] : memref<8x512xf32, #tpu.memory_space<vmem>>, vector<8x256xf32>
    %211 = vector.broadcast %5 : vector<1x256xf32> to vector<8x256xf32>
    %212 = arith.mulf %210, %211 : vector<8x256xf32>
    %c3_187 = arith.constant 3 : index
    %c0_188 = arith.constant 0 : index
    %c16_189 = arith.constant 16 : index
    %213 = vector.load %arg2[%c3_187, %c0_188, %c16_189] : memref<4x8x72xf32, #tpu.memory_space<vmem>>, vector<1x8x8xf32>
    %214 = vector.shape_cast %213 : vector<1x8x8xf32> to vector<8x8xf32>
    %cst_190 = arith.constant dense<0.000000e+00> : vector<8x256xf32>
    %215 = tpu.matmul %214, %212, %cst_190 {dimension_numbers = #tpu.dot_dimension_numbers<[1], [0], [0], [1], [0, 0, 1, 1], [], []>} : vector<8x8xf32>, vector<8x256xf32>, vector<8x256xf32> -> vector<8x256xf32>
    %216 = arith.addf %209, %215 : vector<8x256xf32>
    %c0_191 = arith.constant 0 : index
    %c127_192 = arith.constant 127 : index
    %217 = vector.load %arg6[%c0_191, %c127_192] : memref<8x512xf32, #tpu.memory_space<vmem>>, vector<8x256xf32>
    %218 = vector.broadcast %4 : vector<1x256xf32> to vector<8x256xf32>
    %219 = arith.mulf %217, %218 : vector<8x256xf32>
    %c3_193 = arith.constant 3 : index
    %c0_194 = arith.constant 0 : index
    %c24_195 = arith.constant 24 : index
    %220 = vector.load %arg2[%c3_193, %c0_194, %c24_195] : memref<4x8x72xf32, #tpu.memory_space<vmem>>, vector<1x8x8xf32>
    %221 = vector.shape_cast %220 : vector<1x8x8xf32> to vector<8x8xf32>
    %cst_196 = arith.constant dense<0.000000e+00> : vector<8x256xf32>
    %222 = tpu.matmul %221, %219, %cst_196 {dimension_numbers = #tpu.dot_dimension_numbers<[1], [0], [0], [1], [0, 0, 1, 1], [], []>} : vector<8x8xf32>, vector<8x256xf32>, vector<8x256xf32> -> vector<8x256xf32>
    %223 = arith.addf %216, %222 : vector<8x256xf32>
    %c3_197 = arith.constant 3 : index
    %c0_198 = arith.constant 0 : index
    %c32_199 = arith.constant 32 : index
    %224 = vector.load %arg2[%c3_197, %c0_198, %c32_199] : memref<4x8x72xf32, #tpu.memory_space<vmem>>, vector<1x8x8xf32>
    %225 = vector.shape_cast %224 : vector<1x8x8xf32> to vector<8x8xf32>
    %cst_200 = arith.constant dense<0.000000e+00> : vector<8x256xf32>
    %226 = tpu.matmul %225, %198, %cst_200 {dimension_numbers = #tpu.dot_dimension_numbers<[1], [0], [0], [1], [0, 0, 1, 1], [], []>} : vector<8x8xf32>, vector<8x256xf32>, vector<8x256xf32> -> vector<8x256xf32>
    %227 = arith.addf %223, %226 : vector<8x256xf32>
    %c0_201 = arith.constant 0 : index
    %c129_202 = arith.constant 129 : index
    %228 = vector.load %arg6[%c0_201, %c129_202] : memref<8x512xf32, #tpu.memory_space<vmem>>, vector<8x256xf32>
    %229 = vector.broadcast %5 : vector<1x256xf32> to vector<8x256xf32>
    %230 = arith.mulf %228, %229 : vector<8x256xf32>
    %c3_203 = arith.constant 3 : index
    %c0_204 = arith.constant 0 : index
    %c40_205 = arith.constant 40 : index
    %231 = vector.load %arg2[%c3_203, %c0_204, %c40_205] : memref<4x8x72xf32, #tpu.memory_space<vmem>>, vector<1x8x8xf32>
    %232 = vector.shape_cast %231 : vector<1x8x8xf32> to vector<8x8xf32>
    %cst_206 = arith.constant dense<0.000000e+00> : vector<8x256xf32>
    %233 = tpu.matmul %232, %230, %cst_206 {dimension_numbers = #tpu.dot_dimension_numbers<[1], [0], [0], [1], [0, 0, 1, 1], [], []>} : vector<8x8xf32>, vector<8x256xf32>, vector<8x256xf32> -> vector<8x256xf32>
    %234 = arith.addf %227, %233 : vector<8x256xf32>
    %c0_207 = arith.constant 0 : index
    %c143_208 = arith.constant 143 : index
    %235 = vector.load %arg6[%c0_207, %c143_208] : memref<8x512xf32, #tpu.memory_space<vmem>>, vector<8x256xf32>
    %236 = vector.broadcast %4 : vector<1x256xf32> to vector<8x256xf32>
    %237 = arith.mulf %235, %236 : vector<8x256xf32>
    %c3_209 = arith.constant 3 : index
    %c0_210 = arith.constant 0 : index
    %c48_211 = arith.constant 48 : index
    %238 = vector.load %arg2[%c3_209, %c0_210, %c48_211] : memref<4x8x72xf32, #tpu.memory_space<vmem>>, vector<1x8x8xf32>
    %239 = vector.shape_cast %238 : vector<1x8x8xf32> to vector<8x8xf32>
    %cst_212 = arith.constant dense<0.000000e+00> : vector<8x256xf32>
    %240 = tpu.matmul %239, %237, %cst_212 {dimension_numbers = #tpu.dot_dimension_numbers<[1], [0], [0], [1], [0, 0, 1, 1], [], []>} : vector<8x8xf32>, vector<8x256xf32>, vector<8x256xf32> -> vector<8x256xf32>
    %241 = arith.addf %234, %240 : vector<8x256xf32>
    %c0_213 = arith.constant 0 : index
    %c144_214 = arith.constant 144 : index
    %242 = vector.load %arg6[%c0_213, %c144_214] : memref<8x512xf32, #tpu.memory_space<vmem>>, vector<8x256xf32>
    %c3_215 = arith.constant 3 : index
    %c0_216 = arith.constant 0 : index
    %c56_217 = arith.constant 56 : index
    %243 = vector.load %arg2[%c3_215, %c0_216, %c56_217] : memref<4x8x72xf32, #tpu.memory_space<vmem>>, vector<1x8x8xf32>
    %244 = vector.shape_cast %243 : vector<1x8x8xf32> to vector<8x8xf32>
    %cst_218 = arith.constant dense<0.000000e+00> : vector<8x256xf32>
    %245 = tpu.matmul %244, %242, %cst_218 {dimension_numbers = #tpu.dot_dimension_numbers<[1], [0], [0], [1], [0, 0, 1, 1], [], []>} : vector<8x8xf32>, vector<8x256xf32>, vector<8x256xf32> -> vector<8x256xf32>
    %246 = arith.addf %241, %245 : vector<8x256xf32>
    %c0_219 = arith.constant 0 : index
    %c145_220 = arith.constant 145 : index
    %247 = vector.load %arg6[%c0_219, %c145_220] : memref<8x512xf32, #tpu.memory_space<vmem>>, vector<8x256xf32>
    %248 = vector.broadcast %5 : vector<1x256xf32> to vector<8x256xf32>
    %249 = arith.mulf %247, %248 : vector<8x256xf32>
    %c3_221 = arith.constant 3 : index
    %c0_222 = arith.constant 0 : index
    %c64_223 = arith.constant 64 : index
    %250 = vector.load %arg2[%c3_221, %c0_222, %c64_223] : memref<4x8x72xf32, #tpu.memory_space<vmem>>, vector<1x8x8xf32>
    %251 = vector.shape_cast %250 : vector<1x8x8xf32> to vector<8x8xf32>
    %cst_224 = arith.constant dense<0.000000e+00> : vector<8x256xf32>
    %252 = tpu.matmul %251, %249, %cst_224 {dimension_numbers = #tpu.dot_dimension_numbers<[1], [0], [0], [1], [0, 0, 1, 1], [], []>} : vector<8x8xf32>, vector<8x256xf32>, vector<8x256xf32> -> vector<8x256xf32>
    %253 = arith.addf %246, %252 : vector<8x256xf32>
    %c3_225 = arith.constant 3 : index
    %c0_226 = arith.constant 0 : index
    %c0_227 = arith.constant 0 : index
    %254 = vector.load %arg3[%c3_225, %c0_226, %c0_227] : memref<4x8x1xf32, #tpu.memory_space<vmem>>, vector<1x8x1xf32>
    %255 = vector.shape_cast %254 : vector<1x8x1xf32> to vector<8x1xf32>
    %256 = vector.broadcast %255 : vector<8x1xf32> to vector<8x256xf32>
    %257 = arith.addf %253, %256 : vector<8x256xf32>
    %c0_228 = arith.constant 0 : index
    %c0_229 = arith.constant 0 : index
    %c0_230 = arith.constant 0 : index
    %258 = vector.load %arg5[%c0_228, %c0_229, %c0_230] : memref<2x8x256xf32, #tpu.memory_space<vmem>>, vector<1x8x256xf32>
    %259 = vector.shape_cast %258 : vector<1x8x256xf32> to vector<8x256xf32>
    %260 = vector.shape_cast %257 : vector<8x256xf32> to vector<1x8x256xf32>
    tpu.vector_store %arg5[%c0_228, %c0_229, %c0_230], %260 {strides = array<i32>} : memref<2x8x256xf32, #tpu.memory_space<vmem>>, vector<1x8x256xf32>,
    %c1_231 = arith.constant 1 : index
    %c0_232 = arith.constant 0 : index
    %c0_233 = arith.constant 0 : index
    %261 = vector.load %arg1[%c1_231, %c0_232, %c0_233] : memref<2x8x256xf32, #tpu.memory_space<vmem>>, vector<1x8x256xf32>
    %262 = vector.shape_cast %261 : vector<1x8x256xf32> to vector<8x256xf32>
    %c0_234 = arith.constant 0 : index
    %c128_235 = arith.constant 128 : index
    %263 = vector.load %arg6[%c0_234, %c128_235] : memref<8x512xf32, #tpu.memory_space<vmem>>, vector<8x256xf32>
    tpu.vector_store %arg6[%c0_234, %c128_235], %262 {strides = array<i32>} : memref<8x512xf32, #tpu.memory_space<vmem>>, vector<8x256xf32>,
    %c0_236 = arith.constant 0 : index
    %c128_237 = arith.constant 128 : index
    %264 = vector.load %arg6[%c0_236, %c128_237] : memref<8x512xf32, #tpu.memory_space<vmem>>, vector<8x256xf32>
    %c0_238 = arith.constant 0 : index
    %c111_239 = arith.constant 111 : index
    %265 = vector.load %arg6[%c0_238, %c111_239] : memref<8x512xf32, #tpu.memory_space<vmem>>, vector<8x256xf32>
    %266 = vector.broadcast %4 : vector<1x256xf32> to vector<8x256xf32>
    %267 = arith.mulf %265, %266 : vector<8x256xf32>
    %c0_240 = arith.constant 0 : index
    %c0_241 = arith.constant 0 : index
    %c0_242 = arith.constant 0 : index
    %268 = vector.load %arg2[%c0_240, %c0_241, %c0_242] : memref<4x8x72xf32, #tpu.memory_space<vmem>>, vector<1x8x8xf32>
    %269 = vector.shape_cast %268 : vector<1x8x8xf32> to vector<8x8xf32>
    %cst_243 = arith.constant dense<0.000000e+00> : vector<8x256xf32>
    %270 = tpu.matmul %269, %267, %cst_243 {dimension_numbers = #tpu.dot_dimension_numbers<[1], [0], [0], [1], [0, 0, 1, 1], [], []>} : vector<8x8xf32>, vector<8x256xf32>, vector<8x256xf32> -> vector<8x256xf32>
    %c0_244 = arith.constant 0 : index
    %c112_245 = arith.constant 112 : index
    %271 = vector.load %arg6[%c0_244, %c112_245] : memref<8x512xf32, #tpu.memory_space<vmem>>, vector<8x256xf32>
    %c0_246 = arith.constant 0 : index
    %c0_247 = arith.constant 0 : index
    %c8_248 = arith.constant 8 : index
    %272 = vector.load %arg2[%c0_246, %c0_247, %c8_248] : memref<4x8x72xf32, #tpu.memory_space<vmem>>, vector<1x8x8xf32>
    %273 = vector.shape_cast %272 : vector<1x8x8xf32> to vector<8x8xf32>
    %cst_249 = arith.constant dense<0.000000e+00> : vector<8x256xf32>
    %274 = tpu.matmul %273, %271, %cst_249 {dimension_numbers = #tpu.dot_dimension_numbers<[1], [0], [0], [1], [0, 0, 1, 1], [], []>} : vector<8x8xf32>, vector<8x256xf32>, vector<8x256xf32> -> vector<8x256xf32>
    %275 = arith.addf %270, %274 : vector<8x256xf32>
    %c0_250 = arith.constant 0 : index
    %c113_251 = arith.constant 113 : index
    %276 = vector.load %arg6[%c0_250, %c113_251] : memref<8x512xf32, #tpu.memory_space<vmem>>, vector<8x256xf32>
    %277 = vector.broadcast %5 : vector<1x256xf32> to vector<8x256xf32>
    %278 = arith.mulf %276, %277 : vector<8x256xf32>
    %c0_252 = arith.constant 0 : index
    %c0_253 = arith.constant 0 : index
    %c16_254 = arith.constant 16 : index
    %279 = vector.load %arg2[%c0_252, %c0_253, %c16_254] : memref<4x8x72xf32, #tpu.memory_space<vmem>>, vector<1x8x8xf32>
    %280 = vector.shape_cast %279 : vector<1x8x8xf32> to vector<8x8xf32>
    %cst_255 = arith.constant dense<0.000000e+00> : vector<8x256xf32>
    %281 = tpu.matmul %280, %278, %cst_255 {dimension_numbers = #tpu.dot_dimension_numbers<[1], [0], [0], [1], [0, 0, 1, 1], [], []>} : vector<8x8xf32>, vector<8x256xf32>, vector<8x256xf32> -> vector<8x256xf32>
    %282 = arith.addf %275, %281 : vector<8x256xf32>
    %c0_256 = arith.constant 0 : index
    %c127_257 = arith.constant 127 : index
    %283 = vector.load %arg6[%c0_256, %c127_257] : memref<8x512xf32, #tpu.memory_space<vmem>>, vector<8x256xf32>
    %284 = vector.broadcast %4 : vector<1x256xf32> to vector<8x256xf32>
    %285 = arith.mulf %283, %284 : vector<8x256xf32>
    %c0_258 = arith.constant 0 : index
    %c0_259 = arith.constant 0 : index
    %c24_260 = arith.constant 24 : index
    %286 = vector.load %arg2[%c0_258, %c0_259, %c24_260] : memref<4x8x72xf32, #tpu.memory_space<vmem>>, vector<1x8x8xf32>
    %287 = vector.shape_cast %286 : vector<1x8x8xf32> to vector<8x8xf32>
    %cst_261 = arith.constant dense<0.000000e+00> : vector<8x256xf32>
    %288 = tpu.matmul %287, %285, %cst_261 {dimension_numbers = #tpu.dot_dimension_numbers<[1], [0], [0], [1], [0, 0, 1, 1], [], []>} : vector<8x8xf32>, vector<8x256xf32>, vector<8x256xf32> -> vector<8x256xf32>
    %289 = arith.addf %282, %288 : vector<8x256xf32>
    %c0_262 = arith.constant 0 : index
    %c0_263 = arith.constant 0 : index
    %c32_264 = arith.constant 32 : index
    %290 = vector.load %arg2[%c0_262, %c0_263, %c32_264] : memref<4x8x72xf32, #tpu.memory_space<vmem>>, vector<1x8x8xf32>
    %291 = vector.shape_cast %290 : vector<1x8x8xf32> to vector<8x8xf32>
    %cst_265 = arith.constant dense<0.000000e+00> : vector<8x256xf32>
    %292 = tpu.matmul %291, %264, %cst_265 {dimension_numbers = #tpu.dot_dimension_numbers<[1], [0], [0], [1], [0, 0, 1, 1], [], []>} : vector<8x8xf32>, vector<8x256xf32>, vector<8x256xf32> -> vector<8x256xf32>
    %293 = arith.addf %289, %292 : vector<8x256xf32>
    %c0_266 = arith.constant 0 : index
    %c129_267 = arith.constant 129 : index
    %294 = vector.load %arg6[%c0_266, %c129_267] : memref<8x512xf32, #tpu.memory_space<vmem>>, vector<8x256xf32>
    %295 = vector.broadcast %5 : vector<1x256xf32> to vector<8x256xf32>
    %296 = arith.mulf %294, %295 : vector<8x256xf32>
    %c0_268 = arith.constant 0 : index
    %c0_269 = arith.constant 0 : index
    %c40_270 = arith.constant 40 : index
    %297 = vector.load %arg2[%c0_268, %c0_269, %c40_270] : memref<4x8x72xf32, #tpu.memory_space<vmem>>, vector<1x8x8xf32>
    %298 = vector.shape_cast %297 : vector<1x8x8xf32> to vector<8x8xf32>
    %cst_271 = arith.constant dense<0.000000e+00> : vector<8x256xf32>
    %299 = tpu.matmul %298, %296, %cst_271 {dimension_numbers = #tpu.dot_dimension_numbers<[1], [0], [0], [1], [0, 0, 1, 1], [], []>} : vector<8x8xf32>, vector<8x256xf32>, vector<8x256xf32> -> vector<8x256xf32>
    %300 = arith.addf %293, %299 : vector<8x256xf32>
    %c0_272 = arith.constant 0 : index
    %c143_273 = arith.constant 143 : index
    %301 = vector.load %arg6[%c0_272, %c143_273] : memref<8x512xf32, #tpu.memory_space<vmem>>, vector<8x256xf32>
    %302 = vector.broadcast %4 : vector<1x256xf32> to vector<8x256xf32>
    %303 = arith.mulf %301, %302 : vector<8x256xf32>
    %c0_274 = arith.constant 0 : index
    %c0_275 = arith.constant 0 : index
    %c48_276 = arith.constant 48 : index
    %304 = vector.load %arg2[%c0_274, %c0_275, %c48_276] : memref<4x8x72xf32, #tpu.memory_space<vmem>>, vector<1x8x8xf32>
    %305 = vector.shape_cast %304 : vector<1x8x8xf32> to vector<8x8xf32>
    %cst_277 = arith.constant dense<0.000000e+00> : vector<8x256xf32>
    %306 = tpu.matmul %305, %303, %cst_277 {dimension_numbers = #tpu.dot_dimension_numbers<[1], [0], [0], [1], [0, 0, 1, 1], [], []>} : vector<8x8xf32>, vector<8x256xf32>, vector<8x256xf32> -> vector<8x256xf32>
    %307 = arith.addf %300, %306 : vector<8x256xf32>
    %c0_278 = arith.constant 0 : index
    %c144_279 = arith.constant 144 : index
    %308 = vector.load %arg6[%c0_278, %c144_279] : memref<8x512xf32, #tpu.memory_space<vmem>>, vector<8x256xf32>
    %c0_280 = arith.constant 0 : index
    %c0_281 = arith.constant 0 : index
    %c56_282 = arith.constant 56 : index
    %309 = vector.load %arg2[%c0_280, %c0_281, %c56_282] : memref<4x8x72xf32, #tpu.memory_space<vmem>>, vector<1x8x8xf32>
    %310 = vector.shape_cast %309 : vector<1x8x8xf32> to vector<8x8xf32>
    %cst_283 = arith.constant dense<0.000000e+00> : vector<8x256xf32>
    %311 = tpu.matmul %310, %308, %cst_283 {dimension_numbers = #tpu.dot_dimension_numbers<[1], [0], [0], [1], [0, 0, 1, 1], [], []>} : vector<8x8xf32>, vector<8x256xf32>, vector<8x256xf32> -> vector<8x256xf32>
    %312 = arith.addf %307, %311 : vector<8x256xf32>
    %c0_284 = arith.constant 0 : index
    %c145_285 = arith.constant 145 : index
    %313 = vector.load %arg6[%c0_284, %c145_285] : memref<8x512xf32, #tpu.memory_space<vmem>>, vector<8x256xf32>
    %314 = vector.broadcast %5 : vector<1x256xf32> to vector<8x256xf32>
    %315 = arith.mulf %313, %314 : vector<8x256xf32>
    %c0_286 = arith.constant 0 : index
    %c0_287 = arith.constant 0 : index
    %c64_288 = arith.constant 64 : index
    %316 = vector.load %arg2[%c0_286, %c0_287, %c64_288] : memref<4x8x72xf32, #tpu.memory_space<vmem>>, vector<1x8x8xf32>
    %317 = vector.shape_cast %316 : vector<1x8x8xf32> to vector<8x8xf32>
    %cst_289 = arith.constant dense<0.000000e+00> : vector<8x256xf32>
    %318 = tpu.matmul %317, %315, %cst_289 {dimension_numbers = #tpu.dot_dimension_numbers<[1], [0], [0], [1], [0, 0, 1, 1], [], []>} : vector<8x8xf32>, vector<8x256xf32>, vector<8x256xf32> -> vector<8x256xf32>
    %319 = arith.addf %312, %318 : vector<8x256xf32>
    %c0_290 = arith.constant 0 : index
    %c0_291 = arith.constant 0 : index
    %c0_292 = arith.constant 0 : index
    %320 = vector.load %arg3[%c0_290, %c0_291, %c0_292] : memref<4x8x1xf32, #tpu.memory_space<vmem>>, vector<1x8x1xf32>
    %321 = vector.shape_cast %320 : vector<1x8x1xf32> to vector<8x1xf32>
    %322 = vector.broadcast %321 : vector<8x1xf32> to vector<8x256xf32>
    %323 = arith.addf %319, %322 : vector<8x256xf32>
    %c0_293 = arith.constant 0 : index
    %c128_294 = arith.constant 128 : index
    %324 = vector.load %arg6[%c0_293, %c128_294] : memref<8x512xf32, #tpu.memory_space<vmem>>, vector<8x256xf32>
    tpu.vector_store %arg6[%c0_293, %c128_294], %323 {strides = array<i32>} : memref<8x512xf32, #tpu.memory_space<vmem>>, vector<8x256xf32>,
    %c0_295 = arith.constant 0 : index
    %c128_296 = arith.constant 128 : index
    %325 = vector.load %arg6[%c0_295, %c128_296] : memref<8x512xf32, #tpu.memory_space<vmem>>, vector<8x256xf32>
    %c0_297 = arith.constant 0 : index
    %c111_298 = arith.constant 111 : index
    %326 = vector.load %arg6[%c0_297, %c111_298] : memref<8x512xf32, #tpu.memory_space<vmem>>, vector<8x256xf32>
    %327 = vector.broadcast %4 : vector<1x256xf32> to vector<8x256xf32>
    %328 = arith.mulf %326, %327 : vector<8x256xf32>
    %c1_299 = arith.constant 1 : index
    %c0_300 = arith.constant 0 : index
    %c0_301 = arith.constant 0 : index
    %329 = vector.load %arg2[%c1_299, %c0_300, %c0_301] : memref<4x8x72xf32, #tpu.memory_space<vmem>>, vector<1x8x8xf32>
    %330 = vector.shape_cast %329 : vector<1x8x8xf32> to vector<8x8xf32>
    %cst_302 = arith.constant dense<0.000000e+00> : vector<8x256xf32>
    %331 = tpu.matmul %330, %328, %cst_302 {dimension_numbers = #tpu.dot_dimension_numbers<[1], [0], [0], [1], [0, 0, 1, 1], [], []>} : vector<8x8xf32>, vector<8x256xf32>, vector<8x256xf32> -> vector<8x256xf32>
    %c0_303 = arith.constant 0 : index
    %c112_304 = arith.constant 112 : index
    %332 = vector.load %arg6[%c0_303, %c112_304] : memref<8x512xf32, #tpu.memory_space<vmem>>, vector<8x256xf32>
    %c1_305 = arith.constant 1 : index
    %c0_306 = arith.constant 0 : index
    %c8_307 = arith.constant 8 : index
    %333 = vector.load %arg2[%c1_305, %c0_306, %c8_307] : memref<4x8x72xf32, #tpu.memory_space<vmem>>, vector<1x8x8xf32>
    %334 = vector.shape_cast %333 : vector<1x8x8xf32> to vector<8x8xf32>
    %cst_308 = arith.constant dense<0.000000e+00> : vector<8x256xf32>
    %335 = tpu.matmul %334, %332, %cst_308 {dimension_numbers = #tpu.dot_dimension_numbers<[1], [0], [0], [1], [0, 0, 1, 1], [], []>} : vector<8x8xf32>, vector<8x256xf32>, vector<8x256xf32> -> vector<8x256xf32>
    %336 = arith.addf %331, %335 : vector<8x256xf32>
    %c0_309 = arith.constant 0 : index
    %c113_310 = arith.constant 113 : index
    %337 = vector.load %arg6[%c0_309, %c113_310] : memref<8x512xf32, #tpu.memory_space<vmem>>, vector<8x256xf32>
    %338 = vector.broadcast %5 : vector<1x256xf32> to vector<8x256xf32>
    %339 = arith.mulf %337, %338 : vector<8x256xf32>
    %c1_311 = arith.constant 1 : index
    %c0_312 = arith.constant 0 : index
    %c16_313 = arith.constant 16 : index
    %340 = vector.load %arg2[%c1_311, %c0_312, %c16_313] : memref<4x8x72xf32, #tpu.memory_space<vmem>>, vector<1x8x8xf32>
    %341 = vector.shape_cast %340 : vector<1x8x8xf32> to vector<8x8xf32>
    %cst_314 = arith.constant dense<0.000000e+00> : vector<8x256xf32>
    %342 = tpu.matmul %341, %339, %cst_314 {dimension_numbers = #tpu.dot_dimension_numbers<[1], [0], [0], [1], [0, 0, 1, 1], [], []>} : vector<8x8xf32>, vector<8x256xf32>, vector<8x256xf32> -> vector<8x256xf32>
    %343 = arith.addf %336, %342 : vector<8x256xf32>
    %c0_315 = arith.constant 0 : index
    %c127_316 = arith.constant 127 : index
    %344 = vector.load %arg6[%c0_315, %c127_316] : memref<8x512xf32, #tpu.memory_space<vmem>>, vector<8x256xf32>
    %345 = vector.broadcast %4 : vector<1x256xf32> to vector<8x256xf32>
    %346 = arith.mulf %344, %345 : vector<8x256xf32>
    %c1_317 = arith.constant 1 : index
    %c0_318 = arith.constant 0 : index
    %c24_319 = arith.constant 24 : index
    %347 = vector.load %arg2[%c1_317, %c0_318, %c24_319] : memref<4x8x72xf32, #tpu.memory_space<vmem>>, vector<1x8x8xf32>
    %348 = vector.shape_cast %347 : vector<1x8x8xf32> to vector<8x8xf32>
    %cst_320 = arith.constant dense<0.000000e+00> : vector<8x256xf32>
    %349 = tpu.matmul %348, %346, %cst_320 {dimension_numbers = #tpu.dot_dimension_numbers<[1], [0], [0], [1], [0, 0, 1, 1], [], []>} : vector<8x8xf32>, vector<8x256xf32>, vector<8x256xf32> -> vector<8x256xf32>
    %350 = arith.addf %343, %349 : vector<8x256xf32>
    %c1_321 = arith.constant 1 : index
    %c0_322 = arith.constant 0 : index
    %c32_323 = arith.constant 32 : index
    %351 = vector.load %arg2[%c1_321, %c0_322, %c32_323] : memref<4x8x72xf32, #tpu.memory_space<vmem>>, vector<1x8x8xf32>
    %352 = vector.shape_cast %351 : vector<1x8x8xf32> to vector<8x8xf32>
    %cst_324 = arith.constant dense<0.000000e+00> : vector<8x256xf32>
    %353 = tpu.matmul %352, %325, %cst_324 {dimension_numbers = #tpu.dot_dimension_numbers<[1], [0], [0], [1], [0, 0, 1, 1], [], []>} : vector<8x8xf32>, vector<8x256xf32>, vector<8x256xf32> -> vector<8x256xf32>
    %354 = arith.addf %350, %353 : vector<8x256xf32>
    %c0_325 = arith.constant 0 : index
    %c129_326 = arith.constant 129 : index
    %355 = vector.load %arg6[%c0_325, %c129_326] : memref<8x512xf32, #tpu.memory_space<vmem>>, vector<8x256xf32>
    %356 = vector.broadcast %5 : vector<1x256xf32> to vector<8x256xf32>
    %357 = arith.mulf %355, %356 : vector<8x256xf32>
    %c1_327 = arith.constant 1 : index
    %c0_328 = arith.constant 0 : index
    %c40_329 = arith.constant 40 : index
    %358 = vector.load %arg2[%c1_327, %c0_328, %c40_329] : memref<4x8x72xf32, #tpu.memory_space<vmem>>, vector<1x8x8xf32>
    %359 = vector.shape_cast %358 : vector<1x8x8xf32> to vector<8x8xf32>
    %cst_330 = arith.constant dense<0.000000e+00> : vector<8x256xf32>
    %360 = tpu.matmul %359, %357, %cst_330 {dimension_numbers = #tpu.dot_dimension_numbers<[1], [0], [0], [1], [0, 0, 1, 1], [], []>} : vector<8x8xf32>, vector<8x256xf32>, vector<8x256xf32> -> vector<8x256xf32>
    %361 = arith.addf %354, %360 : vector<8x256xf32>
    %c0_331 = arith.constant 0 : index
    %c143_332 = arith.constant 143 : index
    %362 = vector.load %arg6[%c0_331, %c143_332] : memref<8x512xf32, #tpu.memory_space<vmem>>, vector<8x256xf32>
    %363 = vector.broadcast %4 : vector<1x256xf32> to vector<8x256xf32>
    %364 = arith.mulf %362, %363 : vector<8x256xf32>
    %c1_333 = arith.constant 1 : index
    %c0_334 = arith.constant 0 : index
    %c48_335 = arith.constant 48 : index
    %365 = vector.load %arg2[%c1_333, %c0_334, %c48_335] : memref<4x8x72xf32, #tpu.memory_space<vmem>>, vector<1x8x8xf32>
    %366 = vector.shape_cast %365 : vector<1x8x8xf32> to vector<8x8xf32>
    %cst_336 = arith.constant dense<0.000000e+00> : vector<8x256xf32>
    %367 = tpu.matmul %366, %364, %cst_336 {dimension_numbers = #tpu.dot_dimension_numbers<[1], [0], [0], [1], [0, 0, 1, 1], [], []>} : vector<8x8xf32>, vector<8x256xf32>, vector<8x256xf32> -> vector<8x256xf32>
    %368 = arith.addf %361, %367 : vector<8x256xf32>
    %c0_337 = arith.constant 0 : index
    %c144_338 = arith.constant 144 : index
    %369 = vector.load %arg6[%c0_337, %c144_338] : memref<8x512xf32, #tpu.memory_space<vmem>>, vector<8x256xf32>
    %c1_339 = arith.constant 1 : index
    %c0_340 = arith.constant 0 : index
    %c56_341 = arith.constant 56 : index
    %370 = vector.load %arg2[%c1_339, %c0_340, %c56_341] : memref<4x8x72xf32, #tpu.memory_space<vmem>>, vector<1x8x8xf32>
    %371 = vector.shape_cast %370 : vector<1x8x8xf32> to vector<8x8xf32>
    %cst_342 = arith.constant dense<0.000000e+00> : vector<8x256xf32>
    %372 = tpu.matmul %371, %369, %cst_342 {dimension_numbers = #tpu.dot_dimension_numbers<[1], [0], [0], [1], [0, 0, 1, 1], [], []>} : vector<8x8xf32>, vector<8x256xf32>, vector<8x256xf32> -> vector<8x256xf32>
    %373 = arith.addf %368, %372 : vector<8x256xf32>
    %c0_343 = arith.constant 0 : index
    %c145_344 = arith.constant 145 : index
    %374 = vector.load %arg6[%c0_343, %c145_344] : memref<8x512xf32, #tpu.memory_space<vmem>>, vector<8x256xf32>
    %375 = vector.broadcast %5 : vector<1x256xf32> to vector<8x256xf32>
    %376 = arith.mulf %374, %375 : vector<8x256xf32>
    %c1_345 = arith.constant 1 : index
    %c0_346 = arith.constant 0 : index
    %c64_347 = arith.constant 64 : index
    %377 = vector.load %arg2[%c1_345, %c0_346, %c64_347] : memref<4x8x72xf32, #tpu.memory_space<vmem>>, vector<1x8x8xf32>
    %378 = vector.shape_cast %377 : vector<1x8x8xf32> to vector<8x8xf32>
    %cst_348 = arith.constant dense<0.000000e+00> : vector<8x256xf32>
    %379 = tpu.matmul %378, %376, %cst_348 {dimension_numbers = #tpu.dot_dimension_numbers<[1], [0], [0], [1], [0, 0, 1, 1], [], []>} : vector<8x8xf32>, vector<8x256xf32>, vector<8x256xf32> -> vector<8x256xf32>
    %380 = arith.addf %373, %379 : vector<8x256xf32>
    %c1_349 = arith.constant 1 : index
    %c0_350 = arith.constant 0 : index
    %c0_351 = arith.constant 0 : index
    %381 = vector.load %arg3[%c1_349, %c0_350, %c0_351] : memref<4x8x1xf32, #tpu.memory_space<vmem>>, vector<1x8x1xf32>
    %382 = vector.shape_cast %381 : vector<1x8x1xf32> to vector<8x1xf32>
    %383 = vector.broadcast %382 : vector<8x1xf32> to vector<8x256xf32>
    %384 = arith.addf %380, %383 : vector<8x256xf32>
    %385 = arith.addf %384, %325 : vector<8x256xf32>
    %cst_352 = arith.constant 0.000000e+00 : f32
    %386 = vector.broadcast %cst_352 : f32 to vector<8x256xf32>
    %387 = arith.maximumf %385, %386 : vector<8x256xf32>
    %c0_353 = arith.constant 0 : index
    %c128_354 = arith.constant 128 : index
    %388 = vector.load %arg6[%c0_353, %c128_354] : memref<8x512xf32, #tpu.memory_space<vmem>>, vector<8x256xf32>
    tpu.vector_store %arg6[%c0_353, %c128_354], %387 {strides = array<i32>} : memref<8x512xf32, #tpu.memory_space<vmem>>, vector<8x256xf32>,
    %c0_355 = arith.constant 0 : index
    %c128_356 = arith.constant 128 : index
    %389 = vector.load %arg6[%c0_355, %c128_356] : memref<8x512xf32, #tpu.memory_space<vmem>>, vector<8x256xf32>
    %c0_357 = arith.constant 0 : index
    %c111_358 = arith.constant 111 : index
    %390 = vector.load %arg6[%c0_357, %c111_358] : memref<8x512xf32, #tpu.memory_space<vmem>>, vector<8x256xf32>
    %391 = vector.broadcast %4 : vector<1x256xf32> to vector<8x256xf32>
    %392 = arith.mulf %390, %391 : vector<8x256xf32>
    %c2_359 = arith.constant 2 : index
    %c0_360 = arith.constant 0 : index
    %c0_361 = arith.constant 0 : index
    %393 = vector.load %arg2[%c2_359, %c0_360, %c0_361] : memref<4x8x72xf32, #tpu.memory_space<vmem>>, vector<1x8x8xf32>
    %394 = vector.shape_cast %393 : vector<1x8x8xf32> to vector<8x8xf32>
    %cst_362 = arith.constant dense<0.000000e+00> : vector<8x256xf32>
    %395 = tpu.matmul %394, %392, %cst_362 {dimension_numbers = #tpu.dot_dimension_numbers<[1], [0], [0], [1], [0, 0, 1, 1], [], []>} : vector<8x8xf32>, vector<8x256xf32>, vector<8x256xf32> -> vector<8x256xf32>
    %c0_363 = arith.constant 0 : index
    %c112_364 = arith.constant 112 : index
    %396 = vector.load %arg6[%c0_363, %c112_364] : memref<8x512xf32, #tpu.memory_space<vmem>>, vector<8x256xf32>
    %c2_365 = arith.constant 2 : index
    %c0_366 = arith.constant 0 : index
    %c8_367 = arith.constant 8 : index
    %397 = vector.load %arg2[%c2_365, %c0_366, %c8_367] : memref<4x8x72xf32, #tpu.memory_space<vmem>>, vector<1x8x8xf32>
    %398 = vector.shape_cast %397 : vector<1x8x8xf32> to vector<8x8xf32>
    %cst_368 = arith.constant dense<0.000000e+00> : vector<8x256xf32>
    %399 = tpu.matmul %398, %396, %cst_368 {dimension_numbers = #tpu.dot_dimension_numbers<[1], [0], [0], [1], [0, 0, 1, 1], [], []>} : vector<8x8xf32>, vector<8x256xf32>, vector<8x256xf32> -> vector<8x256xf32>
    %400 = arith.addf %395, %399 : vector<8x256xf32>
    %c0_369 = arith.constant 0 : index
    %c113_370 = arith.constant 113 : index
    %401 = vector.load %arg6[%c0_369, %c113_370] : memref<8x512xf32, #tpu.memory_space<vmem>>, vector<8x256xf32>
    %402 = vector.broadcast %5 : vector<1x256xf32> to vector<8x256xf32>
    %403 = arith.mulf %401, %402 : vector<8x256xf32>
    %c2_371 = arith.constant 2 : index
    %c0_372 = arith.constant 0 : index
    %c16_373 = arith.constant 16 : index
    %404 = vector.load %arg2[%c2_371, %c0_372, %c16_373] : memref<4x8x72xf32, #tpu.memory_space<vmem>>, vector<1x8x8xf32>
    %405 = vector.shape_cast %404 : vector<1x8x8xf32> to vector<8x8xf32>
    %cst_374 = arith.constant dense<0.000000e+00> : vector<8x256xf32>
    %406 = tpu.matmul %405, %403, %cst_374 {dimension_numbers = #tpu.dot_dimension_numbers<[1], [0], [0], [1], [0, 0, 1, 1], [], []>} : vector<8x8xf32>, vector<8x256xf32>, vector<8x256xf32> -> vector<8x256xf32>
    %407 = arith.addf %400, %406 : vector<8x256xf32>
    %c0_375 = arith.constant 0 : index
    %c127_376 = arith.constant 127 : index
    %408 = vector.load %arg6[%c0_375, %c127_376] : memref<8x512xf32, #tpu.memory_space<vmem>>, vector<8x256xf32>
    %409 = vector.broadcast %4 : vector<1x256xf32> to vector<8x256xf32>
    %410 = arith.mulf %408, %409 : vector<8x256xf32>
    %c2_377 = arith.constant 2 : index
    %c0_378 = arith.constant 0 : index
    %c24_379 = arith.constant 24 : index
    %411 = vector.load %arg2[%c2_377, %c0_378, %c24_379] : memref<4x8x72xf32, #tpu.memory_space<vmem>>, vector<1x8x8xf32>
    %412 = vector.shape_cast %411 : vector<1x8x8xf32> to vector<8x8xf32>
    %cst_380 = arith.constant dense<0.000000e+00> : vector<8x256xf32>
    %413 = tpu.matmul %412, %410, %cst_380 {dimension_numbers = #tpu.dot_dimension_numbers<[1], [0], [0], [1], [0, 0, 1, 1], [], []>} : vector<8x8xf32>, vector<8x256xf32>, vector<8x256xf32> -> vector<8x256xf32>
    %414 = arith.addf %407, %413 : vector<8x256xf32>
    %c2_381 = arith.constant 2 : index
    %c0_382 = arith.constant 0 : index
    %c32_383 = arith.constant 32 : index
    %415 = vector.load %arg2[%c2_381, %c0_382, %c32_383] : memref<4x8x72xf32, #tpu.memory_space<vmem>>, vector<1x8x8xf32>
    %416 = vector.shape_cast %415 : vector<1x8x8xf32> to vector<8x8xf32>
    %cst_384 = arith.constant dense<0.000000e+00> : vector<8x256xf32>
    %417 = tpu.matmul %416, %389, %cst_384 {dimension_numbers = #tpu.dot_dimension_numbers<[1], [0], [0], [1], [0, 0, 1, 1], [], []>} : vector<8x8xf32>, vector<8x256xf32>, vector<8x256xf32> -> vector<8x256xf32>
    %418 = arith.addf %414, %417 : vector<8x256xf32>
    %c0_385 = arith.constant 0 : index
    %c129_386 = arith.constant 129 : index
    %419 = vector.load %arg6[%c0_385, %c129_386] : memref<8x512xf32, #tpu.memory_space<vmem>>, vector<8x256xf32>
    %420 = vector.broadcast %5 : vector<1x256xf32> to vector<8x256xf32>
    %421 = arith.mulf %419, %420 : vector<8x256xf32>
    %c2_387 = arith.constant 2 : index
    %c0_388 = arith.constant 0 : index
    %c40_389 = arith.constant 40 : index
    %422 = vector.load %arg2[%c2_387, %c0_388, %c40_389] : memref<4x8x72xf32, #tpu.memory_space<vmem>>, vector<1x8x8xf32>
    %423 = vector.shape_cast %422 : vector<1x8x8xf32> to vector<8x8xf32>
    %cst_390 = arith.constant dense<0.000000e+00> : vector<8x256xf32>
    %424 = tpu.matmul %423, %421, %cst_390 {dimension_numbers = #tpu.dot_dimension_numbers<[1], [0], [0], [1], [0, 0, 1, 1], [], []>} : vector<8x8xf32>, vector<8x256xf32>, vector<8x256xf32> -> vector<8x256xf32>
    %425 = arith.addf %418, %424 : vector<8x256xf32>
    %c0_391 = arith.constant 0 : index
    %c143_392 = arith.constant 143 : index
    %426 = vector.load %arg6[%c0_391, %c143_392] : memref<8x512xf32, #tpu.memory_space<vmem>>, vector<8x256xf32>
    %427 = vector.broadcast %4 : vector<1x256xf32> to vector<8x256xf32>
    %428 = arith.mulf %426, %427 : vector<8x256xf32>
    %c2_393 = arith.constant 2 : index
    %c0_394 = arith.constant 0 : index
    %c48_395 = arith.constant 48 : index
    %429 = vector.load %arg2[%c2_393, %c0_394, %c48_395] : memref<4x8x72xf32, #tpu.memory_space<vmem>>, vector<1x8x8xf32>
    %430 = vector.shape_cast %429 : vector<1x8x8xf32> to vector<8x8xf32>
    %cst_396 = arith.constant dense<0.000000e+00> : vector<8x256xf32>
    %431 = tpu.matmul %430, %428, %cst_396 {dimension_numbers = #tpu.dot_dimension_numbers<[1], [0], [0], [1], [0, 0, 1, 1], [], []>} : vector<8x8xf32>, vector<8x256xf32>, vector<8x256xf32> -> vector<8x256xf32>
    %432 = arith.addf %425, %431 : vector<8x256xf32>
    %c0_397 = arith.constant 0 : index
    %c144_398 = arith.constant 144 : index
    %433 = vector.load %arg6[%c0_397, %c144_398] : memref<8x512xf32, #tpu.memory_space<vmem>>, vector<8x256xf32>
    %c2_399 = arith.constant 2 : index
    %c0_400 = arith.constant 0 : index
    %c56_401 = arith.constant 56 : index
    %434 = vector.load %arg2[%c2_399, %c0_400, %c56_401] : memref<4x8x72xf32, #tpu.memory_space<vmem>>, vector<1x8x8xf32>
    %435 = vector.shape_cast %434 : vector<1x8x8xf32> to vector<8x8xf32>
    %cst_402 = arith.constant dense<0.000000e+00> : vector<8x256xf32>
    %436 = tpu.matmul %435, %433, %cst_402 {dimension_numbers = #tpu.dot_dimension_numbers<[1], [0], [0], [1], [0, 0, 1, 1], [], []>} : vector<8x8xf32>, vector<8x256xf32>, vector<8x256xf32> -> vector<8x256xf32>
    %437 = arith.addf %432, %436 : vector<8x256xf32>
    %c0_403 = arith.constant 0 : index
    %c145_404 = arith.constant 145 : index
    %438 = vector.load %arg6[%c0_403, %c145_404] : memref<8x512xf32, #tpu.memory_space<vmem>>, vector<8x256xf32>
    %439 = vector.broadcast %5 : vector<1x256xf32> to vector<8x256xf32>
    %440 = arith.mulf %438, %439 : vector<8x256xf32>
    %c2_405 = arith.constant 2 : index
    %c0_406 = arith.constant 0 : index
    %c64_407 = arith.constant 64 : index
    %441 = vector.load %arg2[%c2_405, %c0_406, %c64_407] : memref<4x8x72xf32, #tpu.memory_space<vmem>>, vector<1x8x8xf32>
    %442 = vector.shape_cast %441 : vector<1x8x8xf32> to vector<8x8xf32>
    %cst_408 = arith.constant dense<0.000000e+00> : vector<8x256xf32>
    %443 = tpu.matmul %442, %440, %cst_408 {dimension_numbers = #tpu.dot_dimension_numbers<[1], [0], [0], [1], [0, 0, 1, 1], [], []>} : vector<8x8xf32>, vector<8x256xf32>, vector<8x256xf32> -> vector<8x256xf32>
    %444 = arith.addf %437, %443 : vector<8x256xf32>
    %c2_409 = arith.constant 2 : index
    %c0_410 = arith.constant 0 : index
    %c0_411 = arith.constant 0 : index
    %445 = vector.load %arg3[%c2_409, %c0_410, %c0_411] : memref<4x8x1xf32, #tpu.memory_space<vmem>>, vector<1x8x1xf32>
    %446 = vector.shape_cast %445 : vector<1x8x1xf32> to vector<8x1xf32>
    %447 = vector.broadcast %446 : vector<8x1xf32> to vector<8x256xf32>
    %448 = arith.addf %444, %447 : vector<8x256xf32>
    %449 = arith.addf %448, %389 : vector<8x256xf32>
    %cst_412 = arith.constant 0.000000e+00 : f32
    %450 = vector.broadcast %cst_412 : f32 to vector<8x256xf32>
    %451 = arith.maximumf %449, %450 : vector<8x256xf32>
    %c0_413 = arith.constant 0 : index
    %c128_414 = arith.constant 128 : index
    %452 = vector.load %arg6[%c0_413, %c128_414] : memref<8x512xf32, #tpu.memory_space<vmem>>, vector<8x256xf32>
    tpu.vector_store %arg6[%c0_413, %c128_414], %451 {strides = array<i32>} : memref<8x512xf32, #tpu.memory_space<vmem>>, vector<8x256xf32>,
    %c0_415 = arith.constant 0 : index
    %c128_416 = arith.constant 128 : index
    %453 = vector.load %arg6[%c0_415, %c128_416] : memref<8x512xf32, #tpu.memory_space<vmem>>, vector<8x256xf32>
    %c0_417 = arith.constant 0 : index
    %c111_418 = arith.constant 111 : index
    %454 = vector.load %arg6[%c0_417, %c111_418] : memref<8x512xf32, #tpu.memory_space<vmem>>, vector<8x256xf32>
    %455 = vector.broadcast %4 : vector<1x256xf32> to vector<8x256xf32>
    %456 = arith.mulf %454, %455 : vector<8x256xf32>
    %c3_419 = arith.constant 3 : index
    %c0_420 = arith.constant 0 : index
    %c0_421 = arith.constant 0 : index
    %457 = vector.load %arg2[%c3_419, %c0_420, %c0_421] : memref<4x8x72xf32, #tpu.memory_space<vmem>>, vector<1x8x8xf32>
    %458 = vector.shape_cast %457 : vector<1x8x8xf32> to vector<8x8xf32>
    %cst_422 = arith.constant dense<0.000000e+00> : vector<8x256xf32>
    %459 = tpu.matmul %458, %456, %cst_422 {dimension_numbers = #tpu.dot_dimension_numbers<[1], [0], [0], [1], [0, 0, 1, 1], [], []>} : vector<8x8xf32>, vector<8x256xf32>, vector<8x256xf32> -> vector<8x256xf32>
    %c0_423 = arith.constant 0 : index
    %c112_424 = arith.constant 112 : index
    %460 = vector.load %arg6[%c0_423, %c112_424] : memref<8x512xf32, #tpu.memory_space<vmem>>, vector<8x256xf32>
    %c3_425 = arith.constant 3 : index
    %c0_426 = arith.constant 0 : index
    %c8_427 = arith.constant 8 : index
    %461 = vector.load %arg2[%c3_425, %c0_426, %c8_427] : memref<4x8x72xf32, #tpu.memory_space<vmem>>, vector<1x8x8xf32>
    %462 = vector.shape_cast %461 : vector<1x8x8xf32> to vector<8x8xf32>
    %cst_428 = arith.constant dense<0.000000e+00> : vector<8x256xf32>
    %463 = tpu.matmul %462, %460, %cst_428 {dimension_numbers = #tpu.dot_dimension_numbers<[1], [0], [0], [1], [0, 0, 1, 1], [], []>} : vector<8x8xf32>, vector<8x256xf32>, vector<8x256xf32> -> vector<8x256xf32>
    %464 = arith.addf %459, %463 : vector<8x256xf32>
    %c0_429 = arith.constant 0 : index
    %c113_430 = arith.constant 113 : index
    %465 = vector.load %arg6[%c0_429, %c113_430] : memref<8x512xf32, #tpu.memory_space<vmem>>, vector<8x256xf32>
    %466 = vector.broadcast %5 : vector<1x256xf32> to vector<8x256xf32>
    %467 = arith.mulf %465, %466 : vector<8x256xf32>
    %c3_431 = arith.constant 3 : index
    %c0_432 = arith.constant 0 : index
    %c16_433 = arith.constant 16 : index
    %468 = vector.load %arg2[%c3_431, %c0_432, %c16_433] : memref<4x8x72xf32, #tpu.memory_space<vmem>>, vector<1x8x8xf32>
    %469 = vector.shape_cast %468 : vector<1x8x8xf32> to vector<8x8xf32>
    %cst_434 = arith.constant dense<0.000000e+00> : vector<8x256xf32>
    %470 = tpu.matmul %469, %467, %cst_434 {dimension_numbers = #tpu.dot_dimension_numbers<[1], [0], [0], [1], [0, 0, 1, 1], [], []>} : vector<8x8xf32>, vector<8x256xf32>, vector<8x256xf32> -> vector<8x256xf32>
    %471 = arith.addf %464, %470 : vector<8x256xf32>
    %c0_435 = arith.constant 0 : index
    %c127_436 = arith.constant 127 : index
    %472 = vector.load %arg6[%c0_435, %c127_436] : memref<8x512xf32, #tpu.memory_space<vmem>>, vector<8x256xf32>
    %473 = vector.broadcast %4 : vector<1x256xf32> to vector<8x256xf32>
    %474 = arith.mulf %472, %473 : vector<8x256xf32>
    %c3_437 = arith.constant 3 : index
    %c0_438 = arith.constant 0 : index
    %c24_439 = arith.constant 24 : index
    %475 = vector.load %arg2[%c3_437, %c0_438, %c24_439] : memref<4x8x72xf32, #tpu.memory_space<vmem>>, vector<1x8x8xf32>
    %476 = vector.shape_cast %475 : vector<1x8x8xf32> to vector<8x8xf32>
    %cst_440 = arith.constant dense<0.000000e+00> : vector<8x256xf32>
    %477 = tpu.matmul %476, %474, %cst_440 {dimension_numbers = #tpu.dot_dimension_numbers<[1], [0], [0], [1], [0, 0, 1, 1], [], []>} : vector<8x8xf32>, vector<8x256xf32>, vector<8x256xf32> -> vector<8x256xf32>
    %478 = arith.addf %471, %477 : vector<8x256xf32>
    %c3_441 = arith.constant 3 : index
    %c0_442 = arith.constant 0 : index
    %c32_443 = arith.constant 32 : index
    %479 = vector.load %arg2[%c3_441, %c0_442, %c32_443] : memref<4x8x72xf32, #tpu.memory_space<vmem>>, vector<1x8x8xf32>
    %480 = vector.shape_cast %479 : vector<1x8x8xf32> to vector<8x8xf32>
    %cst_444 = arith.constant dense<0.000000e+00> : vector<8x256xf32>
    %481 = tpu.matmul %480, %453, %cst_444 {dimension_numbers = #tpu.dot_dimension_numbers<[1], [0], [0], [1], [0, 0, 1, 1], [], []>} : vector<8x8xf32>, vector<8x256xf32>, vector<8x256xf32> -> vector<8x256xf32>
    %482 = arith.addf %478, %481 : vector<8x256xf32>
    %c0_445 = arith.constant 0 : index
    %c129_446 = arith.constant 129 : index
    %483 = vector.load %arg6[%c0_445, %c129_446] : memref<8x512xf32, #tpu.memory_space<vmem>>, vector<8x256xf32>
    %484 = vector.broadcast %5 : vector<1x256xf32> to vector<8x256xf32>
    %485 = arith.mulf %483, %484 : vector<8x256xf32>
    %c3_447 = arith.constant 3 : index
    %c0_448 = arith.constant 0 : index
    %c40_449 = arith.constant 40 : index
    %486 = vector.load %arg2[%c3_447, %c0_448, %c40_449] : memref<4x8x72xf32, #tpu.memory_space<vmem>>, vector<1x8x8xf32>
    %487 = vector.shape_cast %486 : vector<1x8x8xf32> to vector<8x8xf32>
    %cst_450 = arith.constant dense<0.000000e+00> : vector<8x256xf32>
    %488 = tpu.matmul %487, %485, %cst_450 {dimension_numbers = #tpu.dot_dimension_numbers<[1], [0], [0], [1], [0, 0, 1, 1], [], []>} : vector<8x8xf32>, vector<8x256xf32>, vector<8x256xf32> -> vector<8x256xf32>
    %489 = arith.addf %482, %488 : vector<8x256xf32>
    %c0_451 = arith.constant 0 : index
    %c143_452 = arith.constant 143 : index
    %490 = vector.load %arg6[%c0_451, %c143_452] : memref<8x512xf32, #tpu.memory_space<vmem>>, vector<8x256xf32>
    %491 = vector.broadcast %4 : vector<1x256xf32> to vector<8x256xf32>
    %492 = arith.mulf %490, %491 : vector<8x256xf32>
    %c3_453 = arith.constant 3 : index
    %c0_454 = arith.constant 0 : index
    %c48_455 = arith.constant 48 : index
    %493 = vector.load %arg2[%c3_453, %c0_454, %c48_455] : memref<4x8x72xf32, #tpu.memory_space<vmem>>, vector<1x8x8xf32>
    %494 = vector.shape_cast %493 : vector<1x8x8xf32> to vector<8x8xf32>
    %cst_456 = arith.constant dense<0.000000e+00> : vector<8x256xf32>
    %495 = tpu.matmul %494, %492, %cst_456 {dimension_numbers = #tpu.dot_dimension_numbers<[1], [0], [0], [1], [0, 0, 1, 1], [], []>} : vector<8x8xf32>, vector<8x256xf32>, vector<8x256xf32> -> vector<8x256xf32>
    %496 = arith.addf %489, %495 : vector<8x256xf32>
    %c0_457 = arith.constant 0 : index
    %c144_458 = arith.constant 144 : index
    %497 = vector.load %arg6[%c0_457, %c144_458] : memref<8x512xf32, #tpu.memory_space<vmem>>, vector<8x256xf32>
    %c3_459 = arith.constant 3 : index
    %c0_460 = arith.constant 0 : index
    %c56_461 = arith.constant 56 : index
    %498 = vector.load %arg2[%c3_459, %c0_460, %c56_461] : memref<4x8x72xf32, #tpu.memory_space<vmem>>, vector<1x8x8xf32>
    %499 = vector.shape_cast %498 : vector<1x8x8xf32> to vector<8x8xf32>
    %cst_462 = arith.constant dense<0.000000e+00> : vector<8x256xf32>
    %500 = tpu.matmul %499, %497, %cst_462 {dimension_numbers = #tpu.dot_dimension_numbers<[1], [0], [0], [1], [0, 0, 1, 1], [], []>} : vector<8x8xf32>, vector<8x256xf32>, vector<8x256xf32> -> vector<8x256xf32>
    %501 = arith.addf %496, %500 : vector<8x256xf32>
    %c0_463 = arith.constant 0 : index
    %c145_464 = arith.constant 145 : index
    %502 = vector.load %arg6[%c0_463, %c145_464] : memref<8x512xf32, #tpu.memory_space<vmem>>, vector<8x256xf32>
    %503 = vector.broadcast %5 : vector<1x256xf32> to vector<8x256xf32>
    %504 = arith.mulf %502, %503 : vector<8x256xf32>
    %c3_465 = arith.constant 3 : index
    %c0_466 = arith.constant 0 : index
    %c64_467 = arith.constant 64 : index
    %505 = vector.load %arg2[%c3_465, %c0_466, %c64_467] : memref<4x8x72xf32, #tpu.memory_space<vmem>>, vector<1x8x8xf32>
    %506 = vector.shape_cast %505 : vector<1x8x8xf32> to vector<8x8xf32>
    %cst_468 = arith.constant dense<0.000000e+00> : vector<8x256xf32>
    %507 = tpu.matmul %506, %504, %cst_468 {dimension_numbers = #tpu.dot_dimension_numbers<[1], [0], [0], [1], [0, 0, 1, 1], [], []>} : vector<8x8xf32>, vector<8x256xf32>, vector<8x256xf32> -> vector<8x256xf32>
    %508 = arith.addf %501, %507 : vector<8x256xf32>
    %c3_469 = arith.constant 3 : index
    %c0_470 = arith.constant 0 : index
    %c0_471 = arith.constant 0 : index
    %509 = vector.load %arg3[%c3_469, %c0_470, %c0_471] : memref<4x8x1xf32, #tpu.memory_space<vmem>>, vector<1x8x1xf32>
    %510 = vector.shape_cast %509 : vector<1x8x1xf32> to vector<8x1xf32>
    %511 = vector.broadcast %510 : vector<8x1xf32> to vector<8x256xf32>
    %512 = arith.addf %508, %511 : vector<8x256xf32>
    %c1_472 = arith.constant 1 : index
    %c0_473 = arith.constant 0 : index
    %c0_474 = arith.constant 0 : index
    %513 = vector.load %arg5[%c1_472, %c0_473, %c0_474] : memref<2x8x256xf32, #tpu.memory_space<vmem>>, vector<1x8x256xf32>
    %514 = vector.shape_cast %513 : vector<1x8x256xf32> to vector<8x256xf32>
    %515 = vector.shape_cast %512 : vector<8x256xf32> to vector<1x8x256xf32>
    tpu.vector_store %arg5[%c1_472, %c0_473, %c0_474], %515 {strides = array<i32>} : memref<2x8x256xf32, #tpu.memory_space<vmem>>, vector<1x8x256xf32>,
    return
  }
  func.func @transform_0(%arg0: i32) -> (i32, i32, i32) {
    %c0_i32 = arith.constant 0 : i32
    %c0_i32_0 = arith.constant 0 : i32
    %c0_i32_1 = arith.constant 0 : i32
    return %arg0, %c0_i32, %c0_i32_0 : i32, i32, i32
  }
  func.func @transform_1(%arg0: i32) -> (i32, i32, i32) {
    %c0_i32 = arith.constant 0 : i32
    %c0_i32_0 = arith.constant 0 : i32
    %c0_i32_1 = arith.constant 0 : i32
    %c0_i32_2 = arith.constant 0 : i32
    return %c0_i32, %c0_i32_0, %c0_i32_1 : i32, i32, i32
  }
  func.func @transform_2(%arg0: i32) -> (i32, i32, i32) {
    %c0_i32 = arith.constant 0 : i32
    %c0_i32_0 = arith.constant 0 : i32
    %c0_i32_1 = arith.constant 0 : i32
    %c0_i32_2 = arith.constant 0 : i32
    return %c0_i32, %c0_i32_0, %c0_i32_1 : i32, i32, i32
  }
  func.func @transform_3(%arg0: i32) -> (i32, i32) {
    %c0_i32 = arith.constant 0 : i32
    %c0_i32_0 = arith.constant 0 : i32
    %c0_i32_1 = arith.constant 0 : i32
    return %c0_i32, %c0_i32_0 : i32, i32
  }
  func.func @transform_4(%arg0: i32) -> (i32, i32, i32) {
    %c0_i32 = arith.constant 0 : i32
    %c0_i32_0 = arith.constant 0 : i32
    %c0_i32_1 = arith.constant 0 : i32
    return %arg0, %c0_i32, %c0_i32_0 : i32, i32, i32
  }
}

</mosaic_0001>

<bundles_post_ra>
// kernel: resid_cnn_forward.1
= control target key start
LH: loop header
LB: loop body
LE: loop exit
PB: predicated region body
PF: predicated region fallthrough
CT: control target
= control target key end

     0   :  { %s5031_s19 = smov 113   ;;  %s5032_s20 = smov 111   ;;  %v5042_v9 = vmov 0.0   ;;  %vm240_vm0 = vcmask 1039360   ;;  %vm36_vm1 = vcmask 908288   ;;  %vm168_vm2 = vcmask 924672   ;;  %s6184_s3 = inlined_call_operand.vmem [shape: f32[2,256], index: 3, kind: input, shape index: {}]   ;;  %s6185_s0 = inlined_call_operand.vmem [shape: f32[2,8,256], index: 0, kind: input, shape index: {}]   ;;  %s6186_s1 = inlined_call_operand.vmem [shape: f32[4,8,72], index: 1, kind: input, shape index: {}]   ;;  %s6187_s2 = inlined_call_operand.vmem [shape: f32[4,8,1], index: 2, kind: input, shape index: {}]   ;;  %s6188_s4 = inlined_call_operand.vmem [shape: f32[2,8,256], index: 4, kind: output, shape index: {}]  }
   0x1   :  { %v4505_v0 = vld [vmem:[%s6184_s3 + $0x1] ss:$2 sm:$0x3]  ;;  %v19_v1 = vld [vmem:[%s6184_s3] ss:$2 sm:$0x3] }
   0x2   :  { %v162_v2 = vperm.slane %v4505_v0, 0  ;;  %v30_v3 = vperm.slane %v19_v1, 0  ;;  %s5033_s21 = smov 127   ;;  %v163_v4 = vperm.slane %v4505_v0, 1  ;;  %v31_v5 = vperm.slane %v19_v1, 1  ;;  %s5034_s3 = smov 1  }
   0x3   :  { %s5035_s22 = smov 15   ;;  %s5036_s23 = smov 17   ;;  %v5094_v6 = vld [vmem:[%s6185_s0 + $0x8] sm:$0xff]  ;;  %v5101_v7 = vld [vmem:[%s6186_s1] sm:$0xff]  ;;  %vm259_vm3 = vcmask 7168   ;;  %v5044_v35 = vmov 0  }
   0x4   :  { %164 = vrot.lane.b32.xlu1 %v162_v2, %s5031_s19  ;;  %32 = vrot.lane.b32.xlu0 %v30_v3, %s5032_s20  ;;  %s5037_s26 = smov 16   ;;  %s5038_s29 = smov 88   ;;  %v5114_v8 = vld [vmem:[%s6185_s0] sm:$0xff]  ;;  %vm187_vm4 = vcmask 121856   ;;  %vm114_vm5 = vcmask 138240   ;;  %vm57_vm6 = vcmask 130048  }
   0x5   :  { %236 = vrot.lane.b32.xlu2 %v30_v3, %s5033_s21  ;;  %s5039_s30 = smov 120   ;;  %s5040_s5 = smov 104   ;;  %v4683_v10 = vpack.i.bf16 %v5114_v8, %v5042_v9  ;;  %4723 = vset.pattern.permute.xlu0 %v5044_v35  ;;  %v4708_v44 = vpack.i.bf16 %v5094_v6, %v5114_v8  ;;  %v627_v55 = vld [vmem:[%s6187_s2] sm:$0xff]  ;;  %vm62_vm7 = vcmask 64512   ;;  %vm508_vm8 = vcmask 916480  }
   0x6   :  { %s5041_s6 = smov 96   ;;  %s5043_s9 = smov 112   ;;  %4764 = vset.pattern.permute.xlu2 %v5044_v35  ;;  %4990 = vset.pattern.permute.xlu1 %v5044_v35 }
   0x7   :  { %s5045_s10 = smov 80   ;;  %s5046_s11 = smov 72  }
   0x8   :  { %s5047_s12 = smov 64  }
   0xc   :  { %166 = vrot.lane.b32.xlu1 %v163_v4, %s5031_s19  ;;  %34 = vrot.lane.b32.xlu0 %v31_v5, %s5032_s20 }
   0xd   :  { %238 = vrot.lane.b32.xlu2 %v31_v5, %s5033_s21 }
  0x14   :  { %357 = vrot.lane.b32.xlu0 %v162_v2, %s5034_s3  ;;  %359 = vrot.lane.b32.xlu1 %v163_v4, %s5034_s3 }
  0x15   :  { %427 = vrot.lane.b32.xlu2 %v30_v3, %s5035_s22 }
  0x1c   :  { %429 = vrot.lane.b32.xlu0 %v31_v5, %s5035_s22  ;;  %557 = vrot.lane.b32.xlu1 %v162_v2, %s5036_s23 }
  0x1d   :  { %559 = vrot.lane.b32.xlu2 %v163_v4, %s5036_s23 }
  0x24   :  { %55 = vrot.lane.b32.xlu1 %v5094_v6, %s5037_s26  ;;  %4684 = vrot.lane.b32.xlu0 %v4683_v10, %s5037_s26 }
  0x25   :  { %368 = vrot.lane.b32.xlu2 %v5101_v7, %s5038_s29 }
  0x2c   :  { %46 = vrot.lane.b32.xlu1 %v5101_v7, %s5039_s30  ;;  %176 = vrot.lane.b32.xlu0 %v5101_v7, %s5043_s9 }
  0x34   :  { %248 = vrot.lane.b32.xlu1 %v5101_v7, %s5040_s5 }
  0x3c   :  { %308 = vrot.lane.b32.xlu1 %v5101_v7, %s5041_s6 }
  0x5f   :  { %v237_v11 = vpop.permute.xlu2 %236 }
  0x60   :  { %v5121_v12 = vmul.f32 0.0, %v237_v11 }
  0x67   :  { %v5123_v13 = vpop.permute.xlu2 %238 }
  0x68   :  { %v5127_v14 = vsel %vm240_vm0, %v237_v11, %v5123_v13  ;;  %v247_v15 = vmul.f32 %v5123_v13, %v5094_v6 }
  0x69   :  { %v246_v16 = vmul.f32 %v5127_v14, %v5114_v8 }
  0x6a   :  { %257 = vrot.lane.b32.xlu2 %v247_v15, %s5034_s3 }
  0x6b   :  { %v4698_v17 = vpack.i.bf16 %v246_v16, %v5121_v12 }
  0x6d   :  { %4699 = vrot.lane.b32.xlu1 %v4698_v17, %s5034_s3 }
  0x6f   :  { %v5180_v42 = vpop.permute.xlu2 %427 }
  0x70   :  { %v435_v45 = vmul.f32 %v5180_v42, %v5114_v8 }
  0x76   :  { %v165_v18 = vpop.permute.xlu1 %164  ;;  %v33_v19 = vpop.permute.xlu0 %32 }
  0x77   :  { %v5146_v24 = vmul.f32 0.0, %v33_v19  ;;  %v5159_v29 = vmul.f32 0.0, %v165_v18  ;;  %v560_v47 = vpop.permute.xlu2 %559 }
  0x78   :  { %v5204_v50 = vmul.f32 0.0, %v560_v47 }
  0x7e   :  { %v5136_v20 = vpop.permute.xlu1 %166  ;;  %v5138_v21 = vpop.permute.xlu0 %34 }
  0x7f   :  { %v43_v22 = vmul.f32 %v5138_v21, %v5094_v6  ;;  %v5144_v23 = vsel %vm36_vm1, %v33_v19, %v5138_v21  ;;  %v5154_v27 = vsel %vm168_vm2, %v165_v18, %v5136_v20  ;;  %v175_v28 = vmul.f32 %v5136_v20, %v5094_v6  ;;  %v369_v63 = vpop.permute.xlu2 %368 }
  0x80   :  { %v42_v25 = vmul.f32 %v5144_v23, %v5114_v8  ;;  %v174_v31 = vmul.f32 %v5154_v27, %v5114_v8 }
  0x81   :  { %112 = vrot.lane.b32.xlu0 %v43_v22, %s5036_s23 }
  0x82   :  { %v4688_v26 = vpack.i.bf16 %v42_v25, %v5146_v24  ;;  %v4693_v34 = vpack.i.bf16 %v174_v31, %v5159_v29 }
  0x84   :  { %4689 = vrot.lane.b32.xlu2 %v4688_v26, %s5036_s23 }
  0x86   :  { %v5161_v30 = vpop.permute.xlu0 %357  ;;  %v360_v32 = vpop.permute.xlu1 %359 }
  0x87   :  { %v5168_v33 = vsel %vm259_vm3, %v5161_v30, %v360_v32  ;;  %v365_v36 = vmul.f32 %v5161_v30, %v5114_v8  ;;  %v5176_v38 = vmul.f32 0.0, %v360_v32 }
  0x88   :  { %v366_v37 = vmul.f32 %v5168_v33, %v5094_v6 }
  0x89   :  { %185 = vrot.lane.b32.xlu0 %v175_v28, %s5035_s22 }
  0x8a   :  { %v4703_v41 = vpack.i.bf16 %v366_v37, %v365_v36 }
  0x8c   :  { %4694 = vrot.lane.b32.xlu2 %v4693_v34, %s5035_s22 }
  0x8e   :  { %v430_v39 = vpop.permute.xlu0 %429  ;;  %v5201_v48 = vpop.permute.xlu1 %557 }
  0x8f   :  { %v5178_v40 = vmul.f32 0.0, %v430_v39  ;;  %v5189_v43 = vsel %vm187_vm4, %v5180_v42, %v430_v39  ;;  %v5208_v51 = vsel %vm114_vm5, %v5201_v48, %v560_v47  ;;  %v565_v52 = vmul.f32 %v5201_v48, %v5114_v8 }
  0x90   :  { %v436_v46 = vmul.f32 %v5189_v43, %v5094_v6  ;;  %v566_v53 = vmul.f32 %v5208_v51, %v5094_v6 }
  0x91   :  { %377 = vrot.lane.b32.xlu0 %v5176_v38, %s5033_s21  ;;  %447 = vrot.lane.b32.xlu1 %v5178_v40, %s5031_s19 }
  0x92   :  { %v4713_v49 = vpack.i.bf16 %v436_v46, %v435_v45  ;;  %v4718_v54 = vpack.i.bf16 %v566_v53, %v565_v52 }
  0x94   :  { %4704 = vrot.lane.b32.xlu2 %v4703_v41, %s5033_s21 }
  0x96   :  { %v56_v56 = vpop.permute.xlu1 %55  ;;  %v4685_v57 = vpop.permute.xlu0 %4684 }
  0x97   :  { %v4687_v58 = vunpack.i.h.bf16 %v4685_v57  ;;  %v4686_v59 = vunpack.i.l.bf16 %v4685_v57 }
  0x99   :  { %506 = vrot.lane.b32.xlu0 %v5042_v9, %s5043_s9  ;;  %438 = vrot.lane.b32.xlu1 %v5101_v7, %s5045_s10  ;;  %v58_v60 = vsel %vm57_vm6, %v4686_v59, %v4687_v58  ;;  %v59_v62 = vsel %vm57_vm6, %v4687_v58, %v56_v56 }
  0x9a   :  { %80 = vmatpush.msra.mxu0 %v58_v60  ;;  %100 = vmatpush.msra.mxu1 %v59_v62 }
  0x9c   :  { %4709 = vrot.lane.b32.xlu2 %v4708_v44, %s5043_s9 }
  0x9e   :  { %v47_v61 = vpop.permute.xlu1 %46  ;;  %v177_v25 = vpop.permute.xlu0 %176 }
  0x9f   :  { %4506 = vmatmul.msk.f32.vlgmr.msra.gmra.mxu0 %vm62_vm7, %v47_v61  ;;  %4507 = vmatmul.msk.f32.vlgmr.msra.gmra.mxu1 %vm62_vm7, %v47_v61 }
  0xa1   :  { %4714 = vrot.lane.b32.xlu0 %v4713_v49, %s5031_s19  ;;  %577 = vrot.lane.b32.xlu1 %v5204_v50, %s5032_s20 }
  0xa4   :  { %497 = vrot.lane.b32.xlu2 %v5101_v7, %s5046_s11 }
  0xa6   :  { %v249_v0 = vpop.permute.xlu1 %248 }
  0xa9   :  { %4719 = vrot.lane.b32.xlu0 %v4718_v54, %s5032_s20 }
  0xac   :  { %568 = vrot.lane.b32.xlu2 %v5101_v7, %s5047_s12 }
  0xae   :  { %v309_v2 = vpop.permute.xlu1 %308 }
  0xb1   :  { %630 = vperm.xlu0 %4723, %v627_v55  }
  0xb9   :  { %1005 = vrot.lane.b32.xlu0 %v5178_v40, %s5031_s19 }
  0xc1   :  { %943 = vrot.lane.b32.xlu0 %v5176_v38, %s5033_s21 }
  0xc4   :  { %v258_v1 = vpop.permute.xlu2 %257 }
  0xde   :  { %v4690_v3 = vpop.permute.xlu2 %4689 }
  0xdf   :  { %v4692_v4 = vunpack.i.h.bf16 %v4690_v3  ;;  %v4691_v5 = vunpack.i.l.bf16 %v4690_v3  ;;  %v4700_v10 = vpop.permute.xlu1 %4699  ;;  %v5270_v3 = vld [vmem:[%s6186_s1 + $0x8] sm:$0xff] }
  0xe0   :  { %v4702_v11 = vunpack.i.h.bf16 %v4700_v10  ;;  %v4701_v15 = vunpack.i.l.bf16 %v4700_v10  ;;  %646 = vrot.lane.b32.xlu1 %v5270_v3, %s5039_s30 }
  0xe1   :  { %v115_v16 = vsel %vm114_vm5, %v4691_v5, %v4692_v4 }
  0xe2   :  { %136 = vmatpush.msra.mxu2 %v115_v16  ;;  %v260_v17 = vsel %vm259_vm3, %v4701_v15, %v4702_v11  ;;  %v261_v37 = vsel %vm259_vm3, %v4702_v11, %v258_v1 }
  0xe3   :  { %4508 = vmatmul.msk.f32.vlgmr.msra.gmra.mxu2 %vm62_vm7, %v5101_v7 }
  0xe4   :  { %281 = vmatpush.msrb.mxu2 %v260_v17 }
  0xe6   :  { %v4695_v18 = vpop.permute.xlu2 %4694 }
  0xe7   :  { %v4697_v19 = vunpack.i.h.bf16 %v4695_v18  ;;  %v4696_v22 = vunpack.i.l.bf16 %v4695_v18 }
  0xe8   :  { %761 = vrot.lane.b32.xlu1 %v5270_v3, %s5043_s9 }
  0xe9   :  { %v188_v26 = vsel %vm187_vm4, %v4696_v22, %v4697_v19 }
  0xea   :  { %209 = vmatpush.msrb.mxu0 %v188_v26 }
  0xeb   :  { %4510 = vmatmul.msk.f32.vlgmr.msrb.gmra.mxu0 %vm62_vm7, %v177_v25  ;;  %4512 = vmatmul.msk.f32.vlgmr.msrb.gmra.mxu2 %vm62_vm7, %v249_v0 }
  0xec   :  { %327 = vmatpush.msra.mxu0 %v5114_v8 }
  0xee   :  { %v4705_v28 = vpop.permute.xlu2 %4704 }
  0xef   :  { %v4707_v31 = vunpack.i.h.bf16 %v4705_v28  ;;  %v4706_v32 = vunpack.i.l.bf16 %v4705_v28 }
  0xf0   :  { %882 = vrot.lane.b32.xlu1 %v5270_v3, %s5041_s6 }
  0xf1   :  { %v379_v34 = vsel %vm240_vm0, %v4706_v32, %v4707_v31 }
  0xf2   :  { %400 = vmatpush.msra.mxu2 %v379_v34 }
  0xf3   :  { %v113_v35 = vpop.permute.xlu0 %112  ;;  %4514 = vmatmul.msk.f32.vlgmr.msra.gmra.mxu0 %vm62_vm7, %v309_v2  ;;  %4516 = vmatmul.msk.f32.vlgmr.msra.gmra.mxu2 %vm62_vm7, %v369_v63 }
  0xf4   :  { %v116_v36 = vsel %vm114_vm5, %v4692_v4, %v113_v35 }
  0xf5   :  { %156 = vmatpush.msra.mxu3 %v116_v36 }
  0xf6   :  { %4509 = vmatmul.msk.f32.vlgmr.msra.gmra.mxu3 %vm62_vm7, %v5101_v7  ;;  %v4710_v8 = vpop.permute.xlu2 %4709 }
  0xf7   :  { %301 = vmatpush.msrb.mxu3 %v261_v37  ;;  %v4712_v39 = vunpack.i.h.bf16 %v4710_v8  ;;  %v4711_v41 = vunpack.i.l.bf16 %v4710_v8 }
  0xf9   :  { %v509_v44 = vsel %vm508_vm8, %v4711_v41, %v4712_v39 }
  0xfa   :  { %530 = vmatpush.msrb.mxu2 %v509_v44 }
  0xfb   :  { %v186_v45 = vpop.permute.xlu0 %185 }
  0xfc   :  { %v189_v46 = vsel %vm187_vm4, %v4697_v19, %v186_v45 }
  0xfd   :  { %229 = vmatpush.msrb.mxu1 %v189_v46 }
  0xfe   :  { %4511 = vmatmul.msk.f32.vlgmr.msrb.gmra.mxu1 %vm62_vm7, %v177_v25  ;;  %4513 = vmatmul.msk.f32.vlgmr.msrb.gmra.mxu3 %vm62_vm7, %v249_v0  ;;  %v498_v47 = vpop.permute.xlu2 %497 }
  0xff   :  { %347 = vmatpush.msra.mxu1 %v5094_v6  ;;  %4520 = vmatmul.msk.f32.vlgmr.msrb.gmra.mxu2 %vm62_vm7, %v498_v47 }
 0x103   :  { %v378_v7 = vpop.permute.xlu0 %377  ;;  %v448_v52 = vpop.permute.xlu1 %447 }
 0x104   :  { %v380_v49 = vsel %vm240_vm0, %v4707_v31, %v378_v7 }
 0x105   :  { %420 = vmatpush.msra.mxu3 %v380_v49 }
 0x106   :  { %4515 = vmatmul.msk.f32.vlgmr.msra.gmra.mxu1 %vm62_vm7, %v309_v2  ;;  %4517 = vmatmul.msk.f32.vlgmr.msra.gmra.mxu3 %vm62_vm7, %v369_v63  ;;  %v569_v0 = vpop.permute.xlu2 %568 }
 0x10b   :  { %v507_v53 = vpop.permute.xlu0 %506  ;;  %v439_v55 = vpop.permute.xlu1 %438 }
 0x10c   :  { %v510_v54 = vsel %vm508_vm8, %v4712_v39, %v507_v53 }
 0x10d   :  { %550 = vmatpush.msrb.mxu3 %v510_v54 }
 0x10e   :  { %4521 = vmatmul.msk.f32.vlgmr.msrb.gmra.mxu3 %vm62_vm7, %v498_v47 }
 0x113   :  { %v4715_v56 = vpop.permute.xlu0 %4714  ;;  %v578_v63 = vpop.permute.xlu1 %577 }
 0x114   :  { %v4717_v6 = vunpack.i.h.bf16 %v4715_v56  ;;  %v4716_v57 = vunpack.i.l.bf16 %v4715_v56 }
 0x116   :  { %v449_v58 = vsel %vm168_vm2, %v4716_v57, %v4717_v6  ;;  %v450_v59 = vsel %vm168_vm2, %v4717_v6, %v448_v52 }
 0x117   :  { %470 = vmatpush.msrb.mxu0 %v449_v58  ;;  %490 = vmatpush.msrb.mxu1 %v450_v59 }
 0x118   :  { %4518 = vmatmul.msk.f32.vlgmr.msrb.gmra.mxu0 %vm62_vm7, %v439_v55  ;;  %4519 = vmatmul.msk.f32.vlgmr.msrb.gmra.mxu1 %vm62_vm7, %v439_v55 }
 0x11b   :  { %v4720_v60 = vpop.permute.xlu0 %4719 }
 0x11c   :  { %v4722_v61 = vunpack.i.h.bf16 %v4720_v60  ;;  %v4721_v62 = vunpack.i.l.bf16 %v4720_v60  ;;  %v82_v4 = vpop.f32.mrf.mxu0  ;;  %v102_v5 = vpop.f32.mrf.mxu1 }
 0x11e   :  { %v579_v1 = vsel %vm36_vm1, %v4721_v62, %v4722_v61  ;;  %v580_v2 = vsel %vm36_vm1, %v4722_v61, %v578_v63 }
 0x11f   :  { %600 = vmatpush.msra.mxu0 %v579_v1  ;;  %620 = vmatpush.msra.mxu1 %v580_v2 }
 0x120   :  { %4522 = vmatmul.msk.f32.vlgmr.msra.gmra.mxu0 %vm62_vm7, %v569_v0  ;;  %4523 = vmatmul.msk.f32.vlgmr.msra.gmra.mxu1 %vm62_vm7, %v569_v0 }
 0x123   :  { %v631_v57 = vpop.permute.xlu0 %630 }
 0x166   :  { %v138_v10 = vpop.f32.mrf.mxu2 }
 0x167   :  { %v139_v19 = vadd.f32 %v138_v10, %v82_v4 }
 0x168   :  { %v211_v15 = vpop.f32.mrf.mxu0 }
 0x169   :  { %v234_v28 = vadd.f32 %v211_v15, %v139_v19 }
 0x16e   :  { %v283_v17 = vpop.f32.mrf.mxu2 }
 0x16f   :  { %v306_v32 = vadd.f32 %v283_v17, %v234_v28 }
 0x170   :  { %v329_v25 = vpop.f32.mrf.mxu0 }
 0x171   :  { %v352_v37 = vadd.f32 %v329_v25, %v306_v32  ;;  %v647_v32 = vpop.permute.xlu1 %646 }
 0x176   :  { %v402_v35 = vpop.f32.mrf.mxu2 }
 0x177   :  { %v425_v44 = vadd.f32 %v402_v35, %v352_v37 }
 0x179   :  { %v158_v11 = vpop.f32.mrf.mxu3  ;;  %v762_v35 = vpop.permute.xlu1 %761 }
 0x17a   :  { %v159_v22 = vadd.f32 %v158_v11, %v102_v5 }
 0x17b   :  { %v231_v16 = vpop.f32.mrf.mxu1 }
 0x17c   :  { %v235_v31 = vadd.f32 %v231_v16, %v159_v22  ;;  %v5332_v22 = vld [vmem:[%s6186_s1 + $0x10] sm:$0xff] }
 0x181   :  { %v303_v18 = vpop.f32.mrf.mxu3 }
 0x182   :  { %v307_v34 = vadd.f32 %v303_v18, %v235_v31  ;;  %v532_v7 = vpop.f32.mrf.mxu2 }
 0x183   :  { %v349_v26 = vpop.f32.mrf.mxu1 }
 0x184   :  { %v353_v8 = vadd.f32 %v349_v26, %v307_v34 }
 0x189   :  { %v422_v36 = vpop.f32.mrf.mxu3 }
 0x18a   :  { %v426_v45 = vadd.f32 %v422_v36, %v353_v8  ;;  %v1006_v36 = vpop.permute.xlu0 %1005 }
 0x191   :  { %v552_v49 = vpop.f32.mrf.mxu3 }
 0x195   :  { %v472_v39 = vpop.f32.mrf.mxu0  ;;  %v492_v41 = vpop.f32.mrf.mxu1 }
 0x196   :  { %v495_v46 = vadd.f32 %v472_v39, %v425_v44  ;;  %v496_v47 = vadd.f32 %v492_v41, %v426_v45  ;;  %v883_v39 = vpop.permute.xlu1 %882  ;;  %v944_v45 = vpop.permute.xlu0 %943 }
 0x198   :  { %v555_v52 = vadd.f32 %v532_v7, %v495_v46  ;;  %v556_v53 = vadd.f32 %v552_v49, %v496_v47 }
 0x19d   :  { %v602_v54 = vpop.f32.mrf.mxu0  ;;  %v622_v55 = vpop.f32.mrf.mxu1 }
 0x19e   :  { %v625_v56 = vadd.f32 %v602_v54, %v555_v52  ;;  %v626_v6 = vadd.f32 %v622_v55, %v556_v53 }
 0x1a0   :  { %v5278_v58 = vadd.f32 %v631_v57, %v625_v56  ;;  %v5280_v59 = vadd.f32 %v631_v57, %v626_v6 }
 0x1a2   :  { %655 = vrot.lane.b32.xlu2 %v5280_v59, %s5037_s26  ;;  %v760_v60 = vmul.f32 %v5280_v59, %v5136_v20  ;;  %v4724_v61 = vpack.i.bf16 %v5278_v58, %v5042_v9  ;;  %v759_v62 = vmul.f32 %v5278_v58, %v5154_v27  ;;  %v642_v0 = vmul.f32 %v5280_v59, %v5138_v21 }
 0x1a3   :  { %v641_v1 = vmul.f32 %v5278_v58, %v5144_v23  ;;  %v822_v4 = vmul.f32 %v5280_v59, %v5123_v13  ;;  %v821_v5 = vmul.f32 %v5278_v58, %v5127_v14  ;;  %v993_v11 = vmul.f32 %v5278_v58, %v5180_v42 }
 0x1a4   :  { %770 = vrot.lane.b32.xlu0 %v760_v60, %s5035_s22  ;;  %4725 = vrot.lane.b32.xlu1 %v4724_v61, %s5037_s26  ;;  %v4729_v63 = vpack.i.bf16 %v759_v62, %v5159_v29  ;;  %v994_v15 = vmul.f32 %v5280_v59, %v5189_v43  ;;  %v931_v17 = vmul.f32 %v5278_v58, %v5161_v30 }
 0x1a5   :  { %v4734_v2 = vpack.i.bf16 %v641_v1, %v5146_v24  ;;  %v4739_v10 = vpack.i.bf16 %v821_v5, %v5121_v12  ;;  %v932_v18 = vmul.f32 %v5280_v59, %v5168_v33  ;;  %v1114_v25 = vmul.f32 %v5278_v58, %v5201_v48 }
 0x1a6   :  { %v4744_v16 = vpack.i.bf16 %v994_v15, %v993_v11  ;;  %v1115_v26 = vmul.f32 %v5280_v59, %v5208_v51  ;;  %v4759_v31 = vpack.i.bf16 %v5280_v59, %v5278_v58 }
 0x1a7   :  { %v4749_v19 = vpack.i.bf16 %v932_v18, %v931_v17 }
 0x1a8   :  { %v4754_v28 = vpack.i.bf16 %v1115_v26, %v1114_v25  ;;  %v4543_v26 = vld [vmem:[%s6187_s2 + $0x8] sm:$0xff] }
 0x1aa   :  { %4730 = vrot.lane.b32.xlu2 %v4729_v63, %s5035_s22 }
 0x1ac   :  { %710 = vrot.lane.b32.xlu0 %v642_v0, %s5036_s23  ;;  %823 = vrot.lane.b32.xlu1 %v5270_v3, %s5040_s5 }
 0x1b2   :  { %4735 = vrot.lane.b32.xlu2 %v4734_v2, %s5036_s23 }
 0x1b4   :  { %832 = vrot.lane.b32.xlu0 %v822_v4, %s5034_s3  ;;  %996 = vrot.lane.b32.xlu1 %v5270_v3, %s5045_s10 }
 0x1ba   :  { %4740 = vrot.lane.b32.xlu2 %v4739_v10, %s5034_s3 }
 0x1bc   :  { %1126 = vrot.lane.b32.xlu0 %v5204_v50, %s5032_s20  ;;  %934 = vrot.lane.b32.xlu1 %v5270_v3, %s5038_s29 }
 0x1c2   :  { %4745 = vrot.lane.b32.xlu2 %v4744_v16, %s5031_s19 }
 0x1c4   :  { %1064 = vrot.lane.b32.xlu0 %v5042_v9, %s5043_s9  ;;  %1117 = vrot.lane.b32.xlu1 %v5270_v3, %s5047_s12 }
 0x1ca   :  { %4750 = vrot.lane.b32.xlu2 %v4749_v19, %s5033_s21 }
 0x1cc   :  { %1315 = vrot.lane.b32.xlu0 %v5332_v22, %s5043_s9  ;;  %1055 = vrot.lane.b32.xlu1 %v5270_v3, %s5046_s11 }
 0x1d2   :  { %4755 = vrot.lane.b32.xlu2 %v4754_v28, %s5032_s20 }
 0x1d4   :  { %1497 = vrot.lane.b32.xlu0 %v5176_v38, %s5033_s21  ;;  %1200 = vrot.lane.b32.xlu1 %v5332_v22, %s5039_s30 }
 0x1da   :  { %4760 = vrot.lane.b32.xlu2 %v4759_v31, %s5043_s9 }
 0x1dc   :  { %1377 = vrot.lane.b32.xlu1 %v5332_v22, %s5040_s5 }
 0x1e2   :  { %1180 = vperm.xlu2 %4764, %v4543_v26  }
 0x1e4   :  { %1436 = vrot.lane.b32.xlu1 %v5332_v22, %s5041_s6 }
 0x1ea   :  { %1488 = vrot.lane.b32.xlu2 %v5332_v22, %s5038_s29 }
 0x1fc   :  { %v656_v34 = vpop.permute.xlu2 %655 }
 0x204   :  { %v4731_v37 = vpop.permute.xlu2 %4730 }
 0x205   :  { %v4733_v52 = vunpack.i.h.bf16 %v4731_v37  ;;  %v4732_v55 = vunpack.i.l.bf16 %v4731_v37 }
 0x207   :  { %v772_v63 = vsel %vm187_vm4, %v4732_v55, %v4733_v52 }
 0x20c   :  { %v4736_v8 = vpop.permute.xlu2 %4735 }
 0x20d   :  { %v4738_v41 = vunpack.i.h.bf16 %v4736_v8  ;;  %v4737_v44 = vunpack.i.l.bf16 %v4736_v8 }
 0x20f   :  { %v712_v46 = vsel %vm114_vm5, %v4737_v44, %v4738_v41 }
 0x210   :  { %733 = vmatpush.msrb.mxu0 %v712_v46 }
 0x211   :  { %4527 = vmatmul.msk.f32.vlgmr.msrb.gmra.mxu0 %vm62_vm7, %v5270_v3 }
 0x214   :  { %v4741_v47 = vpop.permute.xlu2 %4740 }
 0x215   :  { %v4743_v7 = vunpack.i.h.bf16 %v4741_v47  ;;  %v4742_v49 = vunpack.i.l.bf16 %v4741_v47 }
 0x216   :  { %v771_v53 = vpop.permute.xlu0 %770  ;;  %v4726_v54 = vpop.permute.xlu1 %4725 }
 0x217   :  { %v4728_v56 = vunpack.i.h.bf16 %v4726_v54  ;;  %v4727_v6 = vunpack.i.l.bf16 %v4726_v54  ;;  %v834_v57 = vsel %vm259_vm3, %v4742_v49, %v4743_v7  ;;  %v773_v62 = vsel %vm187_vm4, %v4733_v52, %v771_v53 }
 0x218   :  { %855 = vmatpush.msra.mxu0 %v834_v57 }
 0x219   :  { %v657_v60 = vsel %vm57_vm6, %v4727_v6, %v4728_v56  ;;  %v658_v61 = vsel %vm57_vm6, %v4728_v56, %v656_v34 }
 0x21a   :  { %678 = vmatpush.msra.mxu2 %v657_v60  ;;  %698 = vmatpush.msra.mxu3 %v658_v61 }
 0x21b   :  { %4525 = vmatmul.msk.f32.vlgmr.msra.gmra.mxu2 %vm62_vm7, %v647_v32  ;;  %4526 = vmatmul.msk.f32.vlgmr.msra.gmra.mxu3 %vm62_vm7, %v647_v32 }
 0x21c   :  { %793 = vmatpush.msrb.mxu2 %v772_v63  ;;  %813 = vmatpush.msrb.mxu3 %v773_v62  ;;  %v4746_v0 = vpop.permute.xlu2 %4745 }
 0x21d   :  { %v4748_v4 = vunpack.i.h.bf16 %v4746_v0  ;;  %v4747_v5 = vunpack.i.l.bf16 %v4746_v0 }
 0x21e   :  { %901 = vmatpush.msra.mxu2 %v5278_v58  ;;  %921 = vmatpush.msra.mxu3 %v5280_v59  ;;  %v711_v1 = vpop.permute.xlu0 %710  ;;  %v824_v2 = vpop.permute.xlu1 %823 }
 0x21f   :  { %v713_v10 = vsel %vm114_vm5, %v4738_v41, %v711_v1  ;;  %4531 = vmatmul.msk.f32.vlgmr.msra.gmra.mxu0 %vm62_vm7, %v824_v2  ;;  %v1007_v11 = vsel %vm168_vm2, %v4747_v5, %v4748_v4  ;;  %v1008_v15 = vsel %vm168_vm2, %v4748_v4, %v1006_v36 }
 0x220   :  { %753 = vmatpush.msrb.mxu1 %v713_v10 }
 0x221   :  { %4528 = vmatmul.msk.f32.vlgmr.msrb.gmra.mxu1 %vm62_vm7, %v5270_v3 }
 0x223   :  { %4529 = vmatmul.msk.f32.vlgmr.msrb.gmra.mxu2 %vm62_vm7, %v762_v35  ;;  %4530 = vmatmul.msk.f32.vlgmr.msrb.gmra.mxu3 %vm62_vm7, %v762_v35 }
 0x224   :  { %1028 = vmatpush.msrb.mxu2 %v1007_v11  ;;  %1048 = vmatpush.msrb.mxu3 %v1008_v15  ;;  %v4751_v16 = vpop.permute.xlu2 %4750 }
 0x225   :  { %v4753_v17 = vunpack.i.h.bf16 %v4751_v16  ;;  %v4752_v18 = vunpack.i.l.bf16 %v4751_v16 }
 0x226   :  { %v833_v19 = vpop.permute.xlu0 %832  ;;  %v997_v25 = vpop.permute.xlu1 %996 }
 0x227   :  { %v835_v3 = vsel %vm259_vm3, %v4743_v7, %v833_v19  ;;  %v945_v28 = vsel %vm240_vm0, %v4752_v18, %v4753_v17  ;;  %v946_v31 = vsel %vm240_vm0, %v4753_v17, %v944_v45 }
 0x228   :  { %875 = vmatpush.msra.mxu1 %v835_v3  ;;  %966 = vmatpush.msrb.mxu0 %v945_v28 }
 0x229   :  { %4532 = vmatmul.msk.f32.vlgmr.msra.gmra.mxu1 %vm62_vm7, %v824_v2 }
 0x22a   :  { %986 = vmatpush.msrb.mxu1 %v946_v31 }
 0x22b   :  { %4533 = vmatmul.msk.f32.vlgmr.msra.gmra.mxu2 %vm62_vm7, %v883_v39  ;;  %4534 = vmatmul.msk.f32.vlgmr.msra.gmra.mxu3 %vm62_vm7, %v883_v39 }
 0x22c   :  { %v4756_v32 = vpop.permute.xlu2 %4755 }
 0x22d   :  { %v4758_v34 = vunpack.i.h.bf16 %v4756_v32  ;;  %v4757_v35 = vunpack.i.l.bf16 %v4756_v32 }
 0x22e   :  { %v1127_v36 = vpop.permute.xlu0 %1126  ;;  %v935_v37 = vpop.permute.xlu1 %934 }
 0x22f   :  { %v1129_v8 = vsel %vm36_vm1, %v4758_v34, %v1127_v36  ;;  %4535 = vmatmul.msk.f32.vlgmr.msrb.gmra.mxu0 %vm62_vm7, %v935_v37  ;;  %v1128_v41 = vsel %vm36_vm1, %v4757_v35, %v4758_v34 }
 0x230   :  { %1149 = vmatpush.msra.mxu2 %v1128_v41  ;;  %1169 = vmatpush.msra.mxu3 %v1129_v8 }
 0x231   :  { %4536 = vmatmul.msk.f32.vlgmr.msrb.gmra.mxu1 %vm62_vm7, %v935_v37 }
 0x233   :  { %4537 = vmatmul.msk.f32.vlgmr.msrb.gmra.mxu2 %vm62_vm7, %v997_v25  ;;  %4538 = vmatmul.msk.f32.vlgmr.msrb.gmra.mxu3 %vm62_vm7, %v997_v25 }
 0x234   :  { %v4761_v39 = vpop.permute.xlu2 %4760 }
 0x235   :  { %v4763_v44 = vunpack.i.h.bf16 %v4761_v39  ;;  %v4762_v45 = vunpack.i.l.bf16 %v4761_v39 }
 0x236   :  { %v1065_v46 = vpop.permute.xlu0 %1064  ;;  %v1118_v47 = vpop.permute.xlu1 %1117 }
 0x237   :  { %v1067_v7 = vsel %vm508_vm8, %v4763_v44, %v1065_v46  ;;  %v1066_v49 = vsel %vm508_vm8, %v4762_v45, %v4763_v44 }
 0x238   :  { %1087 = vmatpush.msra.mxu0 %v1066_v49  ;;  %1107 = vmatpush.msra.mxu1 %v1067_v7 }
 0x23b   :  { %4541 = vmatmul.msk.f32.vlgmr.msra.gmra.mxu2 %vm62_vm7, %v1118_v47  ;;  %4542 = vmatmul.msk.f32.vlgmr.msra.gmra.mxu3 %vm62_vm7, %v1118_v47 }
 0x23c   :  { %v1181_v36 = vpop.permute.xlu2 %1180 }
 0x23e   :  { %v1056_v52 = vpop.permute.xlu1 %1055 }
 0x23f   :  { %4539 = vmatmul.msk.f32.vlgmr.msra.gmra.mxu0 %vm62_vm7, %v1056_v52  ;;  %4540 = vmatmul.msk.f32.vlgmr.msra.gmra.mxu1 %vm62_vm7, %v1056_v52 }
 0x28e   :  { %v735_v56 = vpop.f32.mrf.mxu0 }
 0x29c   :  { %v857_v61 = vpop.f32.mrf.mxu0 }
 0x29e   :  { %v680_v53 = vpop.f32.mrf.mxu2  ;;  %v700_v54 = vpop.f32.mrf.mxu3 }
 0x29f   :  { %v755_v55 = vpop.f32.mrf.mxu1  ;;  %v736_v62 = vadd.f32 %v735_v56, %v680_v53 }
 0x2a0   :  { %v756_v63 = vadd.f32 %v755_v55, %v700_v54 }
 0x2a6   :  { %v795_v6 = vpop.f32.mrf.mxu2  ;;  %v815_v57 = vpop.f32.mrf.mxu3 }
 0x2a7   :  { %v877_v60 = vpop.f32.mrf.mxu1  ;;  %v818_v2 = vadd.f32 %v795_v6, %v736_v62  ;;  %v819_v4 = vadd.f32 %v815_v57, %v756_v63 }
 0x2a9   :  { %v881_v5 = vadd.f32 %v877_v60, %v819_v4  ;;  %v880_v10 = vadd.f32 %v857_v61, %v818_v2 }
 0x2ac   :  { %v968_v11 = vpop.f32.mrf.mxu0 }
 0x2ae   :  { %v903_v0 = vpop.f32.mrf.mxu2  ;;  %v923_v1 = vpop.f32.mrf.mxu3 }
 0x2af   :  { %v988_v15 = vpop.f32.mrf.mxu1  ;;  %v926_v16 = vadd.f32 %v903_v0, %v880_v10  ;;  %v927_v17 = vadd.f32 %v923_v1, %v881_v5 }
 0x2b1   :  { %v992_v25 = vadd.f32 %v988_v15, %v927_v17  ;;  %v991_v26 = vadd.f32 %v968_v11, %v926_v16  ;;  %v4563_v15 = vld [vmem:[%s6187_s2 + $0x10] sm:$0xff]  ;;  %v5468_v16 = vld [vmem:[%s6186_s1 + $0x18] sm:$0xff] }
 0x2b2   :  { %v5481_v17 = vld [vmem:[%s6185_s0 + $0x10] sm:$0xff] }
 0x2b6   :  { %v1030_v18 = vpop.f32.mrf.mxu2  ;;  %v1050_v19 = vpop.f32.mrf.mxu3 }
 0x2b7   :  { %v1053_v3 = vadd.f32 %v1030_v18, %v991_v26  ;;  %v1054_v28 = vadd.f32 %v1050_v19, %v992_v25  ;;  %v2593_v18 = vmul.f32 %v5481_v17, %v5161_v30  ;;  %v5491_v25 = vpop.permute.xlu2 %1488  ;;  %v1201_v26 = vpop.permute.xlu1 %1200 }
 0x2b9   :  { %v4805_v19 = vpack.i.bf16 %v2593_v18, %v5176_v38 }
 0x2bc   :  { %v1089_v31 = vpop.f32.mrf.mxu0  ;;  %v1109_v32 = vpop.f32.mrf.mxu1 }
 0x2bd   :  { %v1112_v34 = vadd.f32 %v1089_v31, %v1053_v3  ;;  %v1113_v35 = vadd.f32 %v1109_v32, %v1054_v28 }
 0x2be   :  { %v1151_v37 = vpop.f32.mrf.mxu2  ;;  %v1171_v8 = vpop.f32.mrf.mxu3 }
 0x2bf   :  { %v1174_v41 = vadd.f32 %v1151_v37, %v1112_v34  ;;  %v1175_v39 = vadd.f32 %v1171_v8, %v1113_v35  ;;  %v1378_v28 = vpop.permute.xlu1 %1377  ;;  %v1316_v35 = vpop.permute.xlu0 %1315 }
 0x2c1   :  { %v1183_v44 = vadd.f32 %v1181_v36, %v1174_v41  ;;  %v1184_v45 = vadd.f32 %v1181_v36, %v1175_v39 }
 0x2c3   :  { %v1185_v46 = vadd.f32 %v1183_v44, %v5278_v58  ;;  %v1186_v47 = vadd.f32 %v1184_v45, %v5280_v59 }
 0x2c5   :  { %v5400_v7 = vmax.f32 %v1185_v46, 0.0  ;;  %v5402_v49 = vmax.f32 %v1186_v47, 0.0 }
 0x2c7   :  { %1209 = vrot.lane.b32.xlu1 %v5402_v49, %s5037_s26  ;;  %v4765_v52 = vpack.i.bf16 %v5400_v7, %v5042_v9  ;;  %v1195_v53 = vmul.f32 %v5400_v7, %v5144_v23  ;;  %v1375_v58 = vmul.f32 %v5400_v7, %v5127_v14  ;;  %v1313_v55 = vmul.f32 %v5400_v7, %v5154_v27  ;;  %v1437_v37 = vpop.permute.xlu1 %1436  ;;  %v1498_v8 = vpop.permute.xlu0 %1497 }
 0x2c8   :  { %v1196_v56 = vmul.f32 %v5402_v49, %v5138_v21  ;;  %v1314_v57 = vmul.f32 %v5402_v49, %v5136_v20  ;;  %v1376_v60 = vmul.f32 %v5402_v49, %v5123_v13  ;;  %v1485_v61 = vmul.f32 %v5400_v7, %v5161_v30 }
 0x2c9   :  { %4766 = vrot.lane.b32.xlu0 %v4765_v52, %s5037_s26  ;;  %v4770_v54 = vpack.i.bf16 %v1195_v53, %v5146_v24  ;;  %v4780_v59 = vpack.i.bf16 %v1375_v58, %v5121_v12  ;;  %v4775_v6 = vpack.i.bf16 %v1313_v55, %v5159_v29  ;;  %v1486_v62 = vmul.f32 %v5402_v49, %v5168_v33 }
 0x2ca   :  { %v1547_v0 = vmul.f32 %v5400_v7, %v5180_v42  ;;  %v1548_v1 = vmul.f32 %v5402_v49, %v5189_v43  ;;  %v4790_v4 = vpack.i.bf16 %v5402_v49, %v5400_v7  ;;  %v1668_v5 = vmul.f32 %v5400_v7, %v5201_v48 }
 0x2cb   :  { %4771 = vrot.lane.b32.xlu2 %v4770_v54, %s5036_s23  ;;  %v4785_v63 = vpack.i.bf16 %v1486_v62, %v1485_v61  ;;  %v1669_v10 = vmul.f32 %v5402_v49, %v5208_v51 }
 0x2cc   :  { %v4795_v2 = vpack.i.bf16 %v1548_v1, %v1547_v0 }
 0x2cd   :  { %v4800_v11 = vpack.i.bf16 %v1669_v10, %v1668_v5 }
 0x2cf   :  { %4781 = vrot.lane.b32.xlu1 %v4780_v59, %s5034_s3 }
 0x2d1   :  { %1264 = vrot.lane.b32.xlu0 %v1196_v56, %s5036_s23 }
 0x2d3   :  { %4776 = vrot.lane.b32.xlu2 %v4775_v6, %s5035_s22 }
 0x2d7   :  { %1559 = vrot.lane.b32.xlu1 %v5178_v40, %s5031_s19 }
 0x2d9   :  { %1324 = vrot.lane.b32.xlu0 %v1314_v57, %s5035_s22 }
 0x2db   :  { %1386 = vrot.lane.b32.xlu2 %v1376_v60, %s5034_s3 }
 0x2df   :  { %1550 = vrot.lane.b32.xlu1 %v5332_v22, %s5045_s10 }
 0x2e1   :  { %1618 = vrot.lane.b32.xlu0 %v5042_v9, %s5043_s9 }
 0x2e3   :  { %4786 = vrot.lane.b32.xlu2 %v4785_v63, %s5033_s21 }
 0x2e7   :  { %1680 = vrot.lane.b32.xlu1 %v5204_v50, %s5032_s20 }
 0x2e9   :  { %4796 = vrot.lane.b32.xlu0 %v4795_v2, %s5031_s19 }
 0x2eb   :  { %4791 = vrot.lane.b32.xlu2 %v4790_v4, %s5043_s9 }
 0x2ef   :  { %2113 = vrot.lane.b32.xlu1 %v5178_v40, %s5031_s19 }
 0x2f1   :  { %4801 = vrot.lane.b32.xlu0 %v4800_v11, %s5032_s20 }
 0x2f3   :  { %1609 = vrot.lane.b32.xlu2 %v5332_v22, %s5046_s11 }
 0x2f9   :  { %1734 = vperm.xlu0 %4723, %v4563_v15  }
 0x2fb   :  { %1671 = vrot.lane.b32.xlu2 %v5332_v22, %s5047_s12 }
 0x301   :  { %1754 = vrot.lane.b32.xlu0 %v5468_v16, %s5039_s30 }
 0x303   :  { %1869 = vrot.lane.b32.xlu2 %v5468_v16, %s5043_s9 }
 0x309   :  { %1990 = vrot.lane.b32.xlu0 %v5468_v16, %s5041_s6 }
 0x30b   :  { %1931 = vrot.lane.b32.xlu2 %v5468_v16, %s5040_s5 }
 0x311   :  { %2104 = vrot.lane.b32.xlu0 %v5468_v16, %s5045_s10 }
 0x313   :  { %4806 = vrot.lane.b32.xlu2 %v4805_v19, %s5033_s21 }
 0x319   :  { %2225 = vrot.lane.b32.xlu0 %v5468_v16, %s5047_s12 }
 0x31b   :  { %2042 = vrot.lane.b32.xlu2 %v5468_v16, %s5038_s29 }
 0x325   :  { %v4772_v3 = vpop.permute.xlu2 %4771 }
 0x326   :  { %v4774_v31 = vunpack.i.h.bf16 %v4772_v3  ;;  %v4773_v32 = vunpack.i.l.bf16 %v4772_v3 }
 0x328   :  { %v1266_v34 = vsel %vm114_vm5, %v4773_v32, %v4774_v31 }
 0x329   :  { %1287 = vmatpush.msrb.mxu2 %v1266_v34 }
 0x32a   :  { %4547 = vmatmul.msk.f32.vlgmr.msrb.gmra.mxu2 %vm62_vm7, %v5332_v22 }
 0x32d   :  { %v4777_v36 = vpop.permute.xlu2 %4776 }
 0x32e   :  { %v4779_v45 = vunpack.i.h.bf16 %v4777_v36  ;;  %v4778_v46 = vunpack.i.l.bf16 %v4777_v36 }
 0x330   :  { %v1326_v59 = vsel %vm187_vm4, %v4778_v46, %v4779_v45 }
 0x335   :  { %v1387_v41 = vpop.permute.xlu2 %1386 }
 0x339   :  { %v1210_v39 = vpop.permute.xlu1 %1209 }
 0x33b   :  { %v4767_v44 = vpop.permute.xlu0 %4766 }
 0x33c   :  { %v4769_v47 = vunpack.i.h.bf16 %v4767_v44  ;;  %v4768_v52 = vunpack.i.l.bf16 %v4767_v44 }
 0x33d   :  { %v4787_v53 = vpop.permute.xlu2 %4786 }
 0x33e   :  { %v1211_v54 = vsel %vm57_vm6, %v4768_v52, %v4769_v47  ;;  %v1212_v58 = vsel %vm57_vm6, %v4769_v47, %v1210_v39  ;;  %v4789_v56 = vunpack.i.h.bf16 %v4787_v53  ;;  %v4788_v6 = vunpack.i.l.bf16 %v4787_v53 }
 0x33f   :  { %1232 = vmatpush.msrb.mxu0 %v1211_v54  ;;  %1252 = vmatpush.msrb.mxu1 %v1212_v58 }
 0x340   :  { %4545 = vmatmul.msk.f32.vlgmr.msrb.gmra.mxu0 %vm62_vm7, %v1201_v26  ;;  %4546 = vmatmul.msk.f32.vlgmr.msrb.gmra.mxu1 %vm62_vm7, %v1201_v26  ;;  %v1499_v5 = vsel %vm240_vm0, %v4788_v6, %v4789_v56  ;;  %v1500_v10 = vsel %vm240_vm0, %v4789_v56, %v1498_v8 }
 0x341   :  { %1347 = vmatpush.msra.mxu0 %v1326_v59  ;;  %v4782_v55 = vpop.permute.xlu1 %4781 }
 0x342   :  { %v4784_v57 = vunpack.i.h.bf16 %v4782_v55  ;;  %v4783_v60 = vunpack.i.l.bf16 %v4782_v55 }
 0x343   :  { %1455 = vmatpush.msrb.mxu0 %v5400_v7  ;;  %v1265_v61 = vpop.permute.xlu0 %1264 }
 0x344   :  { %v1267_v62 = vsel %vm114_vm5, %v4774_v31, %v1265_v61  ;;  %v1388_v63 = vsel %vm259_vm3, %v4783_v60, %v4784_v57  ;;  %v1389_v0 = vsel %vm259_vm3, %v4784_v57, %v1387_v41 }
 0x345   :  { %v4792_v1 = vpop.permute.xlu2 %4791  ;;  %1307 = vmatpush.msrb.mxu3 %v1267_v62  ;;  %1409 = vmatpush.msra.mxu2 %v1388_v63 }
 0x346   :  { %v4794_v2 = vunpack.i.h.bf16 %v4792_v1  ;;  %v4793_v4 = vunpack.i.l.bf16 %v4792_v1  ;;  %4548 = vmatmul.msk.f32.vlgmr.msrb.gmra.mxu3 %vm62_vm7, %v5332_v22  ;;  %4551 = vmatmul.msk.f32.vlgmr.msra.gmra.mxu2 %vm62_vm7, %v1378_v28 }
 0x347   :  { %1429 = vmatpush.msra.mxu3 %v1389_v0  ;;  %1520 = vmatpush.msrb.mxu2 %v1499_v5 }
 0x348   :  { %4549 = vmatmul.msk.f32.vlgmr.msra.gmra.mxu0 %vm62_vm7, %v1316_v35  ;;  %v1620_v11 = vsel %vm508_vm8, %v4793_v4, %v4794_v2 }
 0x349   :  { %1540 = vmatpush.msrb.mxu3 %v1500_v10  ;;  %1641 = vmatpush.msra.mxu2 %v1620_v11  ;;  %v1560_v22 = vpop.permute.xlu1 %1559 }
 0x34b   :  { %v1325_v15 = vpop.permute.xlu0 %1324 }
 0x34c   :  { %v1327_v18 = vsel %vm187_vm4, %v4779_v45, %v1325_v15 }
 0x34d   :  { %1367 = vmatpush.msra.mxu1 %v1327_v18  ;;  %v1610_v3 = vpop.permute.xlu2 %1609 }
 0x34e   :  { %4550 = vmatmul.msk.f32.vlgmr.msra.gmra.mxu1 %vm62_vm7, %v1316_v35  ;;  %4552 = vmatmul.msk.f32.vlgmr.msra.gmra.mxu3 %vm62_vm7, %v1378_v28 }
 0x34f   :  { %1475 = vmatpush.msrb.mxu1 %v5402_v49  ;;  %4555 = vmatmul.msk.f32.vlgmr.msrb.gmra.mxu2 %vm62_vm7, %v5491_v25 }
 0x350   :  { %4553 = vmatmul.msk.f32.vlgmr.msrb.gmra.mxu0 %vm62_vm7, %v1437_v37 }
 0x351   :  { %v1551_v28 = vpop.permute.xlu1 %1550 }
 0x353   :  { %v1619_v19 = vpop.permute.xlu0 %1618 }
 0x354   :  { %v1621_v26 = vsel %vm508_vm8, %v4794_v2, %v1619_v19 }
 0x355   :  { %1661 = vmatpush.msra.mxu3 %v1621_v26  ;;  %v1672_v45 = vpop.permute.xlu2 %1671 }
 0x356   :  { %4554 = vmatmul.msk.f32.vlgmr.msrb.gmra.mxu1 %vm62_vm7, %v1437_v37  ;;  %4556 = vmatmul.msk.f32.vlgmr.msrb.gmra.mxu3 %vm62_vm7, %v5491_v25 }
 0x357   :  { %4559 = vmatmul.msk.f32.vlgmr.msra.gmra.mxu2 %vm62_vm7, %v1610_v3 }
 0x359   :  { %v1681_v41 = vpop.permute.xlu1 %1680 }
 0x35b   :  { %v4797_v31 = vpop.permute.xlu0 %4796 }
 0x35c   :  { %v4799_v32 = vunpack.i.h.bf16 %v4797_v31  ;;  %v4798_v34 = vunpack.i.l.bf16 %v4797_v31 }
 0x35e   :  { %4560 = vmatmul.msk.f32.vlgmr.msra.gmra.mxu3 %vm62_vm7, %v1610_v3  ;;  %v1561_v35 = vsel %vm168_vm2, %v4798_v34, %v4799_v32  ;;  %v1562_v36 = vsel %vm168_vm2, %v4799_v32, %v1560_v22 }
 0x35f   :  { %1582 = vmatpush.msra.mxu0 %v1561_v35  ;;  %1602 = vmatpush.msra.mxu1 %v1562_v36 }
 0x360   :  { %4557 = vmatmul.msk.f32.vlgmr.msra.gmra.mxu0 %vm62_vm7, %v1551_v28  ;;  %4558 = vmatmul.msk.f32.vlgmr.msra.gmra.mxu1 %vm62_vm7, %v1551_v28 }
 0x363   :  { %v4802_v37 = vpop.permute.xlu0 %4801 }
 0x364   :  { %v4804_v25 = vunpack.i.h.bf16 %v4802_v37  ;;  %v4803_v8 = vunpack.i.l.bf16 %v4802_v37 }
 0x366   :  { %v1682_v39 = vsel %vm36_vm1, %v4803_v8, %v4804_v25  ;;  %v1683_v44 = vsel %vm36_vm1, %v4804_v25, %v1681_v41 }
 0x367   :  { %1703 = vmatpush.msrb.mxu0 %v1682_v39  ;;  %1723 = vmatpush.msrb.mxu1 %v1683_v44 }
 0x368   :  { %4561 = vmatmul.msk.f32.vlgmr.msrb.gmra.mxu0 %vm62_vm7, %v1672_v45  ;;  %4562 = vmatmul.msk.f32.vlgmr.msrb.gmra.mxu1 %vm62_vm7, %v1672_v45 }
 0x36b   :  { %v1735_v37 = vpop.permute.xlu0 %1734 }
 0x3ad   :  { %v1289_v52 = vpop.f32.mrf.mxu2 }
 0x3bd   :  { %v1234_v46 = vpop.f32.mrf.mxu0  ;;  %v1254_v47 = vpop.f32.mrf.mxu1 }
 0x3be   :  { %v1290_v60 = vadd.f32 %v1289_v52, %v1234_v46 }
 0x3c5   :  { %v1349_v54 = vpop.f32.mrf.mxu0 }
 0x3c6   :  { %v1372_v61 = vadd.f32 %v1349_v54, %v1290_v60 }
 0x3c9   :  { %v1309_v53 = vpop.f32.mrf.mxu3  ;;  %v1411_v59 = vpop.f32.mrf.mxu2 }
 0x3ca   :  { %v1310_v56 = vadd.f32 %v1309_v53, %v1254_v47  ;;  %v1434_v1 = vadd.f32 %v1411_v59, %v1372_v61  ;;  %v5581_v61 = vld [vmem:[%s6185_s0 + $0x18] sm:$0xff] }
 0x3cb   :  { %v1369_v58 = vpop.f32.mrf.mxu1 }
 0x3cc   :  { %v1373_v62 = vadd.f32 %v1369_v58, %v1310_v56 }
 0x3cd   :  { %v1457_v6 = vpop.f32.mrf.mxu0 }
 0x3ce   :  { %v1480_v4 = vadd.f32 %v1457_v6, %v1434_v1  ;;  %v5567_v6 = vld [vmem:[%s6186_s1] sm:$0xff] }
 0x3d1   :  { %v1431_v55 = vpop.f32.mrf.mxu3 }
 0x3d2   :  { %v1522_v63 = vpop.f32.mrf.mxu2  ;;  %v1435_v2 = vadd.f32 %v1431_v55, %v1373_v62 }
 0x3d3   :  { %v1477_v57 = vpop.f32.mrf.mxu1  ;;  %v1545_v11 = vadd.f32 %v1522_v63, %v1480_v4  ;;  %v2304_v63 = vmul.f32 %v5481_v17, %v5144_v23 }
 0x3d4   :  { %v1481_v15 = vadd.f32 %v1477_v57, %v1435_v2 }
 0x3d9   :  { %v1542_v0 = vpop.f32.mrf.mxu3 }
 0x3da   :  { %v1546_v18 = vadd.f32 %v1542_v0, %v1481_v15  ;;  %v1643_v19 = vpop.f32.mrf.mxu2  ;;  %v2305_v0 = vmul.f32 %v5581_v61, %v5138_v21  ;;  %v2483_v15 = vmul.f32 %v5481_v17, %v5127_v14 }
 0x3dd   :  { %v1584_v5 = vpop.f32.mrf.mxu0  ;;  %v1604_v10 = vpop.f32.mrf.mxu1 }
 0x3de   :  { %v1607_v22 = vadd.f32 %v1584_v5, %v1545_v11  ;;  %v1608_v3 = vadd.f32 %v1604_v10, %v1546_v18  ;;  %v4865_v5 = vpack.i.bf16 %v2305_v0, %v2304_v63  ;;  %v2484_v18 = vmul.f32 %v5581_v61, %v5123_v13 }
 0x3e0   :  { %v1666_v28 = vadd.f32 %v1643_v19, %v1607_v22  ;;  %v4875_v19 = vpack.i.bf16 %v2484_v18, %v2483_v15 }
 0x3e1   :  { %v1663_v26 = vpop.f32.mrf.mxu3 }
 0x3e2   :  { %v1667_v31 = vadd.f32 %v1663_v26, %v1608_v3  ;;  %v2594_v3 = vmul.f32 %v5581_v61, %v5168_v33 }
 0x3e5   :  { %v1705_v32 = vpop.f32.mrf.mxu0  ;;  %v1725_v34 = vpop.f32.mrf.mxu1 }
 0x3e6   :  { %v1728_v35 = vadd.f32 %v1705_v32, %v1666_v28  ;;  %v1729_v36 = vadd.f32 %v1725_v34, %v1667_v31  ;;  %v4890_v32 = vpack.i.bf16 %v5176_v38, %v2594_v3 }
 0x3e8   :  { %v1737_v25 = vadd.f32 %v1735_v37, %v1728_v35  ;;  %v1738_v8 = vadd.f32 %v1735_v37, %v1729_v36  ;;  %v2655_v35 = vmul.f32 %v5481_v17, %v5180_v42  ;;  %v2656_v36 = vmul.f32 %v5581_v61, %v5189_v43 }
 0x3e9   :  { %v4860_v37 = vpack.i.bf16 %v5581_v61, %v5481_v17 }
 0x3ea   :  { %v1739_v41 = vadd.f32 %v1737_v25, %v5400_v7  ;;  %v1740_v39 = vadd.f32 %v1738_v8, %v5402_v49  ;;  %v4895_v25 = vpack.i.bf16 %v2656_v36, %v2655_v35  ;;  %v5630_v8 = vpop.permute.xlu2 %1869 }
 0x3ec   :  { %v5537_v44 = vmax.f32 %v1739_v41, 0.0  ;;  %v5539_v45 = vmax.f32 %v1740_v39, 0.0  ;;  %v2421_v41 = vmul.f32 %v5481_v17, %v5154_v27  ;;  %v2422_v39 = vmul.f32 %v5581_v61, %v5136_v20 }
 0x3ee   :  { %v4815_v46 = vpack.i.bf16 0.0, %v5539_v45  ;;  %v4810_v47 = vpack.i.bf16 %v5537_v44, %v5042_v9  ;;  %v1867_v52 = vmul.f32 %v5537_v44, %v5154_v27  ;;  %v1750_v49 = vmul.f32 %v5539_v45, %v5138_v21 }
 0x3ef   :  { %v1929_v53 = vmul.f32 %v5537_v44, %v5127_v14  ;;  %v4820_v58 = vpack.i.bf16 %v5539_v45, %v5537_v44  ;;  %v1749_v55 = vmul.f32 %v5537_v44, %v5144_v23  ;;  %v2101_v57 = vmul.f32 %v5537_v44, %v5180_v42 }
 0x3f0   :  { %4816 = vrot.lane.b32.xlu2 %v4815_v46, %s5037_s26  ;;  %4811 = vrot.lane.b32.xlu1 %v4810_v47, %s5037_s26  ;;  %v4835_v7 = vpack.i.bf16 %v1867_v52, %v5159_v29  ;;  %v4830_v54 = vpack.i.bf16 %v5146_v24, %v1750_v49  ;;  %v2102_v60 = vmul.f32 %v5539_v45, %v5189_v43 }
 0x3f1   :  { %v4845_v59 = vpack.i.bf16 %v1929_v53, %v5121_v12  ;;  %v4825_v56 = vpack.i.bf16 %v1749_v55, %v5146_v24  ;;  %v1868_v1 = vmul.f32 %v5539_v45, %v5136_v20  ;;  %v2222_v2 = vmul.f32 %v5537_v44, %v5201_v48 }
 0x3f2   :  { %4836 = vrot.lane.b32.xlu0 %v4835_v7, %s5035_s22  ;;  %v4880_v62 = vpack.i.bf16 %v2102_v60, %v2101_v57  ;;  %v2223_v4 = vmul.f32 %v5539_v45, %v5208_v51  ;;  %v1930_v22 = vmul.f32 %v5539_v45, %v5123_v13  ;;  %v2039_v28 = vmul.f32 %v5537_v44, %v5161_v30  ;;  %v5643_v47 = vpop.permute.xlu2 %1931 }
 0x3f3   :  { %v4840_v10 = vpack.i.bf16 %v5159_v29, %v1868_v1  ;;  %v2040_v31 = vmul.f32 %v5539_v45, %v5168_v33  ;;  %v4870_v46 = vpack.i.bf16 %v2422_v39, %v2421_v41  ;;  %v2776_v52 = vmul.f32 %v5481_v17, %v5201_v48 }
 0x3f4   :  { %v4885_v11 = vpack.i.bf16 %v2223_v4, %v2222_v2  ;;  %v4850_v26 = vpack.i.bf16 %v5121_v12, %v1930_v22  ;;  %v2777_v7 = vmul.f32 %v5581_v61, %v5208_v51 }
 0x3f5   :  { %v4855_v34 = vpack.i.bf16 %v2040_v31, %v2039_v28 }
 0x3f6   :  { %v4905_v49 = vpack.i.bf16 %v2777_v7, %v2776_v52 }
 0x3f8   :  { %4831 = vrot.lane.b32.xlu2 %v4830_v54, %s5036_s23  ;;  %4821 = vrot.lane.b32.xlu1 %v4820_v58, %s5043_s9  ;;  %v1755_v54 = vpop.permute.xlu0 %1754  ;;  %v2838_v58 = vld [vmem:[%s6187_s2] sm:$0xff] }
 0x3fa   :  { %4846 = vrot.lane.b32.xlu0 %v4845_v59, %s5034_s3  ;;  %v5656_v53 = vpop.permute.xlu2 %4806 }
 0x400   :  { %2172 = vrot.lane.b32.xlu2 %v5042_v9, %s5043_s9  ;;  %4826 = vrot.lane.b32.xlu1 %v4825_v56, %s5036_s23  ;;  %v5665_v55 = vpop.permute.xlu0 %1990 }
 0x402   :  { %2308 = vrot.lane.b32.xlu0 %v5567_v6, %s5039_s30  ;;  %v5663_v59 = vpop.permute.xlu2 %2042 }
 0x408   :  { %2163 = vrot.lane.b32.xlu2 %v5468_v16, %s5046_s11  ;;  %2234 = vrot.lane.b32.xlu1 %v5204_v50, %s5032_s20  ;;  %v5672_v57 = vpop.permute.xlu0 %2104 }
 0x40a   :  { %4881 = vrot.lane.b32.xlu0 %v4880_v62, %s5031_s19  ;;  %v5678_v62 = vpop.permute.xlu1 %2113 }
 0x410   :  { %4866 = vrot.lane.b32.xlu2 %v4865_v5, %s5036_s23  ;;  %4841 = vrot.lane.b32.xlu1 %v4840_v10, %s5035_s22  ;;  %v5680_v63 = vpop.permute.xlu0 %2225 }
 0x412   :  { %4886 = vrot.lane.b32.xlu0 %v4885_v11, %s5032_s20 }
 0x418   :  { %4876 = vrot.lane.b32.xlu2 %v4875_v19, %s5034_s3  ;;  %4851 = vrot.lane.b32.xlu1 %v4850_v26, %s5034_s3 }
 0x41a   :  { %2423 = vrot.lane.b32.xlu0 %v5567_v6, %s5043_s9 }
 0x420   :  { %4891 = vrot.lane.b32.xlu2 %v4890_v32, %s5033_s21  ;;  %4856 = vrot.lane.b32.xlu1 %v4855_v34, %s5033_s21 }
 0x422   :  { %2544 = vrot.lane.b32.xlu0 %v5567_v6, %s5041_s6 }
 0x428   :  { %4896 = vrot.lane.b32.xlu2 %v4895_v25, %s5031_s19  ;;  %4861 = vrot.lane.b32.xlu1 %v4860_v37, %s5037_s26 }
 0x42a   :  { %2667 = vrot.lane.b32.xlu0 %v5178_v40, %s5031_s19 }
 0x430   :  { %2726 = vrot.lane.b32.xlu2 %v5042_v9, %s5043_s9  ;;  %4871 = vrot.lane.b32.xlu1 %v4870_v46, %s5035_s22 }
 0x432   :  { %2658 = vrot.lane.b32.xlu0 %v5567_v6, %s5045_s10 }
 0x438   :  { %4906 = vrot.lane.b32.xlu2 %v4905_v49, %s5032_s20  ;;  %2485 = vrot.lane.b32.xlu1 %v5567_v6, %s5040_s5 }
 0x43a   :  { %2788 = vrot.lane.b32.xlu0 %v5204_v50, %s5032_s20 }
 0x440   :  { %2841 = vperm.xlu2 %4764, %v2838_v58   ;;  %2596 = vrot.lane.b32.xlu1 %v5567_v6, %s5038_s29 }
 0x448   :  { %4901 = vrot.lane.b32.xlu1 %v4860_v37, %s5043_s9 }
 0x44a   :  { %v5668_v56 = vpop.permute.xlu2 %4816 }
 0x44b   :  { %v4818_v2 = vunpack.i.l.bf16 %v5668_v56 }
 0x450   :  { %2717 = vrot.lane.b32.xlu1 %v5567_v6, %s5046_s11 }
 0x452   :  { %v5674_v60 = vpop.permute.xlu2 %4831 }
 0x453   :  { %v4833_v31 = vunpack.i.l.bf16 %v5674_v60 }
 0x458   :  { %2779 = vrot.lane.b32.xlu1 %v5567_v6, %s5047_s12 }
 0x45a   :  { %v5684_v0 = vpop.permute.xlu2 %2172 }
 0x460   :  { %3215 = vrot.lane.b32.xlu1 %v5178_v40, %s5031_s19 }
 0x462   :  { %v4812_v1 = vpop.permute.xlu1 %4811  ;;  %v5697_v3 = vpop.permute.xlu2 %2163 }
 0x463   :  { %v4814_v4 = vunpack.i.h.bf16 %v4812_v1  ;;  %v4813_v5 = vunpack.i.l.bf16 %v4812_v1 }
 0x464   :  { %v4837_v10 = vpop.permute.xlu0 %4836 }
 0x465   :  { %v4839_v11 = vunpack.i.h.bf16 %v4837_v10  ;;  %v4838_v15 = vunpack.i.l.bf16 %v4837_v10  ;;  %v1765_v18 = vsel %vm57_vm6, %v4813_v5, %v4814_v4  ;;  %v1766_v22 = vsel %vm57_vm6, %v4814_v4, %v4818_v2 }
 0x466   :  { %1786 = vmatpush.msrb.mxu2 %v1765_v18  ;;  %1806 = vmatpush.msrb.mxu3 %v1766_v22  ;;  %v4834_v22 = vunpack.i.h.bf16 %v5674_v60 }
 0x467   :  { %4565 = vmatmul.msk.f32.vlgmr.msrb.gmra.mxu2 %vm62_vm7, %v1755_v54  ;;  %4566 = vmatmul.msk.f32.vlgmr.msrb.gmra.mxu3 %vm62_vm7, %v1755_v54  ;;  %v1880_v19 = vsel %vm187_vm4, %v4838_v15, %v4839_v11 }
 0x468   :  { %1901 = vmatpush.msra.mxu2 %v1880_v19  ;;  %3153 = vrot.lane.b32.xlu1 %v5176_v38, %s5033_s21 }
 0x46a   :  { %2009 = vmatpush.msrb.mxu2 %v5537_v44  ;;  %v5695_v26 = vpop.permute.xlu1 %4821  ;;  %v5706_v39 = vpop.permute.xlu2 %4866 }
 0x46b   :  { %v4868_v5 = vunpack.i.l.bf16 %v5706_v39 }
 0x46c   :  { %v4847_v28 = vpop.permute.xlu0 %4846 }
 0x46d   :  { %v4849_v34 = vunpack.i.h.bf16 %v4847_v28  ;;  %v4848_v35 = vunpack.i.l.bf16 %v4847_v28 }
 0x46f   :  { %4569 = vmatmul.msk.f32.vlgmr.msra.gmra.mxu2 %vm62_vm7, %v5630_v8  ;;  %v1942_v46 = vsel %vm259_vm3, %v4848_v35, %v4849_v34 }
 0x472   :  { %v4827_v32 = vpop.permute.xlu1 %4826  ;;  %v5718_v1 = vpop.permute.xlu2 %4876 }
 0x473   :  { %v4829_v36 = vunpack.i.h.bf16 %v4827_v32  ;;  %v4828_v37 = vunpack.i.l.bf16 %v4827_v32 }
 0x474   :  { %v5702_v25 = vpop.permute.xlu0 %2308 }
 0x475   :  { %v1820_v41 = vsel %vm114_vm5, %v4828_v37, %v4829_v36  ;;  %v1821_v44 = vsel %vm114_vm5, %v4829_v36, %v4833_v31 }
 0x476   :  { %1841 = vmatpush.msra.mxu0 %v1820_v41  ;;  %1861 = vmatpush.msra.mxu1 %v1821_v44  ;;  %v4809_v41 = vunpack.i.h.bf16 %v5656_v53 }
 0x477   :  { %4567 = vmatmul.msk.f32.vlgmr.msra.gmra.mxu0 %vm62_vm7, %v5468_v16  ;;  %4568 = vmatmul.msk.f32.vlgmr.msra.gmra.mxu1 %vm62_vm7, %v5468_v16 }
 0x478   :  { %1963 = vmatpush.msrb.mxu0 %v1942_v46  ;;  %4573 = vmatmul.msk.f32.vlgmr.msrb.gmra.mxu2 %vm62_vm7, %v5665_v55  ;;  %v4808_v46 = vunpack.i.l.bf16 %v5656_v53 }
 0x47a   :  { %v2235_v52 = vpop.permute.xlu1 %2234  ;;  %v5737_v31 = vpop.permute.xlu2 %4891 }
 0x47c   :  { %v4882_v7 = vpop.permute.xlu0 %4881 }
 0x47d   :  { %v4884_v49 = vunpack.i.h.bf16 %v4882_v7  ;;  %v4883_v54 = vunpack.i.l.bf16 %v4882_v7 }
 0x47f   :  { %4571 = vmatmul.msk.f32.vlgmr.msrb.gmra.mxu0 %vm62_vm7, %v5643_v47  ;;  %v2115_v58 = vsel %vm168_vm2, %v4883_v54, %v4884_v49  ;;  %v2116_v28 = vsel %vm168_vm2, %v4884_v49, %v5678_v62  ;;  %v4824_v49 = vunpack.i.h.bf16 %v5695_v26 }
 0x480   :  { %2136 = vmatpush.msra.mxu2 %v2115_v58 }
 0x481   :  { %4577 = vmatmul.msk.f32.vlgmr.msra.gmra.mxu2 %vm62_vm7, %v5672_v57 }
 0x482   :  { %v5722_v16 = vpop.permute.xlu1 %4841 }
 0x483   :  { %v4843_v2 = vunpack.i.l.bf16 %v5722_v16 }
 0x484   :  { %v4887_v4 = vpop.permute.xlu0 %4886 }
 0x485   :  { %v4889_v10 = vunpack.i.h.bf16 %v4887_v4  ;;  %v4888_v15 = vunpack.i.l.bf16 %v4887_v4  ;;  %v1881_v18 = vsel %vm187_vm4, %v4839_v11, %v4843_v2  ;;  %v2374_v11 = vsel %vm114_vm5, %v4834_v22, %v4868_v5 }
 0x486   :  { %1921 = vmatpush.msra.mxu3 %v1881_v18 }
 0x487   :  { %4570 = vmatmul.msk.f32.vlgmr.msra.gmra.mxu3 %vm62_vm7, %v5630_v8  ;;  %v2236_v19 = vsel %vm36_vm1, %v4888_v15, %v4889_v10  ;;  %v4878_v8 = vunpack.i.l.bf16 %v5718_v1  ;;  %v2237_v44 = vsel %vm36_vm1, %v4889_v10, %v2235_v52  ;;  %v4869_v52 = vunpack.i.h.bf16 %v5706_v39 }
 0x488   :  { %2029 = vmatpush.msrb.mxu3 %v5539_v45  ;;  %2257 = vmatpush.msrb.mxu2 %v2236_v19  ;;  %v4893_v45 = vunpack.i.l.bf16 %v5737_v31  ;;  %v4819_v15 = vunpack.i.h.bf16 %v5668_v56  ;;  %v4897_v19 = vpop.permute.xlu2 %4896 }
 0x489   :  { %4581 = vmatmul.msk.f32.vlgmr.msrb.gmra.mxu2 %vm62_vm7, %v5680_v63  ;;  %v2375_v39 = vsel %vm114_vm5, %v4868_v5, %v4869_v52  ;;  %v4844_v5 = vunpack.i.h.bf16 %v5722_v16  ;;  %v4899_v16 = vunpack.i.h.bf16 %v4897_v19 }
 0x48a   :  { %2156 = vmatpush.msra.mxu3 %v2116_v28  ;;  %2395 = vmatpush.msra.mxu2 %v2374_v11  ;;  %v4852_v60 = vpop.permute.xlu1 %4851 }
 0x48b   :  { %v4854_v32 = vunpack.i.h.bf16 %v4852_v60  ;;  %v4853_v35 = vunpack.i.l.bf16 %v4852_v60 }
 0x48c   :  { %v5741_v36 = vpop.permute.xlu0 %2423 }
 0x48d   :  { %v1943_v62 = vsel %vm259_vm3, %v4849_v34, %v4853_v35  ;;  %v2496_v37 = vsel %vm259_vm3, %v4854_v32, %v4878_v8  ;;  %v2607_v34 = vsel %vm240_vm0, %v4809_v41, %v4893_v45  ;;  %v4894_v32 = vunpack.i.h.bf16 %v5737_v31 }
 0x48e   :  { %1983 = vmatpush.msrb.mxu1 %v1943_v62  ;;  %2517 = vmatpush.msrb.mxu2 %v2496_v37 }
 0x48f   :  { %4572 = vmatmul.msk.f32.vlgmr.msrb.gmra.mxu1 %vm62_vm7, %v5643_v47  ;;  %4574 = vmatmul.msk.f32.vlgmr.msrb.gmra.mxu3 %vm62_vm7, %v5665_v55  ;;  %v4823_v47 = vunpack.i.l.bf16 %v5695_v26  ;;  %v2175_v26 = vsel %vm508_vm8, %v4824_v49, %v5684_v0 }
 0x490   :  { %2277 = vmatpush.msrb.mxu3 %v2237_v44  ;;  %v2727_v37 = vpop.permute.xlu2 %2726 }
 0x491   :  { %4588 = vmatmul.msk.f32.vlgmr.msra.gmra.mxu2 %vm62_vm7, %v5567_v6  ;;  %v2174_v53 = vsel %vm508_vm8, %v4823_v47, %v4824_v49 }
 0x492   :  { %2628 = vmatpush.msra.mxu2 %v2607_v34  ;;  %v4857_v7 = vpop.permute.xlu1 %4856 }
 0x493   :  { %v4859_v54 = vunpack.i.h.bf16 %v4857_v7  ;;  %v4858_v55 = vunpack.i.l.bf16 %v4857_v7 }
 0x494   :  { %v2545_v4 = vpop.permute.xlu0 %2544 }
 0x495   :  { %v2053_v58 = vsel %vm240_vm0, %v4858_v55, %v4859_v54  ;;  %v2054_v2 = vsel %vm240_vm0, %v4859_v54, %v4808_v46 }
 0x496   :  { %2074 = vmatpush.msra.mxu0 %v2053_v58  ;;  %2094 = vmatpush.msra.mxu1 %v2054_v2 }
 0x497   :  { %4575 = vmatmul.msk.f32.vlgmr.msra.gmra.mxu0 %vm62_vm7, %v5663_v59  ;;  %4576 = vmatmul.msk.f32.vlgmr.msra.gmra.mxu1 %vm62_vm7, %v5663_v59  ;;  %v4879_v59 = vunpack.i.h.bf16 %v5718_v1 }
 0x498   :  { %4578 = vmatmul.msk.f32.vlgmr.msra.gmra.mxu3 %vm62_vm7, %v5672_v57  ;;  %2195 = vmatpush.msrb.mxu0 %v2174_v53 }
 0x499   :  { %2215 = vmatpush.msrb.mxu1 %v2175_v26  ;;  %2415 = vmatpush.msra.mxu3 %v2375_v39  ;;  %v2497_v56 = vsel %vm259_vm3, %v4878_v8, %v4879_v59  ;;  %v4898_v8 = vunpack.i.l.bf16 %v4897_v19 }
 0x49a   :  { %v4862_v10 = vpop.permute.xlu1 %4861 }
 0x49b   :  { %v4864_v18 = vunpack.i.h.bf16 %v4862_v10  ;;  %v4863_v22 = vunpack.i.l.bf16 %v4862_v10 }
 0x49c   :  { %v2668_v0 = vpop.permute.xlu0 %2667 }
 0x49d   :  { %v2319_v28 = vsel %vm57_vm6, %v4819_v15, %v4863_v22  ;;  %v2320_v57 = vsel %vm57_vm6, %v4863_v22, %v4864_v18 }
 0x49e   :  { %2340 = vmatpush.msra.mxu0 %v2319_v28  ;;  %2360 = vmatpush.msra.mxu1 %v2320_v57 }
 0x49f   :  { %4579 = vmatmul.msk.f32.vlgmr.msrb.gmra.mxu0 %vm62_vm7, %v5697_v3  ;;  %4580 = vmatmul.msk.f32.vlgmr.msrb.gmra.mxu1 %vm62_vm7, %v5697_v3 }
 0x4a0   :  { %4582 = vmatmul.msk.f32.vlgmr.msrb.gmra.mxu3 %vm62_vm7, %v5680_v63  ;;  %v2608_v63 = vsel %vm240_vm0, %v4893_v45, %v4894_v32 }
 0x4a1   :  { %2537 = vmatpush.msrb.mxu3 %v2497_v56 }
 0x4a2   :  { %v4872_v1 = vpop.permute.xlu1 %4871 }
 0x4a3   :  { %v4874_v11 = vunpack.i.h.bf16 %v4872_v1  ;;  %v4873_v60 = vunpack.i.l.bf16 %v4872_v1 }
 0x4a4   :  { %v2659_v41 = vpop.permute.xlu0 %2658 }
 0x4a5   :  { %v2434_v35 = vsel %vm187_vm4, %v4844_v5, %v4873_v60  ;;  %v2435_v62 = vsel %vm187_vm4, %v4873_v60, %v4874_v11 }
 0x4a6   :  { %2455 = vmatpush.msrb.mxu0 %v2434_v35  ;;  %2475 = vmatpush.msrb.mxu1 %v2435_v62 }
 0x4a7   :  { %4586 = vmatmul.msk.f32.vlgmr.msra.gmra.mxu0 %vm62_vm7, %v5702_v25  ;;  %4587 = vmatmul.msk.f32.vlgmr.msra.gmra.mxu1 %vm62_vm7, %v5702_v25  ;;  %v4907_v25 = vpop.permute.xlu2 %4906 }
 0x4a8   :  { %4589 = vmatmul.msk.f32.vlgmr.msra.gmra.mxu3 %vm62_vm7, %v5567_v6  ;;  %2563 = vmatpush.msra.mxu0 %v5481_v17  ;;  %v2669_v6 = vsel %vm168_vm2, %v4898_v8, %v4899_v16  ;;  %v2670_v17 = vsel %vm168_vm2, %v4899_v16, %v2668_v0  ;;  %v4909_v31 = vunpack.i.h.bf16 %v4907_v25  ;;  %v4908_v45 = vunpack.i.l.bf16 %v4907_v25 }
 0x4a9   :  { %2648 = vmatpush.msra.mxu3 %v2608_v63  ;;  %2583 = vmatpush.msra.mxu1 %v5581_v61 }
 0x4aa   :  { %v2486_v3 = vpop.permute.xlu1 %2485 }
 0x4ab   :  { %4592 = vmatmul.msk.f32.vlgmr.msrb.gmra.mxu2 %vm62_vm7, %v2486_v3 }
 0x4ac   :  { %v2789_v44 = vpop.permute.xlu0 %2788 }
 0x4ad   :  { %v2791_v34 = vsel %vm36_vm1, %v4909_v31, %v2789_v44 }
 0x4af   :  { %4590 = vmatmul.msk.f32.vlgmr.msrb.gmra.mxu0 %vm62_vm7, %v5741_v36  ;;  %4591 = vmatmul.msk.f32.vlgmr.msrb.gmra.mxu1 %vm62_vm7, %v5741_v36  ;;  %v2790_v36 = vsel %vm36_vm1, %v4908_v45, %v4909_v31 }
 0x4b0   :  { %4593 = vmatmul.msk.f32.vlgmr.msrb.gmra.mxu3 %vm62_vm7, %v2486_v3  ;;  %2690 = vmatpush.msrb.mxu0 %v2669_v6 }
 0x4b1   :  { %2710 = vmatpush.msrb.mxu1 %v2670_v17 }
 0x4b2   :  { %v2597_v61 = vpop.permute.xlu1 %2596 }
 0x4b3   :  { %4596 = vmatmul.msk.f32.vlgmr.msra.gmra.mxu2 %vm62_vm7, %v2597_v61 }
 0x4b7   :  { %4594 = vmatmul.msk.f32.vlgmr.msra.gmra.mxu0 %vm62_vm7, %v2545_v4  ;;  %4595 = vmatmul.msk.f32.vlgmr.msra.gmra.mxu1 %vm62_vm7, %v2545_v4 }
 0x4b8   :  { %4597 = vmatmul.msk.f32.vlgmr.msra.gmra.mxu3 %vm62_vm7, %v2597_v61  ;;  %2811 = vmatpush.msra.mxu0 %v2790_v36 }
 0x4b9   :  { %2831 = vmatpush.msra.mxu1 %v2791_v34 }
 0x4ba   :  { %v4902_v46 = vpop.permute.xlu1 %4901 }
 0x4bb   :  { %v4904_v7 = vunpack.i.h.bf16 %v4902_v46  ;;  %v4903_v49 = vunpack.i.l.bf16 %v4902_v46 }
 0x4bd   :  { %v2728_v47 = vsel %vm508_vm8, %v4903_v49, %v4904_v7  ;;  %v2729_v54 = vsel %vm508_vm8, %v4904_v7, %v2727_v37 }
 0x4be   :  { %2749 = vmatpush.msrb.mxu2 %v2728_v47  ;;  %2769 = vmatpush.msrb.mxu3 %v2729_v54 }
 0x4bf   :  { %4598 = vmatmul.msk.f32.vlgmr.msrb.gmra.mxu0 %vm62_vm7, %v2659_v41  ;;  %4599 = vmatmul.msk.f32.vlgmr.msrb.gmra.mxu1 %vm62_vm7, %v2659_v41 }
 0x4c2   :  { %v2718_v55 = vpop.permute.xlu1 %2717 }
 0x4c3   :  { %4600 = vmatmul.msk.f32.vlgmr.msrb.gmra.mxu2 %vm62_vm7, %v2718_v55  ;;  %4601 = vmatmul.msk.f32.vlgmr.msrb.gmra.mxu3 %vm62_vm7, %v2718_v55 }
 0x4ca   :  { %v2780_v52 = vpop.permute.xlu1 %2779 }
 0x4cb   :  { %4602 = vmatmul.msk.f32.vlgmr.msra.gmra.mxu0 %vm62_vm7, %v2780_v52  ;;  %4603 = vmatmul.msk.f32.vlgmr.msra.gmra.mxu1 %vm62_vm7, %v2780_v52 }
 0x4ea   :  { %v1788_v58 = vpop.f32.mrf.mxu2  ;;  %v1808_v2 = vpop.f32.mrf.mxu3 }
 0x4f2   :  { %v1903_v4 = vpop.f32.mrf.mxu2 }
 0x4f4   :  { %v1843_v53 = vpop.f32.mrf.mxu0  ;;  %v1863_v26 = vpop.f32.mrf.mxu1 }
 0x4f5   :  { %v1844_v39 = vadd.f32 %v1843_v53, %v1788_v58  ;;  %v1864_v10 = vadd.f32 %v1863_v26, %v1808_v2 }
 0x4f7   :  { %v1926_v15 = vadd.f32 %v1903_v4, %v1844_v39 }
 0x4fb   :  { %v2011_v59 = vpop.f32.mrf.mxu2 }
 0x4fc   :  { %v1965_v18 = vpop.f32.mrf.mxu0 }
 0x4fd   :  { %v1988_v22 = vadd.f32 %v1965_v18, %v1926_v15 }
 0x4ff   :  { %v2034_v19 = vadd.f32 %v2011_v59, %v1988_v22 }
 0x504   :  { %v2138_v5 = vpop.f32.mrf.mxu2 }
 0x50a   :  { %v1923_v28 = vpop.f32.mrf.mxu3 }
 0x50b   :  { %v1927_v57 = vadd.f32 %v1923_v28, %v1864_v10 }
 0x50c   :  { %v1985_v56 = vpop.f32.mrf.mxu1  ;;  %v2259_v6 = vpop.f32.mrf.mxu2 }
 0x50d   :  { %v1989_v0 = vadd.f32 %v1985_v56, %v1927_v57 }
 0x512   :  { %v2031_v1 = vpop.f32.mrf.mxu3 }
 0x513   :  { %v2035_v11 = vadd.f32 %v2031_v1, %v1989_v0 }
 0x514   :  { %v2076_v60 = vpop.f32.mrf.mxu0  ;;  %v2096_v32 = vpop.f32.mrf.mxu1 }
 0x515   :  { %v2099_v35 = vadd.f32 %v2076_v60, %v2034_v19  ;;  %v2100_v62 = vadd.f32 %v2096_v32, %v2035_v11  ;;  %v2397_v36 = vpop.f32.mrf.mxu2  ;;  %v5827_v60 = vld [vmem:[%s6186_s1 + $0x8] sm:$0xff] }
 0x516   :  { %2856 = vrot.lane.b32.xlu2 %v5827_v60, %s5039_s30 }
 0x517   :  { %v2161_v37 = vadd.f32 %v2138_v5, %v2099_v35 }
 0x51b   :  { %v2158_v63 = vpop.f32.mrf.mxu3 }
 0x51c   :  { %v2162_v3 = vadd.f32 %v2158_v63, %v2100_v62  ;;  %v2197_v16 = vpop.f32.mrf.mxu0  ;;  %v2217_v8 = vpop.f32.mrf.mxu1 }
 0x51d   :  { %v2220_v41 = vadd.f32 %v2197_v16, %v2161_v37  ;;  %v2842_v63 = vpop.permute.xlu2 %2841 }
 0x51e   :  { %v2221_v25 = vadd.f32 %v2217_v8, %v2162_v3  ;;  %2971 = vrot.lane.b32.xlu2 %v5827_v60, %s5043_s9 }
 0x51f   :  { %v5820_v17 = vadd.f32 %v2259_v6, %v2220_v41 }
 0x523   :  { %v2279_v61 = vpop.f32.mrf.mxu3 }
 0x524   :  { %v5822_v31 = vadd.f32 %v2279_v61, %v2221_v25  ;;  %v2342_v45 = vpop.f32.mrf.mxu0  ;;  %v2362_v44 = vpop.f32.mrf.mxu1 }
 0x525   :  { %v2398_v58 = vadd.f32 %v2397_v36, %v2342_v45 }
 0x526   :  { %3092 = vrot.lane.b32.xlu2 %v5827_v60, %s5041_s6 }
 0x52b   :  { %v2417_v34 = vpop.f32.mrf.mxu3 }
 0x52c   :  { %v2457_v46 = vpop.f32.mrf.mxu0  ;;  %v2477_v7 = vpop.f32.mrf.mxu1  ;;  %v2418_v54 = vadd.f32 %v2417_v34, %v2362_v44 }
 0x52d   :  { %v2480_v2 = vadd.f32 %v2457_v46, %v2398_v58 }
 0x52e   :  { %v2519_v49 = vpop.f32.mrf.mxu2  ;;  %v2481_v4 = vadd.f32 %v2477_v7, %v2418_v54  ;;  %3033 = vrot.lane.b32.xlu2 %v5827_v60, %s5040_s5 }
 0x52f   :  { %v2542_v26 = vadd.f32 %v2519_v49, %v2480_v2 }
 0x533   :  { %v2539_v47 = vpop.f32.mrf.mxu3 }
 0x534   :  { %v2565_v55 = vpop.f32.mrf.mxu0  ;;  %v2585_v52 = vpop.f32.mrf.mxu1  ;;  %v2543_v53 = vadd.f32 %v2539_v47, %v2481_v4  ;;  %v5894_v4 = vld [vmem:[%s6186_s1 + $0x10] sm:$0xff] }
 0x535   :  { %v2588_v15 = vadd.f32 %v2565_v55, %v2542_v26 }
 0x536   :  { %v2630_v39 = vpop.f32.mrf.mxu2  ;;  %v2589_v18 = vadd.f32 %v2585_v52, %v2543_v53  ;;  %3206 = vrot.lane.b32.xlu2 %v5827_v60, %s5045_s10 }
 0x537   :  { %v2653_v28 = vadd.f32 %v2630_v39, %v2588_v15  ;;  %v4623_v39 = vld [vmem:[%s6187_s2 + $0x8] sm:$0xff] }
 0x53b   :  { %v2650_v10 = vpop.f32.mrf.mxu3 }
 0x53c   :  { %v2692_v22 = vpop.f32.mrf.mxu0  ;;  %v2712_v59 = vpop.f32.mrf.mxu1  ;;  %v2654_v19 = vadd.f32 %v2650_v10, %v2589_v18 }
 0x53d   :  { %v2715_v57 = vadd.f32 %v2692_v22, %v2653_v28  ;;  %v3216_v10 = vpop.permute.xlu1 %3215 }
 0x53e   :  { %v2716_v56 = vadd.f32 %v2712_v59, %v2654_v19  ;;  %3144 = vrot.lane.b32.xlu2 %v5827_v60, %s5038_s29 }
 0x545   :  { %v5917_v18 = vpop.permute.xlu1 %3153 }
 0x546   :  { %v2751_v0 = vpop.f32.mrf.mxu2  ;;  %v2771_v1 = vpop.f32.mrf.mxu3  ;;  %3327 = vrot.lane.b32.xlu2 %v5827_v60, %s5047_s12 }
 0x547   :  { %v2774_v5 = vadd.f32 %v2751_v0, %v2715_v57  ;;  %v2775_v11 = vadd.f32 %v2771_v1, %v2716_v56 }
 0x548   :  { %v2813_v32 = vpop.f32.mrf.mxu0  ;;  %v2833_v35 = vpop.f32.mrf.mxu1 }
 0x549   :  { %v2836_v62 = vadd.f32 %v2813_v32, %v2774_v5  ;;  %v2837_v37 = vadd.f32 %v2833_v35, %v2775_v11 }
 0x54b   :  { %v5831_v3 = vadd.f32 %v2842_v63, %v2836_v62  ;;  %v5833_v16 = vadd.f32 %v2842_v63, %v2837_v37 }
 0x54d   :  { %2865 = vrot.lane.b32.xlu1 %v5833_v16, %s5037_s26  ;;  %v4910_v8 = vpack.i.bf16 %v5831_v3, %v5042_v9  ;;  %v2969_v41 = vmul.f32 %v5831_v3, %v5154_v27  ;;  %v2970_v6 = vmul.f32 %v5833_v16, %v5136_v20  ;;  %v2852_v61 = vmul.f32 %v5831_v3, %v5144_v23 }
 0x54e   :  { %v2853_v45 = vmul.f32 %v5833_v16, %v5138_v21  ;;  %v3031_v36 = vmul.f32 %v5831_v3, %v5127_v14  ;;  %v3032_v34 = vmul.f32 %v5833_v16, %v5123_v13  ;;  %v3203_v7 = vmul.f32 %v5831_v3, %v5180_v42  ;;  %3265 = vrot.lane.b32.xlu2 %v5827_v60, %s5046_s11 }
 0x54f   :  { %4911 = vrot.lane.b32.xlu0 %v4910_v8, %s5037_s26  ;;  %v4915_v25 = vpack.i.bf16 %v2969_v41, %v5159_v29  ;;  %v4920_v44 = vpack.i.bf16 %v2852_v61, %v5146_v24  ;;  %v3204_v49 = vmul.f32 %v5833_v16, %v5189_v43  ;;  %v3141_v54 = vmul.f32 %v5831_v3, %v5161_v30 }
 0x550   :  { %v4925_v46 = vpack.i.bf16 %v3031_v36, %v5121_v12  ;;  %v3142_v55 = vmul.f32 %v5833_v16, %v5168_v33  ;;  %v3324_v58 = vmul.f32 %v5831_v3, %v5201_v48  ;;  %v3325_v2 = vmul.f32 %v5833_v16, %v5208_v51 }
 0x551   :  { %v4930_v47 = vpack.i.bf16 %v3204_v49, %v3203_v7  ;;  %v4945_v26 = vpack.i.bf16 %v5833_v16, %v5831_v3 }
 0x552   :  { %v4935_v52 = vpack.i.bf16 %v3142_v55, %v3141_v54  ;;  %v4940_v53 = vpack.i.bf16 %v3325_v2, %v3324_v58 }
 0x555   :  { %2980 = vrot.lane.b32.xlu1 %v2970_v6, %s5035_s22 }
 0x556   :  { %3408 = vrot.lane.b32.xlu2 %v5894_v4, %s5039_s30 }
 0x557   :  { %4916 = vrot.lane.b32.xlu0 %v4915_v25, %s5035_s22 }
 0x55d   :  { %2920 = vrot.lane.b32.xlu1 %v2853_v45, %s5036_s23 }
 0x55e   :  { %3585 = vrot.lane.b32.xlu2 %v5894_v4, %s5040_s5 }
 0x55f   :  { %4921 = vrot.lane.b32.xlu0 %v4920_v44, %s5036_s23 }
 0x565   :  { %3042 = vrot.lane.b32.xlu1 %v3032_v34, %s5034_s3 }
 0x566   :  { %3644 = vrot.lane.b32.xlu2 %v5894_v4, %s5041_s6 }
 0x567   :  { %4926 = vrot.lane.b32.xlu0 %v4925_v46, %s5034_s3 }
 0x56d   :  { %3336 = vrot.lane.b32.xlu1 %v5204_v50, %s5032_s20 }
 0x56f   :  { %4931 = vrot.lane.b32.xlu0 %v4930_v47, %s5031_s19 }
 0x570   :  { %v2857_v15 = vpop.permute.xlu2 %2856 }
 0x575   :  { %3274 = vrot.lane.b32.xlu1 %v5042_v9, %s5043_s9 }
 0x577   :  { %4936 = vrot.lane.b32.xlu0 %v4935_v52, %s5033_s21 }
 0x578   :  { %v2972_v22 = vpop.permute.xlu2 %2971 }
 0x57d   :  { %3523 = vrot.lane.b32.xlu1 %v5894_v4, %s5043_s9 }
 0x57f   :  { %4941 = vrot.lane.b32.xlu0 %v4940_v53, %s5032_s20 }
 0x580   :  { %v3093_v5 = vpop.permute.xlu2 %3092 }
 0x585   :  { %3705 = vrot.lane.b32.xlu1 %v5176_v38, %s5033_s21 }
 0x587   :  { %4946 = vrot.lane.b32.xlu0 %v4945_v26, %s5043_s9 }
 0x588   :  { %v3034_v25 = vpop.permute.xlu2 %3033 }
 0x58f   :  { %3389 = vperm.xlu0 %4723, %v4623_v39  }
 0x590   :  { %v3207_v47 = vpop.permute.xlu2 %3206 }
 0x597   :  { %3696 = vrot.lane.b32.xlu0 %v5894_v4, %s5038_s29 }
 0x598   :  { %v3145_v2 = vpop.permute.xlu2 %3144 }
 0x5bf   :  { %v2866_v59 = vpop.permute.xlu1 %2865 }
 0x5c1   :  { %v4912_v19 = vpop.permute.xlu0 %4911 }
 0x5c2   :  { %v4914_v28 = vunpack.i.h.bf16 %v4912_v19  ;;  %v4913_v57 = vunpack.i.l.bf16 %v4912_v19 }
 0x5c4   :  { %v2867_v56 = vsel %vm57_vm6, %v4913_v57, %v4914_v28  ;;  %v2868_v0 = vsel %vm57_vm6, %v4914_v28, %v2866_v59 }
 0x5c5   :  { %2888 = vmatpush.msra.mxu2 %v2867_v56  ;;  %2908 = vmatpush.msra.mxu3 %v2868_v0 }
 0x5c6   :  { %4605 = vmatmul.msk.f32.vlgmr.msra.gmra.mxu2 %vm62_vm7, %v2857_v15  ;;  %4606 = vmatmul.msk.f32.vlgmr.msra.gmra.mxu3 %vm62_vm7, %v2857_v15 }
 0x5c7   :  { %v2981_v1 = vpop.permute.xlu1 %2980 }
 0x5c9   :  { %v4917_v11 = vpop.permute.xlu0 %4916 }
 0x5ca   :  { %v4919_v32 = vunpack.i.h.bf16 %v4917_v11  ;;  %v4918_v35 = vunpack.i.l.bf16 %v4917_v11 }
 0x5cc   :  { %v2982_v62 = vsel %vm187_vm4, %v4918_v35, %v4919_v32  ;;  %v2983_v37 = vsel %vm187_vm4, %v4919_v32, %v2981_v1 }
 0x5cd   :  { %3003 = vmatpush.msrb.mxu2 %v2982_v62  ;;  %3023 = vmatpush.msrb.mxu3 %v2983_v37 }
 0x5ce   :  { %4609 = vmatmul.msk.f32.vlgmr.msrb.gmra.mxu2 %vm62_vm7, %v2972_v22  ;;  %4610 = vmatmul.msk.f32.vlgmr.msrb.gmra.mxu3 %vm62_vm7, %v2972_v22 }
 0x5cf   :  { %3111 = vmatpush.msra.mxu2 %v5831_v3  ;;  %3131 = vmatpush.msra.mxu3 %v5833_v16  ;;  %v2921_v63 = vpop.permute.xlu1 %2920 }
 0x5d1   :  { %v4922_v8 = vpop.permute.xlu0 %4921 }
 0x5d2   :  { %v4924_v41 = vunpack.i.h.bf16 %v4922_v8  ;;  %v4923_v6 = vunpack.i.l.bf16 %v4922_v8 }
 0x5d4   :  { %v2922_v61 = vsel %vm114_vm5, %v4923_v6, %v4924_v41  ;;  %v2923_v45 = vsel %vm114_vm5, %v4924_v41, %v2921_v63 }
 0x5d5   :  { %2943 = vmatpush.msrb.mxu0 %v2922_v61  ;;  %2963 = vmatpush.msrb.mxu1 %v2923_v45 }
 0x5d6   :  { %4607 = vmatmul.msk.f32.vlgmr.msrb.gmra.mxu0 %vm62_vm7, %v5827_v60  ;;  %4608 = vmatmul.msk.f32.vlgmr.msrb.gmra.mxu1 %vm62_vm7, %v5827_v60 }
 0x5d7   :  { %4613 = vmatmul.msk.f32.vlgmr.msra.gmra.mxu2 %vm62_vm7, %v3093_v5  ;;  %4614 = vmatmul.msk.f32.vlgmr.msra.gmra.mxu3 %vm62_vm7, %v3093_v5  ;;  %v3043_v46 = vpop.permute.xlu1 %3042 }
 0x5d9   :  { %v4927_v44 = vpop.permute.xlu0 %4926 }
 0x5da   :  { %v4929_v36 = vunpack.i.h.bf16 %v4927_v44  ;;  %v4928_v34 = vunpack.i.l.bf16 %v4927_v44 }
 0x5dc   :  { %v3044_v7 = vsel %vm259_vm3, %v4928_v34, %v4929_v36  ;;  %v3045_v49 = vsel %vm259_vm3, %v4929_v36, %v3043_v46 }
 0x5dd   :  { %3065 = vmatpush.msra.mxu0 %v3044_v7  ;;  %3085 = vmatpush.msra.mxu1 %v3045_v49 }
 0x5de   :  { %4611 = vmatmul.msk.f32.vlgmr.msra.gmra.mxu0 %vm62_vm7, %v3034_v25  ;;  %4612 = vmatmul.msk.f32.vlgmr.msra.gmra.mxu1 %vm62_vm7, %v3034_v25 }
 0x5df   :  { %v3337_v59 = vpop.permute.xlu1 %3336 }
 0x5e1   :  { %v4932_v60 = vpop.permute.xlu0 %4931 }
 0x5e2   :  { %v4934_v54 = vunpack.i.h.bf16 %v4932_v60  ;;  %v4933_v55 = vunpack.i.l.bf16 %v4932_v60 }
 0x5e4   :  { %v3217_v52 = vsel %vm168_vm2, %v4933_v55, %v4934_v54  ;;  %v3218_v58 = vsel %vm168_vm2, %v4934_v54, %v3216_v10  ;;  %v3328_v10 = vpop.permute.xlu2 %3327 }
 0x5e5   :  { %3238 = vmatpush.msrb.mxu2 %v3217_v52  ;;  %3258 = vmatpush.msrb.mxu3 %v3218_v58 }
 0x5e6   :  { %4617 = vmatmul.msk.f32.vlgmr.msrb.gmra.mxu2 %vm62_vm7, %v3207_v47  ;;  %4618 = vmatmul.msk.f32.vlgmr.msrb.gmra.mxu3 %vm62_vm7, %v3207_v47 }
 0x5e7   :  { %v3275_v11 = vpop.permute.xlu1 %3274 }
 0x5e9   :  { %v4937_v53 = vpop.permute.xlu0 %4936 }
 0x5ea   :  { %v4939_v26 = vunpack.i.h.bf16 %v4937_v53  ;;  %v4938_v39 = vunpack.i.l.bf16 %v4937_v53 }
 0x5ec   :  { %v3155_v15 = vsel %vm240_vm0, %v4938_v39, %v4939_v26  ;;  %v3156_v22 = vsel %vm240_vm0, %v4939_v26, %v5917_v18  ;;  %v3266_v32 = vpop.permute.xlu2 %3265 }
 0x5ed   :  { %3176 = vmatpush.msrb.mxu0 %v3155_v15  ;;  %3196 = vmatpush.msrb.mxu1 %v3156_v22 }
 0x5ee   :  { %4615 = vmatmul.msk.f32.vlgmr.msrb.gmra.mxu0 %vm62_vm7, %v3145_v2  ;;  %4616 = vmatmul.msk.f32.vlgmr.msrb.gmra.mxu1 %vm62_vm7, %v3145_v2 }
 0x5f1   :  { %v4942_v19 = vpop.permute.xlu0 %4941 }
 0x5f2   :  { %v4944_v28 = vunpack.i.h.bf16 %v4942_v19  ;;  %v4943_v57 = vunpack.i.l.bf16 %v4942_v19 }
 0x5f4   :  { %v3338_v56 = vsel %vm36_vm1, %v4943_v57, %v4944_v28  ;;  %v3339_v0 = vsel %vm36_vm1, %v4944_v28, %v3337_v59 }
 0x5f5   :  { %3359 = vmatpush.msra.mxu2 %v3338_v56  ;;  %3379 = vmatpush.msra.mxu3 %v3339_v0 }
 0x5f6   :  { %4621 = vmatmul.msk.f32.vlgmr.msra.gmra.mxu2 %vm62_vm7, %v3328_v10  ;;  %4622 = vmatmul.msk.f32.vlgmr.msra.gmra.mxu3 %vm62_vm7, %v3328_v10 }
 0x5f9   :  { %v4947_v18 = vpop.permute.xlu0 %4946 }
 0x5fa   :  { %v4949_v1 = vunpack.i.h.bf16 %v4947_v18  ;;  %v4948_v5 = vunpack.i.l.bf16 %v4947_v18 }
 0x5fc   :  { %v3276_v35 = vsel %vm508_vm8, %v4948_v5, %v4949_v1  ;;  %v3277_v62 = vsel %vm508_vm8, %v4949_v1, %v3275_v11 }
 0x5fd   :  { %3297 = vmatpush.msra.mxu0 %v3276_v35  ;;  %3317 = vmatpush.msra.mxu1 %v3277_v62 }
 0x5fe   :  { %4619 = vmatmul.msk.f32.vlgmr.msra.gmra.mxu0 %vm62_vm7, %v3266_v32  ;;  %4620 = vmatmul.msk.f32.vlgmr.msra.gmra.mxu1 %vm62_vm7, %v3266_v32 }
 0x601   :  { %v3390_v1 = vpop.permute.xlu0 %3389 }
 0x649   :  { %v2890_v37 = vpop.f32.mrf.mxu2  ;;  %v2910_v63 = vpop.f32.mrf.mxu3 }
 0x651   :  { %v3005_v6 = vpop.f32.mrf.mxu2  ;;  %v3025_v25 = vpop.f32.mrf.mxu3 }
 0x653   :  { %v2945_v8 = vpop.f32.mrf.mxu0  ;;  %v2965_v41 = vpop.f32.mrf.mxu1 }
 0x654   :  { %v2946_v61 = vadd.f32 %v2945_v8, %v2890_v37  ;;  %v2966_v45 = vadd.f32 %v2965_v41, %v2910_v63 }
 0x656   :  { %v3028_v7 = vadd.f32 %v3005_v6, %v2946_v61  ;;  %v3029_v49 = vadd.f32 %v3025_v25, %v2966_v45 }
 0x65a   :  { %v3113_v34 = vpop.f32.mrf.mxu2  ;;  %v3133_v46 = vpop.f32.mrf.mxu3 }
 0x65b   :  { %v3067_v44 = vpop.f32.mrf.mxu0  ;;  %v3087_v36 = vpop.f32.mrf.mxu1 }
 0x65c   :  { %v3090_v47 = vadd.f32 %v3067_v44, %v3028_v7  ;;  %v3091_v60 = vadd.f32 %v3087_v36, %v3029_v49 }
 0x65e   :  { %v3136_v52 = vadd.f32 %v3113_v34, %v3090_v47  ;;  %v3137_v58 = vadd.f32 %v3133_v46, %v3091_v60 }
 0x669   :  { %v3240_v2 = vpop.f32.mrf.mxu2  ;;  %v3260_v53 = vpop.f32.mrf.mxu3 }
 0x66b   :  { %v3178_v54 = vpop.f32.mrf.mxu0  ;;  %v3198_v55 = vpop.f32.mrf.mxu1 }
 0x66c   :  { %v3201_v26 = vadd.f32 %v3178_v54, %v3136_v52  ;;  %v3202_v39 = vadd.f32 %v3198_v55, %v3137_v58  ;;  %v3409_v58 = vpop.permute.xlu2 %3408 }
 0x66e   :  { %v3263_v15 = vadd.f32 %v3240_v2, %v3201_v26  ;;  %v3264_v22 = vadd.f32 %v3260_v53, %v3202_v39  ;;  %v3524_v26 = vpop.permute.xlu1 %3523 }
 0x674   :  { %v3586_v2 = vpop.permute.xlu2 %3585 }
 0x679   :  { %v3361_v57 = vpop.f32.mrf.mxu2  ;;  %v3381_v56 = vpop.f32.mrf.mxu3 }
 0x67b   :  { %v3299_v10 = vpop.f32.mrf.mxu0  ;;  %v3319_v59 = vpop.f32.mrf.mxu1 }
 0x67c   :  { %v3322_v19 = vadd.f32 %v3299_v10, %v3263_v15  ;;  %v3323_v28 = vadd.f32 %v3319_v59, %v3264_v22  ;;  %v3645_v53 = vpop.permute.xlu2 %3644  ;;  %v3706_v15 = vpop.permute.xlu1 %3705 }
 0x67d   :  { %v3697_v22 = vpop.permute.xlu0 %3696 }
 0x67e   :  { %v3384_v0 = vadd.f32 %v3361_v57, %v3322_v19  ;;  %v3385_v18 = vadd.f32 %v3381_v56, %v3323_v28 }
 0x680   :  { %v3392_v5 = vadd.f32 %v3390_v1, %v3384_v0  ;;  %v3393_v11 = vadd.f32 %v3390_v1, %v3385_v18 }
 0x682   :  { %v3394_v32 = vadd.f32 %v3392_v5, %v5831_v3  ;;  %v3395_v35 = vadd.f32 %v3393_v11, %v5833_v16 }
 0x684   :  { %v5960_v62 = vmax.f32 %v3394_v32, 0.0  ;;  %v5962_v37 = vmax.f32 %v3395_v35, 0.0 }
 0x686   :  { %3417 = vrot.lane.b32.xlu2 %v5962_v37, %s5037_s26  ;;  %v4950_v63 = vpack.i.bf16 %v5960_v62, %v5042_v9  ;;  %v3404_v8 = vmul.f32 %v5960_v62, %v5144_v23  ;;  %v3583_v3 = vmul.f32 %v5960_v62, %v5127_v14  ;;  %v3521_v6 = vmul.f32 %v5960_v62, %v5154_v27 }
 0x687   :  { %v3405_v25 = vmul.f32 %v5962_v37, %v5138_v21  ;;  %v3522_v45 = vmul.f32 %v5962_v37, %v5136_v20  ;;  %v3584_v44 = vmul.f32 %v5962_v37, %v5123_v13  ;;  %v3693_v36 = vmul.f32 %v5960_v62, %v5161_v30 }
 0x688   :  { %4951 = vrot.lane.b32.xlu1 %v4950_v63, %s5037_s26  ;;  %v4955_v41 = vpack.i.bf16 %v3404_v8, %v5146_v24  ;;  %v4965_v16 = vpack.i.bf16 %v3583_v3, %v5121_v12  ;;  %v4960_v61 = vpack.i.bf16 %v3521_v6, %v5159_v29  ;;  %v3694_v34 = vmul.f32 %v5962_v37, %v5168_v33 }
 0x689   :  { %v3755_v7 = vmul.f32 %v5960_v62, %v5180_v42  ;;  %v3756_v49 = vmul.f32 %v5962_v37, %v5189_v43  ;;  %v4975_v60 = vpack.i.bf16 %v5962_v37, %v5960_v62  ;;  %v3876_v54 = vmul.f32 %v5960_v62, %v5201_v48 }
 0x68a   :  { %4956 = vrot.lane.b32.xlu0 %v4955_v41, %s5036_s23  ;;  %v4970_v46 = vpack.i.bf16 %v3694_v34, %v3693_v36  ;;  %v3877_v55 = vmul.f32 %v5962_v37, %v5208_v51  ;;  %v4643_v36 = vld [vmem:[%s6187_s2 + $0x10] sm:$0xff] }
 0x68b   :  { %v4980_v47 = vpack.i.bf16 %v3756_v49, %v3755_v7 }
 0x68c   :  { %v4985_v52 = vpack.i.bf16 %v3877_v55, %v3876_v54 }
 0x68e   :  { %4966 = vrot.lane.b32.xlu2 %v4965_v16, %s5034_s3 }
 0x690   :  { %3472 = vrot.lane.b32.xlu1 %v3405_v25, %s5036_s23 }
 0x692   :  { %4961 = vrot.lane.b32.xlu0 %v4960_v61, %s5035_s22 }
 0x696   :  { %3767 = vrot.lane.b32.xlu2 %v5178_v40, %s5031_s19 }
 0x698   :  { %3532 = vrot.lane.b32.xlu1 %v3522_v45, %s5035_s22 }
 0x69a   :  { %3594 = vrot.lane.b32.xlu0 %v3584_v44, %s5034_s3 }
 0x69e   :  { %3758 = vrot.lane.b32.xlu2 %v5894_v4, %s5045_s10 }
 0x6a0   :  { %3826 = vrot.lane.b32.xlu1 %v5042_v9, %s5043_s9 }
 0x6a2   :  { %4971 = vrot.lane.b32.xlu0 %v4970_v46, %s5033_s21 }
 0x6a6   :  { %3888 = vrot.lane.b32.xlu2 %v5204_v50, %s5032_s20 }
 0x6a8   :  { %4981 = vrot.lane.b32.xlu1 %v4980_v47, %s5031_s19 }
 0x6aa   :  { %4976 = vrot.lane.b32.xlu0 %v4975_v60, %s5043_s9 }
 0x6b0   :  { %4986 = vrot.lane.b32.xlu1 %v4985_v52, %s5032_s20 }
 0x6b2   :  { %3817 = vrot.lane.b32.xlu0 %v5894_v4, %s5046_s11 }
 0x6b8   :  { %3941 = vperm.xlu1 %4990, %v4643_v36  }
 0x6ba   :  { %3879 = vrot.lane.b32.xlu0 %v5894_v4, %s5047_s12 }
 0x6c2   :  { %4319 = vrot.lane.b32.xlu0 %v5178_v40, %s5031_s19 }
 0x6ca   :  { %4257 = vrot.lane.b32.xlu0 %v5176_v38, %s5033_s21 }
 0x6e0   :  { %v3418_v39 = vpop.permute.xlu2 %3417 }
 0x6e8   :  { %v4967_v10 = vpop.permute.xlu2 %4966 }
 0x6e9   :  { %v4969_v57 = vunpack.i.h.bf16 %v4967_v10  ;;  %v4968_v56 = vunpack.i.l.bf16 %v4967_v10 }
 0x6eb   :  { %v3596_v11 = vsel %vm259_vm3, %v4968_v56, %v4969_v57 }
 0x6fa   :  { %v4952_v59 = vpop.permute.xlu1 %4951 }
 0x6fb   :  { %v4954_v19 = vunpack.i.h.bf16 %v4952_v59  ;;  %v4953_v28 = vunpack.i.l.bf16 %v4952_v59 }
 0x6fc   :  { %v4957_v0 = vpop.permute.xlu0 %4956 }
 0x6fd   :  { %v4959_v18 = vunpack.i.h.bf16 %v4957_v0  ;;  %v4958_v1 = vunpack.i.l.bf16 %v4957_v0  ;;  %v3419_v40 = vsel %vm57_vm6, %v4953_v28, %v4954_v19  ;;  %v3420_v38 = vsel %vm57_vm6, %v4954_v19, %v3418_v39 }
 0x6fe   :  { %3440 = vmatpush.msrb.mxu0 %v3419_v40  ;;  %3460 = vmatpush.msrb.mxu1 %v3420_v38 }
 0x6ff   :  { %4625 = vmatmul.msk.f32.vlgmr.msrb.gmra.mxu0 %vm62_vm7, %v3409_v58  ;;  %4626 = vmatmul.msk.f32.vlgmr.msrb.gmra.mxu1 %vm62_vm7, %v3409_v58  ;;  %v3474_v5 = vsel %vm114_vm5, %v4958_v1, %v4959_v18 }
 0x700   :  { %3495 = vmatpush.msrb.mxu2 %v3474_v5 }
 0x701   :  { %4627 = vmatmul.msk.f32.vlgmr.msrb.gmra.mxu2 %vm62_vm7, %v5894_v4 }
 0x702   :  { %3617 = vmatpush.msra.mxu2 %v3596_v11  ;;  %v3473_v32 = vpop.permute.xlu1 %3472 }
 0x703   :  { %v3475_v35 = vsel %vm114_vm5, %v4959_v18, %v3473_v32  ;;  %v6068_v18 = vld [vmem:[%s6186_s1 + $0x18] sm:$0xff] }
 0x704   :  { %v4962_v63 = vpop.permute.xlu0 %4961  ;;  %3515 = vmatpush.msrb.mxu3 %v3475_v35  ;;  %3960 = vrot.lane.b32.xlu1 %v6068_v18, %s5039_s30 }
 0x705   :  { %v4964_v8 = vunpack.i.h.bf16 %v4962_v63  ;;  %v4963_v41 = vunpack.i.l.bf16 %v4962_v63  ;;  %4628 = vmatmul.msk.f32.vlgmr.msrb.gmra.mxu3 %vm62_vm7, %v5894_v4  ;;  %v3768_v4 = vpop.permute.xlu2 %3767 }
 0x707   :  { %v3534_v3 = vsel %vm187_vm4, %v4963_v41, %v4964_v8 }
 0x708   :  { %3555 = vmatpush.msra.mxu0 %v3534_v3 }
 0x709   :  { %4629 = vmatmul.msk.f32.vlgmr.msra.gmra.mxu0 %vm62_vm7, %v3524_v26  ;;  %4631 = vmatmul.msk.f32.vlgmr.msra.gmra.mxu2 %vm62_vm7, %v3586_v2 }
 0x70a   :  { %3663 = vmatpush.msrb.mxu0 %v5960_v62  ;;  %v3533_v16 = vpop.permute.xlu1 %3532 }
 0x70b   :  { %v3535_v6 = vsel %vm187_vm4, %v4964_v8, %v3533_v16 }
 0x70c   :  { %v3595_v25 = vpop.permute.xlu0 %3594  ;;  %3575 = vmatpush.msra.mxu1 %v3535_v6  ;;  %4075 = vrot.lane.b32.xlu1 %v6068_v18, %s5043_s9 }
 0x70d   :  { %v3597_v61 = vsel %vm259_vm3, %v4969_v57, %v3595_v25  ;;  %4630 = vmatmul.msk.f32.vlgmr.msra.gmra.mxu1 %vm62_vm7, %v3524_v26  ;;  %v3759_v47 = vpop.permute.xlu2 %3758 }
 0x70e   :  { %3683 = vmatpush.msrb.mxu1 %v5962_v37  ;;  %3637 = vmatpush.msra.mxu3 %v3597_v61 }
 0x70f   :  { %4632 = vmatmul.msk.f32.vlgmr.msra.gmra.mxu3 %vm62_vm7, %v3586_v2 }
 0x711   :  { %4633 = vmatmul.msk.f32.vlgmr.msrb.gmra.mxu0 %vm62_vm7, %v3645_v53 }
 0x712   :  { %v3827_v45 = vpop.permute.xlu1 %3826 }
 0x714   :  { %v4972_v44 = vpop.permute.xlu0 %4971  ;;  %4196 = vrot.lane.b32.xlu1 %v6068_v18, %s5041_s6 }
 0x715   :  { %v4974_v34 = vunpack.i.h.bf16 %v4972_v44  ;;  %v4973_v46 = vunpack.i.l.bf16 %v4972_v44  ;;  %4634 = vmatmul.msk.f32.vlgmr.msrb.gmra.mxu1 %vm62_vm7, %v3645_v53  ;;  %v3889_v19 = vpop.permute.xlu2 %3888 }
 0x717   :  { %v3707_v7 = vsel %vm240_vm0, %v4973_v46, %v4974_v34  ;;  %v3708_v49 = vsel %vm240_vm0, %v4974_v34, %v3706_v15 }
 0x718   :  { %3728 = vmatpush.msrb.mxu2 %v3707_v7  ;;  %3748 = vmatpush.msrb.mxu3 %v3708_v49 }
 0x719   :  { %4635 = vmatmul.msk.f32.vlgmr.msrb.gmra.mxu2 %vm62_vm7, %v3697_v22  ;;  %4636 = vmatmul.msk.f32.vlgmr.msrb.gmra.mxu3 %vm62_vm7, %v3697_v22 }
 0x71a   :  { %v4982_v60 = vpop.permute.xlu1 %4981 }
 0x71b   :  { %v4984_v54 = vunpack.i.h.bf16 %v4982_v60  ;;  %v4983_v55 = vunpack.i.l.bf16 %v4982_v60 }
 0x71c   :  { %v4977_v52 = vpop.permute.xlu0 %4976  ;;  %4137 = vrot.lane.b32.xlu1 %v6068_v18, %s5040_s5 }
 0x71d   :  { %v4979_v58 = vunpack.i.h.bf16 %v4977_v52  ;;  %v4978_v2 = vunpack.i.l.bf16 %v4977_v52  ;;  %v3769_v53 = vsel %vm168_vm2, %v4983_v55, %v4984_v54  ;;  %v3770_v26 = vsel %vm168_vm2, %v4984_v54, %v3768_v4 }
 0x71e   :  { %3790 = vmatpush.msra.mxu0 %v3769_v53  ;;  %3810 = vmatpush.msra.mxu1 %v3770_v26 }
 0x71f   :  { %v3828_v39 = vsel %vm508_vm8, %v4978_v2, %v4979_v58  ;;  %v3829_v15 = vsel %vm508_vm8, %v4979_v58, %v3827_v45  ;;  %4637 = vmatmul.msk.f32.vlgmr.msra.gmra.mxu0 %vm62_vm7, %v3759_v47  ;;  %4638 = vmatmul.msk.f32.vlgmr.msra.gmra.mxu1 %vm62_vm7, %v3759_v47 }
 0x720   :  { %3849 = vmatpush.msra.mxu2 %v3828_v39  ;;  %3869 = vmatpush.msra.mxu3 %v3829_v15 }
 0x722   :  { %v4987_v22 = vpop.permute.xlu1 %4986 }
 0x723   :  { %v4989_v10 = vunpack.i.h.bf16 %v4987_v22  ;;  %v4988_v59 = vunpack.i.l.bf16 %v4987_v22 }
 0x724   :  { %v3818_v28 = vpop.permute.xlu0 %3817  ;;  %4310 = vrot.lane.b32.xlu1 %v6068_v18, %s5045_s10 }
 0x725   :  { %4639 = vmatmul.msk.f32.vlgmr.msra.gmra.mxu2 %vm62_vm7, %v3818_v28  ;;  %4640 = vmatmul.msk.f32.vlgmr.msra.gmra.mxu3 %vm62_vm7, %v3818_v28  ;;  %v3890_v57 = vsel %vm36_vm1, %v4988_v59, %v4989_v10  ;;  %v3891_v56 = vsel %vm36_vm1, %v4989_v10, %v3889_v19 }
 0x726   :  { %3911 = vmatpush.msrb.mxu0 %v3890_v57  ;;  %3931 = vmatpush.msrb.mxu1 %v3891_v56 }
 0x72a   :  { %v3942_v53 = vpop.permute.xlu1 %3941 }
 0x72c   :  { %v3880_v0 = vpop.permute.xlu0 %3879  ;;  %4248 = vrot.lane.b32.xlu1 %v6068_v18, %s5038_s29 }
 0x72d   :  { %4641 = vmatmul.msk.f32.vlgmr.msrb.gmra.mxu0 %vm62_vm7, %v3880_v0  ;;  %4642 = vmatmul.msk.f32.vlgmr.msrb.gmra.mxu1 %vm62_vm7, %v3880_v0 }
 0x734   :  { %4431 = vrot.lane.b32.xlu1 %v6068_v18, %s5047_s12 }
 0x73c   :  { %4369 = vrot.lane.b32.xlu1 %v6068_v18, %s5046_s11 }
 0x77c   :  { %v3442_v1 = vpop.f32.mrf.mxu0  ;;  %v3462_v40 = vpop.f32.mrf.mxu1 }
 0x784   :  { %v3497_v38 = vpop.f32.mrf.mxu2 }
 0x785   :  { %v3498_v35 = vadd.f32 %v3497_v38, %v3442_v1 }
 0x786   :  { %v3557_v5 = vpop.f32.mrf.mxu0 }
 0x787   :  { %v3580_v6 = vadd.f32 %v3557_v5, %v3498_v35 }
 0x788   :  { %v3517_v11 = vpop.f32.mrf.mxu3 }
 0x789   :  { %v3518_v63 = vadd.f32 %v3517_v11, %v3462_v40 }
 0x78a   :  { %v3577_v32 = vpop.f32.mrf.mxu1 }
 0x78b   :  { %v3581_v25 = vadd.f32 %v3577_v32, %v3518_v63  ;;  %v4320_v63 = vpop.permute.xlu0 %4319 }
 0x78c   :  { %v3619_v8 = vpop.f32.mrf.mxu2 }
 0x78d   :  { %v3642_v61 = vadd.f32 %v3619_v8, %v3580_v6 }
 0x78e   :  { %v3665_v3 = vpop.f32.mrf.mxu0 }
 0x78f   :  { %v3688_v36 = vadd.f32 %v3665_v3, %v3642_v61 }
 0x792   :  { %v3639_v41 = vpop.f32.mrf.mxu3  ;;  %v3685_v16 = vpop.f32.mrf.mxu1 }
 0x793   :  { %v3643_v4 = vadd.f32 %v3639_v41, %v3581_v25  ;;  %v4258_v25 = vpop.permute.xlu0 %4257 }
 0x795   :  { %v3689_v34 = vadd.f32 %v3685_v16, %v3643_v4 }
 0x79c   :  { %v3730_v45 = vpop.f32.mrf.mxu2  ;;  %v3750_v44 = vpop.f32.mrf.mxu3 }
 0x79d   :  { %v3792_v46 = vpop.f32.mrf.mxu0  ;;  %v3812_v7 = vpop.f32.mrf.mxu1  ;;  %v3753_v49 = vadd.f32 %v3730_v45, %v3688_v36  ;;  %v3754_v47 = vadd.f32 %v3750_v44, %v3689_v34 }
 0x79f   :  { %v3815_v60 = vadd.f32 %v3792_v46, %v3753_v49  ;;  %v3816_v54 = vadd.f32 %v3812_v7, %v3754_v47 }
 0x7a8   :  { %v3851_v55 = vpop.f32.mrf.mxu2  ;;  %v3871_v52 = vpop.f32.mrf.mxu3 }
 0x7a9   :  { %v3874_v58 = vadd.f32 %v3851_v55, %v3815_v60  ;;  %v3875_v2 = vadd.f32 %v3871_v52, %v3816_v54 }
 0x7aa   :  { %v3913_v26 = vpop.f32.mrf.mxu0  ;;  %v3933_v39 = vpop.f32.mrf.mxu1 }
 0x7ab   :  { %v3936_v15 = vadd.f32 %v3913_v26, %v3874_v58  ;;  %v3937_v22 = vadd.f32 %v3933_v39, %v3875_v2 }
 0x7ad   :  { %v3944_v10 = vadd.f32 %v3942_v53, %v3936_v15  ;;  %v3945_v59 = vadd.f32 %v3942_v53, %v3937_v22 }
 0x7af   :  { %v3946_v19 = vadd.f32 %v3944_v10, %v5960_v62  ;;  %v3947_v28 = vadd.f32 %v3945_v59, %v5962_v37 }
 0x7b1   :  { %v3948_v57 = vmax.f32 %v3946_v19, 0.0  ;;  %v6086_v56 = vmax.f32 %v3947_v28, 0.0 }
 0x7b3   :  { %3969 = vrot.lane.b32.xlu0 %v6086_v56, %s5037_s26  ;;  %v4991_v0 = vpack.i.bf16 %v3948_v57, %v5042_v9  ;;  %v4073_v1 = vmul.f32 %v3948_v57, %v5154_v27  ;;  %v4074_v62 = vmul.f32 %v6086_v56, %v5136_v20  ;;  %v3956_v40 = vmul.f32 %v3948_v57, %v5144_v23 }
 0x7b4   :  { %v3957_v38 = vmul.f32 %v6086_v56, %v5138_v21  ;;  %v4135_v5 = vmul.f32 %v3948_v57, %v5127_v14  ;;  %v4136_v20 = vmul.f32 %v6086_v56, %v5123_v13  ;;  %v4307_v23 = vmul.f32 %v3948_v57, %v5180_v42 }
 0x7b5   :  { %4992 = vrot.lane.b32.xlu2 %v4991_v0, %s5037_s26  ;;  %v4996_v37 = vpack.i.bf16 %v4073_v1, %v5159_v29  ;;  %v5001_v27 = vpack.i.bf16 %v3956_v40, %v5146_v24  ;;  %v4308_v21 = vmul.f32 %v6086_v56, %v5189_v43  ;;  %v4245_v14 = vmul.f32 %v3948_v57, %v5161_v30 }
 0x7b6   :  { %v5006_v29 = vpack.i.bf16 %v4135_v5, %v5121_v12  ;;  %v4246_v13 = vmul.f32 %v6086_v56, %v5168_v33  ;;  %v4428_v42 = vmul.f32 %v3948_v57, %v5201_v48  ;;  %v4429_v43 = vmul.f32 %v6086_v56, %v5208_v51 }
 0x7b7   :  { %v5011_v24 = vpack.i.bf16 %v4308_v21, %v4307_v23  ;;  %v5026_v33 = vpack.i.bf16 %v6086_v56, %v3948_v57 }
 0x7b8   :  { %v5016_v12 = vpack.i.bf16 %v4246_v13, %v4245_v14  ;;  %v5021_v30 = vpack.i.bf16 %v4429_v43, %v4428_v42 }
 0x7bb   :  { %4084 = vrot.lane.b32.xlu0 %v4074_v62, %s5035_s22 }
 0x7bd   :  { %4997 = vrot.lane.b32.xlu2 %v4996_v37, %s5035_s22 }
 0x7c3   :  { %4024 = vrot.lane.b32.xlu0 %v3957_v38, %s5036_s23 }
 0x7c5   :  { %5002 = vrot.lane.b32.xlu2 %v5001_v27, %s5036_s23 }
 0x7cb   :  { %4146 = vrot.lane.b32.xlu0 %v4136_v20, %s5034_s3 }
 0x7cd   :  { %5007 = vrot.lane.b32.xlu2 %v5006_v29, %s5034_s3 }
 0x7d3   :  { %4440 = vrot.lane.b32.xlu0 %v5204_v50, %s5032_s20  ;;  %v4663_v50 = vld [vmem:[%s6187_s2 + $0x18] sm:$0xff] }
 0x7d5   :  { %5012 = vrot.lane.b32.xlu2 %v5011_v24, %s5031_s19 }
 0x7db   :  { %4378 = vrot.lane.b32.xlu0 %v5042_v9, %s5043_s9  ;;  %v3961_v9 = vpop.permute.xlu1 %3960 }
 0x7dd   :  { %5017 = vrot.lane.b32.xlu2 %v5016_v12, %s5033_s21 }
 0x7e3   :  { %4493 = vperm.xlu0 %4723, %v4663_v50   ;;  %v4076_v11 = vpop.permute.xlu1 %4075 }
 0x7e5   :  { %5022 = vrot.lane.b32.xlu2 %v5021_v30, %s5032_s20 }
 0x7eb   :  { %v4197_v41 = vpop.permute.xlu1 %4196 }
 0x7ed   :  { %5027 = vrot.lane.b32.xlu2 %v5026_v33, %s5043_s9 }
 0x7f3   :  { %v4138_v44 = vpop.permute.xlu1 %4137 }
 0x7f5   :  { %2288 = vperm.xlu2 %4764, %v4663_v50  }
 0x7fb   :  { %v4311_v54 = vpop.permute.xlu1 %4310 }
 0x803   :  { %v4249_v22 = vpop.permute.xlu1 %4248 }
 0x80b   :  { %v4432_v62 = vpop.permute.xlu1 %4431 }
 0x80f   :  { %v4993_v32 = vpop.permute.xlu2 %4992 }
 0x810   :  { %v4995_v48 = vunpack.i.h.bf16 %v4993_v32  ;;  %v4994_v35 = vunpack.i.l.bf16 %v4993_v32 }
 0x812   :  { %v3971_v51 = vsel %vm57_vm6, %v4994_v35, %v4995_v48 }
 0x813   :  { %3992 = vmatpush.msrb.mxu2 %v3971_v51  ;;  %v4370_v21 = vpop.permute.xlu1 %4369 }
 0x814   :  { %4645 = vmatmul.msk.f32.vlgmr.msrb.gmra.mxu2 %vm62_vm7, %v3961_v9 }
 0x817   :  { %v4998_v8 = vpop.permute.xlu2 %4997 }
 0x818   :  { %v5000_v3 = vunpack.i.h.bf16 %v4998_v8  ;;  %v4999_v16 = vunpack.i.l.bf16 %v4998_v8 }
 0x81a   :  { %v4086_v6 = vsel %vm187_vm4, %v4999_v16, %v5000_v3 }
 0x81b   :  { %4107 = vmatpush.msra.mxu2 %v4086_v6 }
 0x81c   :  { %4649 = vmatmul.msk.f32.vlgmr.msra.gmra.mxu2 %vm62_vm7, %v4076_v11 }
 0x81d   :  { %4215 = vmatpush.msrb.mxu2 %v3948_v57 }
 0x81f   :  { %v5003_v61 = vpop.permute.xlu2 %5002 }
 0x820   :  { %v5005_v4 = vunpack.i.h.bf16 %v5003_v61  ;;  %v5004_v45 = vunpack.i.l.bf16 %v5003_v61 }
 0x822   :  { %v4026_v36 = vsel %vm114_vm5, %v5004_v45, %v5005_v4 }
 0x823   :  { %4047 = vmatpush.msra.mxu0 %v4026_v36 }
 0x824   :  { %4647 = vmatmul.msk.f32.vlgmr.msra.gmra.mxu0 %vm62_vm7, %v6068_v18  ;;  %4653 = vmatmul.msk.f32.vlgmr.msrb.gmra.mxu2 %vm62_vm7, %v4197_v41 }
 0x825   :  { %v3970_v34 = vpop.permute.xlu0 %3969 }
 0x826   :  { %v3972_v46 = vsel %vm57_vm6, %v4995_v48, %v3970_v34 }
 0x827   :  { %4012 = vmatpush.msrb.mxu3 %v3972_v46  ;;  %v5008_v7 = vpop.permute.xlu2 %5007 }
 0x828   :  { %v5010_v49 = vunpack.i.h.bf16 %v5008_v7  ;;  %v5009_v47 = vunpack.i.l.bf16 %v5008_v7  ;;  %4646 = vmatmul.msk.f32.vlgmr.msrb.gmra.mxu3 %vm62_vm7, %v3961_v9 }
 0x82a   :  { %v4148_v60 = vsel %vm259_vm3, %v5009_v47, %v5010_v49 }
 0x82b   :  { %4169 = vmatpush.msrb.mxu0 %v4148_v60 }
 0x82c   :  { %4651 = vmatmul.msk.f32.vlgmr.msrb.gmra.mxu0 %vm62_vm7, %v4138_v44 }
 0x82d   :  { %v4085_v55 = vpop.permute.xlu0 %4084 }
 0x82e   :  { %v4087_v52 = vsel %vm187_vm4, %v5000_v3, %v4085_v55 }
 0x82f   :  { %4127 = vmatpush.msra.mxu3 %v4087_v52  ;;  %v5013_v58 = vpop.permute.xlu2 %5012 }
 0x830   :  { %v5015_v2 = vunpack.i.h.bf16 %v5013_v58  ;;  %v5014_v53 = vunpack.i.l.bf16 %v5013_v58  ;;  %4650 = vmatmul.msk.f32.vlgmr.msra.gmra.mxu3 %vm62_vm7, %v4076_v11 }
 0x831   :  { %4235 = vmatpush.msrb.mxu3 %v6086_v56 }
 0x832   :  { %v4321_v26 = vsel %vm168_vm2, %v5014_v53, %v5015_v2  ;;  %v4322_v39 = vsel %vm168_vm2, %v5015_v2, %v4320_v63 }
 0x833   :  { %4342 = vmatpush.msra.mxu2 %v4321_v26  ;;  %4362 = vmatpush.msra.mxu3 %v4322_v39 }
 0x834   :  { %4657 = vmatmul.msk.f32.vlgmr.msra.gmra.mxu2 %vm62_vm7, %v4311_v54 }
 0x835   :  { %v4025_v15 = vpop.permute.xlu0 %4024 }
 0x836   :  { %v4027_v10 = vsel %vm114_vm5, %v5005_v4, %v4025_v15 }
 0x837   :  { %v5018_v59 = vpop.permute.xlu2 %5017  ;;  %4067 = vmatpush.msra.mxu1 %v4027_v10 }
 0x838   :  { %v5020_v19 = vunpack.i.h.bf16 %v5018_v59  ;;  %v5019_v28 = vunpack.i.l.bf16 %v5018_v59  ;;  %4648 = vmatmul.msk.f32.vlgmr.msra.gmra.mxu1 %vm62_vm7, %v6068_v18  ;;  %4654 = vmatmul.msk.f32.vlgmr.msrb.gmra.mxu3 %vm62_vm7, %v4197_v41 }
 0x83a   :  { %v4259_v57 = vsel %vm240_vm0, %v5019_v28, %v5020_v19  ;;  %v4260_v38 = vsel %vm240_vm0, %v5020_v19, %v4258_v25 }
 0x83b   :  { %4280 = vmatpush.msra.mxu0 %v4259_v57 }
 0x83c   :  { %4655 = vmatmul.msk.f32.vlgmr.msra.gmra.mxu0 %vm62_vm7, %v4249_v22 }
 0x83d   :  { %v4147_v56 = vpop.permute.xlu0 %4146 }
 0x83e   :  { %v4149_v0 = vsel %vm259_vm3, %v5010_v49, %v4147_v56 }
 0x83f   :  { %v5023_v1 = vpop.permute.xlu2 %5022  ;;  %4189 = vmatpush.msrb.mxu1 %v4149_v0 }
 0x840   :  { %v5025_v37 = vunpack.i.h.bf16 %v5023_v1  ;;  %v5024_v40 = vunpack.i.l.bf16 %v5023_v1  ;;  %4652 = vmatmul.msk.f32.vlgmr.msrb.gmra.mxu1 %vm62_vm7, %v4138_v44  ;;  %4658 = vmatmul.msk.f32.vlgmr.msra.gmra.mxu3 %vm62_vm7, %v4311_v54 }
 0x841   :  { %4300 = vmatpush.msra.mxu1 %v4260_v38 }
 0x842   :  { %v4442_v18 = vsel %vm36_vm1, %v5024_v40, %v5025_v37 }
 0x843   :  { %4463 = vmatpush.msrb.mxu2 %v4442_v18 }
 0x844   :  { %4661 = vmatmul.msk.f32.vlgmr.msrb.gmra.mxu2 %vm62_vm7, %v4432_v62 }
 0x845   :  { %v4441_v27 = vpop.permute.xlu0 %4440 }
 0x846   :  { %v4443_v5 = vsel %vm36_vm1, %v5025_v37, %v4441_v27 }
 0x847   :  { %v5028_v20 = vpop.permute.xlu2 %5027  ;;  %4483 = vmatpush.msrb.mxu3 %v4443_v5 }
 0x848   :  { %v5030_v29 = vunpack.i.h.bf16 %v5028_v20  ;;  %v5029_v23 = vunpack.i.l.bf16 %v5028_v20  ;;  %4656 = vmatmul.msk.f32.vlgmr.msra.gmra.mxu1 %vm62_vm7, %v4249_v22  ;;  %4662 = vmatmul.msk.f32.vlgmr.msrb.gmra.mxu3 %vm62_vm7, %v4432_v62 }
 0x84a   :  { %v4380_v24 = vsel %vm508_vm8, %v5029_v23, %v5030_v29 }
 0x84b   :  { %4401 = vmatpush.msrb.mxu0 %v4380_v24 }
 0x84c   :  { %4659 = vmatmul.msk.f32.vlgmr.msrb.gmra.mxu0 %vm62_vm7, %v4370_v21 }
 0x84d   :  { %v4379_v14 = vpop.permute.xlu0 %4378 }
 0x84e   :  { %v4381_v13 = vsel %vm508_vm8, %v5030_v29, %v4379_v14 }
 0x84f   :  { %v2289_v12 = vpop.permute.xlu2 %2288  ;;  %4421 = vmatpush.msrb.mxu1 %v4381_v13 }
 0x850   :  { %v2291_v42 = vadd.f32 %v2289_v12, %v5820_v17  ;;  %v2292_v43 = vadd.f32 %v2289_v12, %v5822_v31  ;;  %4660 = vmatmul.msk.f32.vlgmr.msrb.gmra.mxu1 %vm62_vm7, %v4370_v21 }
 0x852   :  { %2293 = vst [vmem:[%s6188_s4] sm:$0xff] %v2291_v42 }
 0x853   :  { %2294 = vst [vmem:[%s6188_s4 + $0x8] sm:$0xff] %v2292_v43 }
 0x855   :  { %v4494_v55 = vpop.permute.xlu0 %4493 }
 0x897   :  { %v3994_v50 = vpop.f32.mrf.mxu2 }
 0x89f   :  { %v4109_v9 = vpop.f32.mrf.mxu2 }
 0x8a1   :  { %v4049_v33 = vpop.f32.mrf.mxu0 }
 0x8a2   :  { %v4050_v48 = vadd.f32 %v4049_v33, %v3994_v50 }
 0x8a4   :  { %v4132_v51 = vadd.f32 %v4109_v9, %v4050_v48 }
 0x8a7   :  { %v4217_v35 = vpop.f32.mrf.mxu2 }
 0x8a9   :  { %v4171_v17 = vpop.f32.mrf.mxu0 }
 0x8aa   :  { %v4194_v41 = vadd.f32 %v4171_v17, %v4132_v51 }
 0x8ab   :  { %v4014_v30 = vpop.f32.mrf.mxu3 }
 0x8ac   :  { %v4240_v25 = vadd.f32 %v4217_v35, %v4194_v41 }
 0x8b3   :  { %v4129_v11 = vpop.f32.mrf.mxu3 }
 0x8b5   :  { %v4069_v32 = vpop.f32.mrf.mxu1 }
 0x8b6   :  { %v4070_v63 = vadd.f32 %v4069_v32, %v4014_v30 }
 0x8b7   :  { %v4344_v6 = vpop.f32.mrf.mxu2 }
 0x8b8   :  { %v4133_v3 = vadd.f32 %v4129_v11, %v4070_v63 }
 0x8b9   :  { %v4282_v16 = vpop.f32.mrf.mxu0 }
 0x8ba   :  { %v4305_v4 = vadd.f32 %v4282_v16, %v4240_v25 }
 0x8bb   :  { %v4237_v31 = vpop.f32.mrf.mxu3 }
 0x8bc   :  { %v4367_v34 = vadd.f32 %v4344_v6, %v4305_v4 }
 0x8bd   :  { %v4191_v8 = vpop.f32.mrf.mxu1 }
 0x8be   :  { %v4195_v61 = vadd.f32 %v4191_v8, %v4133_v3 }
 0x8c0   :  { %v4241_v36 = vadd.f32 %v4237_v31, %v4195_v61 }
 0x8c3   :  { %v4364_v45 = vpop.f32.mrf.mxu3 }
 0x8c5   :  { %v4302_v44 = vpop.f32.mrf.mxu1 }
 0x8c6   :  { %v4306_v46 = vadd.f32 %v4302_v44, %v4241_v36 }
 0x8c7   :  { %v4465_v49 = vpop.f32.mrf.mxu2 }
 0x8c8   :  { %v4368_v54 = vadd.f32 %v4364_v45, %v4306_v46 }
 0x8c9   :  { %v4403_v7 = vpop.f32.mrf.mxu0 }
 0x8ca   :  { %v4426_v47 = vadd.f32 %v4403_v7, %v4367_v34 }
 0x8cb   :  { %v4485_v53 = vpop.f32.mrf.mxu3 }
 0x8cc   :  { %v4488_v60 = vadd.f32 %v4465_v49, %v4426_v47 }
 0x8cd   :  { %v4423_v52 = vpop.f32.mrf.mxu1 }
 0x8ce   :  { %v4496_v58 = vadd.f32 %v4494_v55, %v4488_v60  ;;  %v4427_v2 = vadd.f32 %v4423_v52, %v4368_v54 }
 0x8d0   :  { %4664 = vst [vmem:[%s6188_s4 + $0x10] sm:$0xff] %v4496_v58  ;;  %v4489_v26 = vadd.f32 %v4485_v53, %v4427_v2 }
 0x8d2   :  { %v4497_v39 = vadd.f32 %v4494_v55, %v4489_v26 }
 0x8d4   :  { %4665 = vst [vmem:[%s6188_s4 + $0x18] sm:$0xff] %v4497_v39 }

</bundles_post_ra>
